<compile_context>
chip_gen: v7x
topology: tpu7x:2x2x1
jax: 0.10.0
libtpu: 0.0.40
codegen_flags: <defaults>
</compile_context>

<pallas_src>
import jax
import jax.numpy as jnp
from jax import lax
from jax.experimental import pallas as pl
from jax.experimental.pallas import tpu as pltpu

MEM_UNITS = 32            # config['mem-units']
NUM_ACTIONS = 6           # num_actions
OBS_HW = 132              # forced by Linear(7200, 256): 32 * 15 * 15 = 7200
FEAT_DIM = 256
LSTM_IN = FEAT_DIM + NUM_ACTIONS + 1
GATES = 4 * MEM_UNITS     # 128

NUM_C2 = 32               # conv2 output channels
CK = 20                   # composite (conv2 o conv1) kernel: 8 + (4-1)*4
CS = 8                    # composite stride: 4 * 2
OUT_HW = 15               # (132 - 20)//8 + 1
NPOS = OUT_HW * OUT_HW    # 225 output positions
FLAT_DIM = NUM_C2 * NPOS  # 7200 (NCHW flatten)

# ---- layout of the packed small-parameter matrix (PACK_ROWS x 128, bf16) ----
WX_OFF = 0                                       # rows   0..255: W_ih[:, :256].T
WD_OFF = FEAT_DIM                                # rows 256..295: [W_ih act cols.T;
XD_LANES = NUM_ACTIONS + 1 + MEM_UNITS + 1       #   W_ih reward col.T; W_hh.T; b_ih+b_hh]
HW_OFF = WD_OFF + XD_LANES                       # rows 296..327: [actor_w.T | critic_w.T | 0]
HB_OFF = HW_OFF + MEM_UNITS                      # row  328     : [actor_b | critic_b | 0]
PACK_ROWS = 336                                  # padded to a multiple of 8

# ---- layout of the dynamic-input row (1 x 128, f32) -------------------------
# lanes 0..5 p_action, 6 p_reward, 7..38 h0, 39 = 1.0 (gate-bias lane),
# 64..95 c0, rest zero.
C0_LANE = 64

# ---- layout of the packed output row (1 x 128, f32) -------------------------
# lanes 0..5 logits, 6 value, 64..95 h_n, 96..127 c_n, rest zero.
H_OUT = 64
C_OUT = 96


# ------------------------------ Pallas kernel --------------------------------

def _fused_kernel(flat_ref, fcw_ref, fcb_ref, pp_ref, dyn_ref, out_ref):
    H = MEM_UNITS

    # Linear(7200, 256) + ReLU.  fcb already contains the folded conv bias.
    acc = jnp.dot(flat_ref[...], fcw_ref[...],
                  preferred_element_type=jnp.float32)           # (1, 256) f32
    feats = jnp.maximum(acc + fcb_ref[...], 0.0)

    # Single-step LSTM cell.  W_ih is split column-wise (feature cols vs.
    # action/reward cols), W_hh and the gate bias ride along in the small
    # input row (bias via the constant 1.0 lane) — mathematically identical
    # to gates = cat(feats, p_act, p_rew) @ W_ih.T + h0 @ W_hh.T + b.
    xd = dyn_ref[:, 0:XD_LANES]                                  # (1, 40) f32
    gates = (
        jnp.dot(feats.astype(jnp.bfloat16),
                pp_ref[WX_OFF:WX_OFF + FEAT_DIM, :],
                preferred_element_type=jnp.float32)
        + jnp.dot(xd.astype(jnp.bfloat16),
                  pp_ref[WD_OFF:WD_OFF + XD_LANES, :],
                  preferred_element_type=jnp.float32)
    )                                                            # (1, 128) f32

    i = jax.nn.sigmoid(gates[:, 0 * H:1 * H])
    f = jax.nn.sigmoid(gates[:, 1 * H:2 * H])
    g = jnp.tanh(gates[:, 2 * H:3 * H])
    o = jax.nn.sigmoid(gates[:, 3 * H:4 * H])

    c0 = dyn_ref[:, C0_LANE:C0_LANE + H]
    c_new = f * c0 + i * g
    h_new = o * jnp.tanh(c_new)

    # Actor + critic as one (32, 128) matmul: lanes 0..5 logits, lane 6 value.
    head = (jnp.dot(h_new.astype(jnp.bfloat16),
                    pp_ref[HW_OFF:HW_OFF + H, :],
                    preferred_element_type=jnp.float32)
            + pp_ref[HB_OFF:HB_OFF + 1, :].astype(jnp.float32))  # (1, 128)

    # Single lane-dense (1, 128) output row: [logits|value|0|h|c].
    out_ref[...] = jnp.concatenate([head[:, 0:H_OUT], h_new, c_new], axis=-1)


def _fused_call(packed, flat, dyn):
    c2 = lambda i: (0, 0)
    return pl.pallas_call(
        _fused_kernel,
        out_shape=jax.ShapeDtypeStruct((1, 128), jnp.float32),
        grid_spec=pltpu.PrefetchScalarGridSpec(
            num_scalar_prefetch=0,
            grid=(1,),
            in_specs=[
                pl.BlockSpec((1, FLAT_DIM), c2),          # flat conv output (bf16)
                pl.BlockSpec((FLAT_DIM, FEAT_DIM), c2),   # fc weight (bf16)
                pl.BlockSpec((1, FEAT_DIM), c2),          # fc bias + folded conv bias
                pl.BlockSpec((PACK_ROWS, GATES), c2),     # packed LSTM/head params
                pl.BlockSpec((1, 128), c2),               # packed dynamic inputs
            ],
            out_specs=pl.BlockSpec((1, 128), c2),
        ),
        compiler_params=pltpu.CompilerParams(
            dimension_semantics=("arbitrary",),
            vmem_limit_bytes=32 * 1024 * 1024,
        ),
    )(flat, packed['fcw'], packed['fcb'], packed['pp'], dyn)


# ------------------------- one-time weight packing ----------------------------

def prepare_params(params):
    """One-time packing (NOT per step): compose the two convs, fold biases,
    transpose / concatenate / bf16-cast the weights."""
    hp = lax.Precision.HIGHEST
    w1, b1 = params['conv1_w'], params['conv1_b']
    w2, b2 = params['conv2_w'], params['conv2_b']

    # conv2 o conv1 -> single 20x20 / stride-8 conv.  Exact: the module has no
    # nonlinearity between the two Conv2d layers.
    w12 = jnp.zeros((NUM_C2, 3, CK, CK), jnp.float32)
    for kh in range(4):
        for kw in range(4):
            tap = jnp.einsum('om,mcrs->ocrs', w2[:, :, kh, kw], w1,
                             precision=hp)
            w12 = w12.at[:, :, 4 * kh:4 * kh + 8, 4 * kw:4 * kw + 8].add(tap)
    b12 = jnp.einsum('omhw,m->o', w2, b1, precision=hp) + b2        # (32,)

    # Fold the (spatially constant) conv bias through the Linear layer into its
    # bias: flat @ fc_w.T = flat_nobias @ fc_w.T + b12_rep @ fc_w.T  (exact, f32).
    b12_rep = jnp.repeat(b12, NPOS)                                  # (7200,) NCHW order
    fcb_eff = params['fc_b'] + jnp.einsum('k,ok->o', b12_rep, params['fc_w'],
                                          precision=hp)              # (256,)

    # LSTM + head small-parameter pack (PACK_ROWS x 128).
    w_ih = params['lstm_w_ih']                                       # (128, 263)
    w_hh = params['lstm_w_hh']                                       # (128, 32)
    wx = w_ih[:, :FEAT_DIM].T                                        # (256, 128)
    wd = jnp.concatenate([
        w_ih[:, FEAT_DIM:FEAT_DIM + NUM_ACTIONS].T,                  # (6, 128)
        w_ih[:, FEAT_DIM + NUM_ACTIONS:].T,                          # (1, 128)
        w_hh.T,                                                      # (32, 128)
        (params['lstm_b_ih'] + params['lstm_b_hh']).reshape(1, GATES),
    ], axis=0)                                                       # (40, 128)
    headw = jnp.zeros((MEM_UNITS, GATES), jnp.float32)
    headw = headw.at[:, :NUM_ACTIONS].set(params['actor_w'].T)       # (32, 6)
    headw = headw.at[:, NUM_ACTIONS:NUM_ACTIONS + 1].set(params['critic_w'].T)
    headb = jnp.zeros((1, GATES), jnp.float32)
    headb = headb.at[0, :NUM_ACTIONS].set(params['actor_b'])
    headb = headb.at[0, NUM_ACTIONS].set(params['critic_b'][0])
    pp = jnp.concatenate(
        [wx, wd, headw, headb,
         jnp.zeros((PACK_ROWS - HB_OFF - 1, GATES), jnp.float32)], axis=0)

    return {
        'w12': w12.astype(jnp.bfloat16),                  # (32, 3, 20, 20)
        'fcw': params['fc_w'].T.astype(jnp.bfloat16),     # (7200, 256)
        'fcb': fcb_eff.reshape(1, FEAT_DIM).astype(jnp.float32),
        'pp':  pp.astype(jnp.bfloat16),                   # (336, 128)
    }


# --------------------------------- forward -----------------------------------

@jax.jit
def _forward_impl(packed, obs, p_act, p_rew, h0, c0):
    # Composite conv runs host-side as a real conv (bf16 operands, f32 acc);
    # its 29 KiB output is the only large activation crossing HBM.
    y2 = lax.conv_general_dilated(
        obs.astype(jnp.bfloat16), packed['w12'],
        window_strides=(CS, CS), padding='VALID',
        dimension_numbers=('NCHW', 'OIHW', 'NCHW'),
        preferred_element_type=jnp.float32)               # (1, 32, 15, 15)
    flat = y2.reshape(1, FLAT_DIM).astype(jnp.bfloat16)   # NCHW flatten

    # Pack the 4 dynamic inputs into one 128-lane row (one DMA instead of 4).
    dyn = jnp.concatenate([
        p_act, p_rew, h0,
        jnp.ones((1, 1), jnp.float32),                    # gate-bias lane
        jnp.zeros((1, C0_LANE - XD_LANES), jnp.float32),
        c0,
        jnp.zeros((1, 128 - C0_LANE - MEM_UNITS), jnp.float32),
    ], axis=-1)                                           # (1, 128)

    out = _fused_call(packed, flat, dyn)                  # (1, 128)
    logits = out[:, 0:NUM_ACTIONS]
    value = out[:, NUM_ACTIONS:NUM_ACTIONS + 1]
    h = out[:, H_OUT:H_OUT + MEM_UNITS]
    c = out[:, C_OUT:C_OUT + MEM_UNITS]
    return logits, value, h, c


def a3c_lstm_forward(packed, obs, p_input, mem_state=None):
    if mem_state is None:
        mem_state = (jnp.zeros((1, 1, MEM_UNITS), jnp.float32),
                     jnp.zeros((1, 1, MEM_UNITS), jnp.float32))
    p_act, p_rew = p_input
    h0 = mem_state[0].reshape(1, MEM_UNITS)
    c0 = mem_state[1].reshape(1, MEM_UNITS)
    logits, value, h, c = _forward_impl(packed, obs, p_act, p_rew, h0, c0)
    return (logits.reshape(1, 1, NUM_ACTIONS),
            value.reshape(1, 1, 1),
            (h.reshape(1, 1, MEM_UNITS), c.reshape(1, 1, MEM_UNITS)))


# ------------------------- pure-JAX reference (check) ------------------------

def _ref_im2col(x, k, s):
    # gather-based im2col: reference only (never used per-step).
    C, Hh, Ww = x.shape
    OH = (Hh - k) // s + 1
    OW = (Ww - k) // s + 1
    rows = (jnp.arange(OH) * s)[:, None] + jnp.arange(k)[None, :]
    cols = (jnp.arange(OW) * s)[:, None] + jnp.arange(k)[None, :]
    p = x[:, rows[:, :, None, None], cols[None, None, :, :]]   # (C,OH,k,OW,k)
    p = jnp.transpose(p, (1, 3, 0, 2, 4))                      # (OH,OW,C,k,k)
    return p.reshape(OH * OW, C * k * k), OH, OW


def reference_forward(params, obs, p_input, mem_state=None):
    H = MEM_UNITS
    if mem_state is None:
        mem_state = (jnp.zeros((1, 1, H), jnp.float32),
                     jnp.zeros((1, 1, H), jnp.float32))
    p_act, p_rew = p_input
    with jax.default_matmul_precision('float32'):
        x = obs[0]
        pt1, oh1, ow1 = _ref_im2col(x, 8, 4)
        y1 = pt1 @ params['conv1_w'].reshape(16, -1).T + params['conv1_b'][None, :]
        y1 = y1.T.reshape(16, oh1, ow1)
        pt2, oh2, ow2 = _ref_im2col(y1, 4, 2)
        y2 = pt2 @ params['conv2_w'].reshape(32, -1).T + params['conv2_b'][None, :]
        flat = y2.T.reshape(1, -1)
        feats = jnp.maximum(flat @ params['fc_w'].T + params['fc_b'][None, :], 0.0)
        xin = jnp.concatenate([feats, p_act, p_rew], axis=-1)
        h0 = mem_state[0].reshape(1, H)
        c0 = mem_state[1].reshape(1, H)
        gates = (xin @ params['lstm_w_ih'].T + h0 @ params['lstm_w_hh'].T
                 + params['lstm_b_ih'][None, :] + params['lstm_b_hh'][None, :])
        i = jax.nn.sigmoid(gates[:, :H])
        f = jax.nn.sigmoid(gates[:, H:2 * H])
        g = jnp.tanh(gates[:, 2 * H:3 * H])
        o = jax.nn.sigmoid(gates[:, 3 * H:])
        c = f * c0 + i * g
        h = o * jnp.tanh(c)
        logits = h @ params['actor_w'].T + params['actor_b'][None, :]
        value = h @ params['critic_w'].T + params['critic_b'][None, :]
    return (logits.reshape(1, 1, NUM_ACTIONS), value.reshape(1, 1, 1),
            (h.reshape(1, 1, H), c.reshape(1, 1, H)))


# ------------------------------- params / main --------------------------------

def init_params(key):
    ks = jax.random.split(key, 12)

    def w(k, shape, scale):
        return (scale * jax.random.normal(k, shape)).astype(jnp.float32)

    # TODO(synk): actor/critic use orthogonal init in the reference; a scaled
    # Gaussian is used here (init scheme does not change forward semantics).
    return {
        'conv1_w': w(ks[0], (16, 3, 8, 8), 0.05),
        'conv1_b': w(ks[7], (16,), 0.1),
        'conv2_w': w(ks[1], (32, 16, 4, 4), 0.05),
        'conv2_b': w(ks[8], (32,), 0.1),
        'fc_w': w(ks[2], (FEAT_DIM, FLAT_DIM), 0.01),
        'fc_b': w(ks[9], (FEAT_DIM,), 0.1),
        'lstm_w_ih': w(ks[3], (GATES, LSTM_IN), 0.05),
        'lstm_w_hh': w(ks[4], (GATES, MEM_UNITS), 0.05),
        'lstm_b_ih': w(ks[10], (GATES,), 0.1),
        'lstm_b_hh': w(ks[11], (GATES,), 0.1),
        'actor_w': w(ks[5], (NUM_ACTIONS, MEM_UNITS), 0.01),
        'actor_b': jnp.zeros((NUM_ACTIONS,), jnp.float32),   # module fills 0
        'critic_w': w(ks[6], (1, MEM_UNITS), 1.0),
        'critic_b': jnp.zeros((1,), jnp.float32),            # module fills 0
    }


if __name__ == "__main__":
    key = jax.random.PRNGKey(0)
    kp, ko, ka, kr = jax.random.split(key, 4)
    params = init_params(kp)
    packed = prepare_params(params)     # one-time weight packing

    obs = jax.random.normal(ko, (1, 3, OBS_HW, OBS_HW), dtype=jnp.float32)
    p_action = jax.nn.one_hot(
        jax.random.randint(ka, (1,), 0, NUM_ACTIONS), NUM_ACTIONS,
        dtype=jnp.float32)                                   # (1, num_actions)
    p_reward = jax.random.normal(kr, (1, 1), dtype=jnp.float32)  # (1, 1)

    logits, value, (h, c) = a3c_lstm_forward(packed, obs, (p_action, p_reward))
    jax.block_until_ready((logits, value, h, c))

    rl, rv, (rh, rc) = reference_forward(params, obs, (p_action, p_reward))
    assert logits.shape == (1, 1, NUM_ACTIONS)
    assert value.shape == (1, 1, 1)
    assert h.shape == (1, 1, MEM_UNITS) and c.shape == (1, 1, MEM_UNITS)
    # conv / fc / lstm matmuls run in bf16 (f32 accumulation), so compare
    # against the f32 reference with a correspondingly loose tolerance.
    assert jnp.allclose(logits, rl, atol=5e-2, rtol=5e-2)
    assert jnp.allclose(value, rv, atol=5e-2, rtol=5e-2)
    assert jnp.allclose(h, rh, atol=5e-2, rtol=5e-2)
    assert jnp.allclose(c, rc, atol=5e-2, rtol=5e-2)

    print("KERNEL_OK")
</pallas_src>

<mosaic_0001>
module attributes {stable_mosaic.version = 11 : i64} {
  func.func @_fused_kernel(%arg0: i32, %arg1: memref<1x7200xbf16, #tpu.memory_space<vmem>>, %arg2: memref<7200x256xbf16, #tpu.memory_space<vmem>>, %arg3: memref<1x256xf32, #tpu.memory_space<vmem>>, %arg4: memref<336x128xbf16, #tpu.memory_space<vmem>>, %arg5: memref<1x128xf32, #tpu.memory_space<vmem>>, %arg6: memref<1x128xf32, #tpu.memory_space<vmem>>) attributes {dimension_semantics = [#tpu.dimension_semantics<arbitrary>], iteration_bounds = array<i64: 1>, scalar_prefetch = 0 : i64, scratch_operands = 0 : i64, tpu.core_type = #tpu.core_type<tc>, window_params = [{pipeline_mode = #tpu.pipeline_mode<synchronous>, transform_indices = @transform_0, window_bounds = array<i64: 1, 7200>}, {pipeline_mode = #tpu.pipeline_mode<synchronous>, transform_indices = @transform_1, window_bounds = array<i64: 7200, 256>}, {pipeline_mode = #tpu.pipeline_mode<synchronous>, transform_indices = @transform_2, window_bounds = array<i64: 1, 256>}, {pipeline_mode = #tpu.pipeline_mode<synchronous>, transform_indices = @transform_3, window_bounds = array<i64: 336, 128>}, {pipeline_mode = #tpu.pipeline_mode<synchronous>, transform_indices = @transform_4, window_bounds = array<i64: 1, 128>}, {pipeline_mode = #tpu.pipeline_mode<synchronous>, transform_indices = @transform_5, window_bounds = array<i64: 1, 128>}]} {
    %c0 = arith.constant 0 : index
    %c0_0 = arith.constant 0 : index
    %0 = vector.load %arg1[%c0, %c0_0] : memref<1x7200xbf16, #tpu.memory_space<vmem>>, vector<1x7200xbf16>
    %c0_1 = arith.constant 0 : index
    %c0_2 = arith.constant 0 : index
    %1 = vector.load %arg2[%c0_1, %c0_2] : memref<7200x256xbf16, #tpu.memory_space<vmem>>, vector<7200x256xbf16>
    %cst = arith.constant dense<0.000000e+00> : vector<1x256xf32>
    %2 = tpu.matmul %0, %1, %cst {dimension_numbers = #tpu.dot_dimension_numbers<[1], [0], [0], [1], [0, 0, 1, 1], [], []>} : vector<1x7200xbf16>, vector<7200x256xbf16>, vector<1x256xf32> -> vector<1x256xf32>
    %c0_3 = arith.constant 0 : index
    %c0_4 = arith.constant 0 : index
    %3 = vector.load %arg3[%c0_3, %c0_4] : memref<1x256xf32, #tpu.memory_space<vmem>>, vector<1x256xf32>
    %4 = arith.addf %2, %3 : vector<1x256xf32>
    %cst_5 = arith.constant 0.000000e+00 : f32
    %5 = vector.broadcast %cst_5 : f32 to vector<1x256xf32>
    %6 = arith.maximumf %4, %5 : vector<1x256xf32>
    %c0_6 = arith.constant 0 : index
    %c0_7 = arith.constant 0 : index
    %7 = vector.load %arg5[%c0_6, %c0_7] : memref<1x128xf32, #tpu.memory_space<vmem>>, vector<1x40xf32>
    %8 = arith.truncf %6 : vector<1x256xf32> to vector<1x256xbf16>
    %c0_8 = arith.constant 0 : index
    %c0_9 = arith.constant 0 : index
    %9 = vector.load %arg4[%c0_8, %c0_9] : memref<336x128xbf16, #tpu.memory_space<vmem>>, vector<256x128xbf16>
    %cst_10 = arith.constant dense<0.000000e+00> : vector<1x128xf32>
    %10 = tpu.matmul %8, %9, %cst_10 {dimension_numbers = #tpu.dot_dimension_numbers<[1], [0], [0], [1], [0, 0, 1, 1], [], []>} : vector<1x256xbf16>, vector<256x128xbf16>, vector<1x128xf32> -> vector<1x128xf32>
    %11 = arith.truncf %7 : vector<1x40xf32> to vector<1x40xbf16>
    %c256 = arith.constant 256 : index
    %c0_11 = arith.constant 0 : index
    %12 = vector.load %arg4[%c256, %c0_11] : memref<336x128xbf16, #tpu.memory_space<vmem>>, vector<40x128xbf16>
    %cst_12 = arith.constant dense<0.000000e+00> : vector<1x128xf32>
    %13 = tpu.matmul %11, %12, %cst_12 {dimension_numbers = #tpu.dot_dimension_numbers<[1], [0], [0], [1], [0, 0, 1, 1], [], []>} : vector<1x40xbf16>, vector<40x128xbf16>, vector<1x128xf32> -> vector<1x128xf32>
    %14 = arith.addf %10, %13 : vector<1x128xf32>
    %15 = vector.extract_strided_slice %14 {offsets = [0, 0], sizes = [1, 32], strides = [1, 1]} : vector<1x128xf32> to vector<1x32xf32>
    %16 = arith.negf %15 : vector<1x32xf32>
    %17 = math.exp %16 : vector<1x32xf32>
    %cst_13 = arith.constant 1.000000e+00 : f32
    %18 = vector.broadcast %cst_13 : f32 to vector<1x32xf32>
    %19 = arith.addf %18, %17 : vector<1x32xf32>
    %20 = arith.divf %18, %19 : vector<1x32xf32>
    %21 = vector.extract_strided_slice %14 {offsets = [0, 32], sizes = [1, 32], strides = [1, 1]} : vector<1x128xf32> to vector<1x32xf32>
    %22 = arith.negf %21 : vector<1x32xf32>
    %23 = math.exp %22 : vector<1x32xf32>
    %cst_14 = arith.constant 1.000000e+00 : f32
    %24 = vector.broadcast %cst_14 : f32 to vector<1x32xf32>
    %25 = arith.addf %24, %23 : vector<1x32xf32>
    %26 = arith.divf %24, %25 : vector<1x32xf32>
    %27 = vector.extract_strided_slice %14 {offsets = [0, 64], sizes = [1, 32], strides = [1, 1]} : vector<1x128xf32> to vector<1x32xf32>
    %28 = math.tanh %27 : vector<1x32xf32>
    %29 = vector.extract_strided_slice %14 {offsets = [0, 96], sizes = [1, 32], strides = [1, 1]} : vector<1x128xf32> to vector<1x32xf32>
    %30 = arith.negf %29 : vector<1x32xf32>
    %31 = math.exp %30 : vector<1x32xf32>
    %cst_15 = arith.constant 1.000000e+00 : f32
    %32 = vector.broadcast %cst_15 : f32 to vector<1x32xf32>
    %33 = arith.addf %32, %31 : vector<1x32xf32>
    %34 = arith.divf %32, %33 : vector<1x32xf32>
    %c0_16 = arith.constant 0 : index
    %c64 = arith.constant 64 : index
    %35 = vector.load %arg5[%c0_16, %c64] : memref<1x128xf32, #tpu.memory_space<vmem>>, vector<1x32xf32>
    %36 = arith.mulf %26, %35 : vector<1x32xf32>
    %37 = arith.mulf %20, %28 : vector<1x32xf32>
    %38 = arith.addf %36, %37 : vector<1x32xf32>
    %39 = math.tanh %38 : vector<1x32xf32>
    %40 = arith.mulf %34, %39 : vector<1x32xf32>
    %41 = arith.truncf %40 : vector<1x32xf32> to vector<1x32xbf16>
    %c296 = arith.constant 296 : index
    %c0_17 = arith.constant 0 : index
    %42 = vector.load %arg4[%c296, %c0_17] : memref<336x128xbf16, #tpu.memory_space<vmem>>, vector<32x128xbf16>
    %cst_18 = arith.constant dense<0.000000e+00> : vector<1x128xf32>
    %43 = tpu.matmul %41, %42, %cst_18 {dimension_numbers = #tpu.dot_dimension_numbers<[1], [0], [0], [1], [0, 0, 1, 1], [], []>} : vector<1x32xbf16>, vector<32x128xbf16>, vector<1x128xf32> -> vector<1x128xf32>
    %c328 = arith.constant 328 : index
    %c0_19 = arith.constant 0 : index
    %44 = vector.load %arg4[%c328, %c0_19] : memref<336x128xbf16, #tpu.memory_space<vmem>>, vector<1x128xbf16>
    %45 = arith.extf %44 : vector<1x128xbf16> to vector<1x128xf32>
    %46 = arith.addf %43, %45 : vector<1x128xf32>
    %47 = vector.extract_strided_slice %46 {offsets = [0, 0], sizes = [1, 64], strides = [1, 1]} : vector<1x128xf32> to vector<1x64xf32>
    %48 = tpu.concatenate %47, %40, %38 in 1 : vector<1x64xf32>, vector<1x32xf32>, vector<1x32xf32> -> vector<1x128xf32>
    %c0_20 = arith.constant 0 : index
    %c0_21 = arith.constant 0 : index
    %49 = vector.load %arg6[%c0_20, %c0_21] : memref<1x128xf32, #tpu.memory_space<vmem>>, vector<1x128xf32>
    tpu.vector_store %arg6[%c0_20, %c0_21], %48 {strides = array<i32>} : memref<1x128xf32, #tpu.memory_space<vmem>>, vector<1x128xf32>,
    return
  }
  func.func @transform_0(%arg0: i32) -> (i32, i32) {
    %c0_i32 = arith.constant 0 : i32
    %c0_i32_0 = arith.constant 0 : i32
    %c0_i32_1 = arith.constant 0 : i32
    return %c0_i32, %c0_i32_0 : i32, i32
  }
  func.func @transform_1(%arg0: i32) -> (i32, i32) {
    %c0_i32 = arith.constant 0 : i32
    %c0_i32_0 = arith.constant 0 : i32
    %c0_i32_1 = arith.constant 0 : i32
    return %c0_i32, %c0_i32_0 : i32, i32
  }
  func.func @transform_2(%arg0: i32) -> (i32, i32) {
    %c0_i32 = arith.constant 0 : i32
    %c0_i32_0 = arith.constant 0 : i32
    %c0_i32_1 = arith.constant 0 : i32
    return %c0_i32, %c0_i32_0 : i32, i32
  }
  func.func @transform_3(%arg0: i32) -> (i32, i32) {
    %c0_i32 = arith.constant 0 : i32
    %c0_i32_0 = arith.constant 0 : i32
    %c0_i32_1 = arith.constant 0 : i32
    return %c0_i32, %c0_i32_0 : i32, i32
  }
  func.func @transform_4(%arg0: i32) -> (i32, i32) {
    %c0_i32 = arith.constant 0 : i32
    %c0_i32_0 = arith.constant 0 : i32
    %c0_i32_1 = arith.constant 0 : i32
    return %c0_i32, %c0_i32_0 : i32, i32
  }
  func.func @transform_5(%arg0: i32) -> (i32, i32) {
    %c0_i32 = arith.constant 0 : i32
    %c0_i32_0 = arith.constant 0 : i32
    %c0_i32_1 = arith.constant 0 : i32
    return %c0_i32, %c0_i32_0 : i32, i32
  }
}

</mosaic_0001>

<bundles_post_ra>
// kernel: _forward_impl.1
= control target key start
LH: loop header
LB: loop body
LE: loop exit
PB: predicated region body
PF: predicated region fallthrough
CT: control target
= control target key end

     0   :  { %v9895_v36 = vmov 1966171168   ;;  %v942_v38 = vlaneseq  ;;  %vm5862_vm0 = vcmask 261120   ;;  %vm7117_vm1 = vcmask 1043456   ;;  %s9901_s29 = smov 32   ;;  %s13009_s1 = inlined_call_operand.vmem [shape: bf16[7200,256], index: 1, kind: input, shape index: {}]   ;;  %s13010_s0 = inlined_call_operand.vmem [shape: bf16[1,7200], index: 0, kind: input, shape index: {}]   ;;  %s13011_s3 = inlined_call_operand.vmem [shape: bf16[336,128], index: 3, kind: input, shape index: {}]   ;;  %s13012_s4 = inlined_call_operand.vmem [shape: f32[1,128], index: 4, kind: input, shape index: {}]   ;;  %s13013_s2 = inlined_call_operand.vmem [shape: f32[1,256], index: 2, kind: input, shape index: {}]   ;;  %s13014_s5 = inlined_call_operand.vmem [shape: f32[1,128], index: 5, kind: output, shape index: {}]  }
   0x1   :  { %v8503_v0 = vld [vmem:[%s13009_s1 + $0x4] ss:$8 sps:$4 sm:$0xff]   ;;  %v8507_v2 = vld [vmem:[%s13009_s1] ss:$8 sps:$4 sm:$0xff]   ;;  %v8509_v4 = vld [vmem:[%s13009_s1 + $0x14] ss:$8 sps:$4 sm:$0xff]   ;;  %v940_v37 = vunpack.c.l.s4 %v9895_v36 }
   0x2   :  { %v8505_v1 = vld [vmem:[%s13009_s1 + $0xe04] ss:$8 sps:$4 sm:$0xff]   ;;  %5866 = vmatprep.subr.bf16.mxu1 %v8503_v0  ;;  %v8508_v3 = vld [vmem:[%s13009_s1 + $0xe00] ss:$8 sps:$4 sm:$0xff]   ;;  %v8511_v5 = vld [vmem:[%s13009_s1 + $0xe14] ss:$8 sps:$4 sm:$0xff]  }
   0x3   :  { %6440 = vmatprep.subr.bf16.mxu0 %v8505_v1  ;;  %5867 = vmatpush1.bf16.msra.mxu1 %v8507_v2  ;;  %v8513_v6 = vld [vmem:[%s13009_s1 + $0x10] ss:$8 sps:$4 sm:$0xff]   ;;  %v8515_v8 = vld [vmem:[%s13009_s1 + $0x24] ss:$8 sps:$4 sm:$0xff]   ;;  %v8519_v10 = vld [vmem:[%s13009_s1 + $0x20] ss:$8 sps:$4 sm:$0xff]   ;;  %v941_v42 = vunpack.c.0.s8 %v940_v37 }
   0x4   :  { %6441 = vmatpush1.bf16.msra.mxu0 %v8508_v3  ;;  %5868 = vmatprep.subr.bf16.mxu1 %v8509_v4  ;;  %v8514_v7 = vld [vmem:[%s13009_s1 + $0xe10] ss:$8 sps:$4 sm:$0xff]   ;;  %v8517_v9 = vld [vmem:[%s13009_s1 + $0xe24] ss:$8 sps:$4 sm:$0xff]   ;;  %v8520_v11 = vld [vmem:[%s13009_s1 + $0xe20] ss:$8 sps:$4 sm:$0xff]  }
   0x5   :  { %6442 = vmatprep.subr.bf16.mxu0 %v8511_v5  ;;  %v8521_v12 = vld [vmem:[%s13009_s1 + $0x34] ss:$8 sps:$4 sm:$0xff]   ;;  %v8525_v14 = vld [vmem:[%s13009_s1 + $0x30] ss:$8 sps:$4 sm:$0xff]   ;;  %v8527_v16 = vld [vmem:[%s13009_s1 + $0x44] ss:$8 sps:$4 sm:$0xff]  }
   0x6   :  { %v8523_v13 = vld [vmem:[%s13009_s1 + $0xe34] ss:$8 sps:$4 sm:$0xff]   ;;  %v8526_v15 = vld [vmem:[%s13009_s1 + $0xe30] ss:$8 sps:$4 sm:$0xff]   ;;  %v8529_v17 = vld [vmem:[%s13009_s1 + $0xe44] ss:$8 sps:$4 sm:$0xff]  }
   0x7   :  { %5869 = vmatpush1.bf16.msra.mxu1 %v8513_v6  ;;  %v8531_v18 = vld [vmem:[%s13009_s1 + $0x40] ss:$8 sps:$4 sm:$0xff]   ;;  %v8533_v20 = vld [vmem:[%s13009_s1 + $0x54] ss:$8 sps:$4 sm:$0xff]   ;;  %v8537_v22 = vld [vmem:[%s13009_s1 + $0x50] ss:$8 sps:$4 sm:$0xff]  }
   0x8   :  { %6443 = vmatpush1.bf16.msra.mxu0 %v8514_v7  ;;  %5870 = vmatprep.subr.bf16.mxu1 %v8515_v8  ;;  %v8532_v19 = vld [vmem:[%s13009_s1 + $0xe40] ss:$8 sps:$4 sm:$0xff]   ;;  %v8535_v21 = vld [vmem:[%s13009_s1 + $0xe54] ss:$8 sps:$4 sm:$0xff]   ;;  %v8538_v23 = vld [vmem:[%s13009_s1 + $0xe50] ss:$8 sps:$4 sm:$0xff]  }
   0x9   :  { %6444 = vmatprep.subr.bf16.mxu0 %v8517_v9  ;;  %v8539_v24 = vld [vmem:[%s13009_s1 + $0x64] ss:$8 sps:$4 sm:$0xff]   ;;  %v8543_v26 = vld [vmem:[%s13009_s1 + $0x60] ss:$8 sps:$4 sm:$0xff]   ;;  %v8545_v28 = vld [vmem:[%s13009_s1 + $0x74] ss:$8 sps:$4 sm:$0xff]  }
   0xa   :  { %v8541_v25 = vld [vmem:[%s13009_s1 + $0xe64] ss:$8 sps:$4 sm:$0xff]   ;;  %v8544_v27 = vld [vmem:[%s13009_s1 + $0xe60] ss:$8 sps:$4 sm:$0xff]   ;;  %v8547_v29 = vld [vmem:[%s13009_s1 + $0xe74] ss:$8 sps:$4 sm:$0xff]  }
   0xb   :  { %5871 = vmatpush1.bf16.msra.mxu1 %v8519_v10  ;;  %v8549_v30 = vld [vmem:[%s13009_s1 + $0x70] ss:$8 sps:$4 sm:$0xff]   ;;  %v8551_v32 = vld [vmem:[%s13009_s1 + $0x84] ss:$8 sps:$4 sm:$0xff]   ;;  %v8555_v34 = vld [vmem:[%s13009_s1 + $0x80] ss:$8 sps:$4 sm:$0xff]  }
   0xc   :  { %6445 = vmatpush1.bf16.msra.mxu0 %v8520_v11  ;;  %5872 = vmatprep.subr.bf16.mxu1 %v8521_v12  ;;  %v8550_v31 = vld [vmem:[%s13009_s1 + $0xe70] ss:$8 sps:$4 sm:$0xff]   ;;  %v8553_v33 = vld [vmem:[%s13009_s1 + $0xe84] ss:$8 sps:$4 sm:$0xff]   ;;  %v8556_v35 = vld [vmem:[%s13009_s1 + $0xe80] ss:$8 sps:$4 sm:$0xff]  }
   0xd   :  { %6446 = vmatprep.subr.bf16.mxu0 %v8523_v13  ;;  %v8557_v39 = vld [vmem:[%s13009_s1 + $0x94] ss:$8 sps:$4 sm:$0xff]   ;;  %v8561_v41 = vld [vmem:[%s13009_s1 + $0x90] ss:$8 sps:$4 sm:$0xff]   ;;  %v10049_v43 = vshrl.u32 %v942_v38, 7  ;;  %v10078_v52 = vld [vmem:[%s13010_s0] sm:$0xff] }
   0xe   :  { %v8559_v40 = vld [vmem:[%s13009_s1 + $0xe94] ss:$8 sps:$4 sm:$0xff]   ;;  %v8562_v44 = vld [vmem:[%s13009_s1 + $0xe90] ss:$8 sps:$4 sm:$0xff]   ;;  %v8563_v45 = vld [vmem:[%s13009_s1 + $0xa4] ss:$8 sps:$4 sm:$0xff]  }
   0xf   :  { %5873 = vmatpush1.bf16.msra.mxu1 %v8525_v14  ;;  %v8565_v46 = vld [vmem:[%s13009_s1 + $0xea4] ss:$8 sps:$4 sm:$0xff]   ;;  %v8567_v47 = vld [vmem:[%s13009_s1 + $0xa0] ss:$8 sps:$4 sm:$0xff]   ;;  %v10067_v49 = vsub.s32 %v941_v42, %v10049_v43  ;;  %v8569_v50 = vld [vmem:[%s13009_s1 + $0xb4] ss:$8 sps:$4 sm:$0xff]  }
  0x10   :  { %6447 = vmatpush1.bf16.msra.mxu0 %v8526_v15  ;;  %5874 = vmatprep.subr.bf16.mxu1 %v8527_v16  ;;  %v8568_v48 = vld [vmem:[%s13009_s1 + $0xea0] ss:$8 sps:$4 sm:$0xff]   ;;  %v8571_v51 = vld [vmem:[%s13009_s1 + $0xeb4] ss:$8 sps:$4 sm:$0xff]   ;;  %v8573_v53 = vld [vmem:[%s13009_s1 + $0xb0] ss:$8 sps:$4 sm:$0xff]  }
  0x11   :  { %6448 = vmatprep.subr.bf16.mxu0 %v8529_v17  ;;  %v945_v54 = vrot.slane %v10078_v52, %v10067_v49  ;;  %v8574_v55 = vld [vmem:[%s13009_s1 + $0xeb0] ss:$8 sps:$4 sm:$0xff]   ;;  %v8575_v57 = vld [vmem:[%s13009_s1 + $0xc4] ss:$8 sps:$4 sm:$0xff]   ;;  %v8579_v63 = vld [vmem:[%s13009_s1 + $0xc0] ss:$8 sps:$4 sm:$0xff]  }
  0x12   :  { %v24_v56 = vld [vmem:[%s13010_s0 + $0x18] sm:$0xff]  ;;  %v8577_v58 = vld [vmem:[%s13009_s1 + $0xec4] ss:$8 sps:$4 sm:$0xff]   ;;  %v8580_v0 = vld [vmem:[%s13009_s1 + $0xec0] ss:$8 sps:$4 sm:$0xff]   ;;  %vm9898_vm2 = vmmov 0  }
  0x13   :  { %5875 = vmatpush1.bf16.msra.mxu1 %v8531_v18  ;;  %v953_v59 = vcombine.high %v945_v54, %v945_v54  ;;  %v1085_v60 = vcombine.high %v24_v56, %v24_v56  ;;  %v8581_v1 = vld [vmem:[%s13009_s1 + $0xd4] ss:$8 sps:$4 sm:$0xff]   ;;  %v8585_v5 = vld [vmem:[%s13009_s1 + $0xd0] ss:$8 sps:$4 sm:$0xff]   ;;  %v8587_v7 = vld [vmem:[%s13009_s1 + $0xe4] ss:$8 sps:$4 sm:$0xff]   ;;  %v10149_v17 = vrot.slane %v945_v54, %v10067_v49 }
  0x14   :  { %6449 = vmatpush1.bf16.msra.mxu0 %v8532_v19  ;;  %5876 = vmatprep.subr.bf16.mxu1 %v8533_v20  ;;  %v8583_v2 = vld [vmem:[%s13009_s1 + $0xed4] ss:$8 sps:$4 sm:$0xff]   ;;  %v8586_v6 = vld [vmem:[%s13009_s1 + $0xed0] ss:$8 sps:$4 sm:$0xff]   ;;  %v8589_v8 = vld [vmem:[%s13009_s1 + $0xee4] ss:$8 sps:$4 sm:$0xff]  }
  0x15   :  { %6450 = vmatprep.subr.bf16.mxu0 %v8535_v21  ;;  %v975_v61 = vrot.slane %v953_v59, %v10067_v49  ;;  %v1099_v62 = vrot.slane %v1085_v60, %v10067_v49  ;;  %v8591_v9 = vld [vmem:[%s13009_s1 + $0xe0] ss:$8 sps:$4 sm:$0xff]   ;;  %v8593_v11 = vld [vmem:[%s13009_s1 + $0xf4] ss:$8 sps:$4 sm:$0xff]   ;;  %v8597_v13 = vld [vmem:[%s13009_s1 + $0xf0] ss:$8 sps:$4 sm:$0xff]  }
  0x16   :  { %v8592_v10 = vld [vmem:[%s13009_s1 + $0xee0] ss:$8 sps:$4 sm:$0xff]   ;;  %v8595_v12 = vld [vmem:[%s13009_s1 + $0xef4] ss:$8 sps:$4 sm:$0xff]   ;;  %v8598_v14 = vld [vmem:[%s13009_s1 + $0xef0] ss:$8 sps:$4 sm:$0xff]  }
  0x17   :  { %5877 = vmatpush1.bf16.msra.mxu1 %v8537_v22  ;;  %v1101_v3 = vcombine.high %v1099_v62, %v1099_v62  ;;  %5898 = vmatprep.mubr.bf16.mxu1 %v975_v61  ;;  %v8602_v15 = vld [vmem:[%s13009_s1 + $0x104] ss:$8 sps:$4 sm:$0xff]   ;;  %v10152_v18 = vrot.slane %v1099_v62, %v10067_v49  ;;  %v8600_v19 = vld [vmem:[%s13009_s1 + $0x100] ss:$8 sps:$4 sm:$0xff]   ;;  %v8609_v21 = vld [vmem:[%s13009_s1 + $0x114] ss:$8 sps:$4 sm:$0xff]  }
  0x18   :  { %6451 = vmatpush1.bf16.msra.mxu0 %v8538_v23  ;;  %5878 = vmatprep.subr.bf16.mxu1 %v8539_v24  ;;  %v8606_v16 = vld [vmem:[%s13009_s1 + $0xf04] ss:$8 sps:$4 sm:$0xff]   ;;  %v8604_v20 = vld [vmem:[%s13009_s1 + $0xf00] ss:$8 sps:$4 sm:$0xff]   ;;  %v8612_v22 = vld [vmem:[%s13009_s1 + $0xf14] ss:$8 sps:$4 sm:$0xff]   ;;  %v985_v23 = vcombine.high %v975_v61, %v975_v61 }
  0x19   :  { %6452 = vmatprep.subr.bf16.mxu0 %v8541_v25  ;;  %v1129_v4 = vrot.slane %v1101_v3, %v10067_v49  ;;  %v8607_v25 = vld [vmem:[%s13009_s1 + $0x110] ss:$8 sps:$4 sm:$0xff]   ;;  %v8630_v36 = vld [vmem:[%s13009_s1 + $0xf44] ss:$8 sps:$4 sm:$0xff]   ;;  %v8625_v37 = vld [vmem:[%s13009_s1 + $0x140] ss:$8 sps:$4 sm:$0xff]  }
  0x1a   :  { %v8628_v38 = vld [vmem:[%s13009_s1 + $0xf40] ss:$8 sps:$4 sm:$0xff]   ;;  %v8634_v42 = vld [vmem:[%s13009_s1 + $0xf50] ss:$8 sps:$4 sm:$0xff]   ;;  %v8651_v54 = vld [vmem:[%s13009_s1 + $0x184] ss:$8 sps:$4 sm:$0xff]  }
  0x1b   :  { %5879 = vmatpush1.bf16.msra.mxu1 %v8543_v26  ;;  %6472 = vmatprep.mubr.bf16.mxu0 %v1129_v4  ;;  %v1133_v24 = vcombine.high %v1129_v4, %v1129_v4  ;;  %v8610_v26 = vld [vmem:[%s13009_s1 + $0xf10] ss:$8 sps:$4 sm:$0xff]   ;;  %v8649_v56 = vld [vmem:[%s13009_s1 + $0x180] ss:$8 sps:$4 sm:$0xff]   ;;  %v8660_v59 = vld [vmem:[%s13009_s1 + $0xf94] ss:$8 sps:$4 sm:$0xff]  }
  0x1c   :  { %6453 = vmatpush1.bf16.msra.mxu0 %v8544_v27  ;;  %5880 = vmatprep.subr.bf16.mxu1 %v8545_v28  ;;  %v8615_v27 = vld [vmem:[%s13009_s1 + $0x124] ss:$8 sps:$4 sm:$0xff]   ;;  %v8655_v60 = vld [vmem:[%s13009_s1 + $0x190] ss:$8 sps:$4 sm:$0xff]   ;;  %v8672_v3 = vld [vmem:[%s13009_s1 + $0xfb4] ss:$8 sps:$4 sm:$0xff]  }
  0x1d   :  { %6454 = vmatprep.subr.bf16.mxu0 %v8547_v29  ;;  %v8618_v28 = vld [vmem:[%s13009_s1 + $0xf24] ss:$8 sps:$4 sm:$0xff]   ;;  %v8613_v29 = vld [vmem:[%s13009_s1 + $0x120] ss:$8 sps:$4 sm:$0xff]   ;;  %v8658_v61 = vld [vmem:[%s13009_s1 + $0xf90] ss:$8 sps:$4 sm:$0xff]  }
  0x1e   :  { %v8663_v62 = vld [vmem:[%s13009_s1 + $0x1a4] ss:$8 sps:$4 sm:$0xff]   ;;  %v8667_v4 = vld [vmem:[%s13009_s1 + $0x1b0] ss:$8 sps:$4 sm:$0xff]   ;;  %vm7113_vm3 = vcmask 326656   ;;  %vm7402_vm4 = vcmask 523264  }
  0x1f   :  { %5881 = vmatpush1.bf16.msra.mxu1 %v8549_v30  ;;  %v8616_v30 = vld [vmem:[%s13009_s1 + $0xf20] ss:$8 sps:$4 sm:$0xff]   ;;  %vm7404_vm5 = vcmask 785408  }
  0x20   :  { %6455 = vmatpush1.bf16.msra.mxu0 %v8550_v31  ;;  %5882 = vmatprep.subr.bf16.mxu1 %v8551_v32  ;;  %v8621_v31 = vld [vmem:[%s13009_s1 + $0x134] ss:$8 sps:$4 sm:$0xff]  }
  0x21   :  { %6456 = vmatprep.subr.bf16.mxu0 %v8553_v33  ;;  %v8624_v32 = vld [vmem:[%s13009_s1 + $0xf34] ss:$8 sps:$4 sm:$0xff]   ;;  %v8619_v33 = vld [vmem:[%s13009_s1 + $0x130] ss:$8 sps:$4 sm:$0xff]  }
  0x23   :  { %5883 = vmatpush1.bf16.msra.mxu1 %v8555_v34  ;;  %v8622_v34 = vld [vmem:[%s13009_s1 + $0xf30] ss:$8 sps:$4 sm:$0xff]  }
  0x24   :  { %6457 = vmatpush1.bf16.msra.mxu0 %v8556_v35  ;;  %5884 = vmatprep.subr.bf16.mxu1 %v8557_v39  ;;  %v8627_v35 = vld [vmem:[%s13009_s1 + $0x144] ss:$8 sps:$4 sm:$0xff]   ;;  %v8633_v39 = vld [vmem:[%s13009_s1 + $0x154] ss:$8 sps:$4 sm:$0xff]  }
  0x25   :  { %6458 = vmatprep.subr.bf16.mxu0 %v8559_v40  ;;  %v8636_v40 = vld [vmem:[%s13009_s1 + $0xf54] ss:$8 sps:$4 sm:$0xff]  }
  0x27   :  { %5885 = vmatpush1.bf16.msra.mxu1 %v8561_v41  ;;  %v8631_v41 = vld [vmem:[%s13009_s1 + $0x150] ss:$8 sps:$4 sm:$0xff]  }
  0x28   :  { %6459 = vmatpush1.bf16.msra.mxu0 %v8562_v44  ;;  %5886 = vmatprep.subr.bf16.mxu1 %v8563_v45  ;;  %v8639_v44 = vld [vmem:[%s13009_s1 + $0x164] ss:$8 sps:$4 sm:$0xff]  }
  0x29   :  { %6460 = vmatprep.subr.bf16.mxu0 %v8565_v46  ;;  %v8642_v45 = vld [vmem:[%s13009_s1 + $0xf64] ss:$8 sps:$4 sm:$0xff]   ;;  %v8637_v46 = vld [vmem:[%s13009_s1 + $0x160] ss:$8 sps:$4 sm:$0xff]  }
  0x2b   :  { %5887 = vmatpush1.bf16.msra.mxu1 %v8567_v47  ;;  %v8640_v47 = vld [vmem:[%s13009_s1 + $0xf60] ss:$8 sps:$4 sm:$0xff]  }
  0x2c   :  { %6461 = vmatpush1.bf16.msra.mxu0 %v8568_v48  ;;  %5888 = vmatprep.subr.bf16.mxu1 %v8569_v50  ;;  %v8645_v48 = vld [vmem:[%s13009_s1 + $0x174] ss:$8 sps:$4 sm:$0xff]  }
  0x2d   :  { %6462 = vmatprep.subr.bf16.mxu0 %v8571_v51  ;;  %v8648_v50 = vld [vmem:[%s13009_s1 + $0xf74] ss:$8 sps:$4 sm:$0xff]   ;;  %v8643_v51 = vld [vmem:[%s13009_s1 + $0x170] ss:$8 sps:$4 sm:$0xff]  }
  0x2f   :  { %5889 = vmatpush1.bf16.msra.mxu1 %v8573_v53  ;;  %v8646_v53 = vld [vmem:[%s13009_s1 + $0xf70] ss:$8 sps:$4 sm:$0xff]  }
  0x30   :  { %6463 = vmatpush1.bf16.msra.mxu0 %v8574_v55  ;;  %5890 = vmatprep.subr.bf16.mxu1 %v8575_v57  ;;  %v8654_v55 = vld [vmem:[%s13009_s1 + $0xf84] ss:$8 sps:$4 sm:$0xff]   ;;  %v8652_v57 = vld [vmem:[%s13009_s1 + $0xf80] ss:$8 sps:$4 sm:$0xff]  }
  0x31   :  { %6464 = vmatprep.subr.bf16.mxu0 %v8577_v58  ;;  %v8657_v58 = vld [vmem:[%s13009_s1 + $0x194] ss:$8 sps:$4 sm:$0xff]  }
  0x33   :  { %5891 = vmatpush1.bf16.msra.mxu1 %v8579_v63  ;;  %v8666_v63 = vld [vmem:[%s13009_s1 + $0xfa4] ss:$8 sps:$4 sm:$0xff]  }
  0x34   :  { %6465 = vmatpush1.bf16.msra.mxu0 %v8580_v0  ;;  %5892 = vmatprep.subr.bf16.mxu1 %v8581_v1  ;;  %v8661_v0 = vld [vmem:[%s13009_s1 + $0x1a0] ss:$8 sps:$4 sm:$0xff]  }
  0x35   :  { %6466 = vmatprep.subr.bf16.mxu0 %v8583_v2  ;;  %v8664_v1 = vld [vmem:[%s13009_s1 + $0xfa0] ss:$8 sps:$4 sm:$0xff]   ;;  %v8669_v2 = vld [vmem:[%s13009_s1 + $0x1b4] ss:$8 sps:$4 sm:$0xff]  }
  0x37   :  { %5893 = vmatpush1.bf16.msra.mxu1 %v8585_v5  ;;  %v8670_v5 = vld [vmem:[%s13009_s1 + $0xfb0] ss:$8 sps:$4 sm:$0xff]  }
  0x38   :  { %6467 = vmatpush1.bf16.msra.mxu0 %v8586_v6  ;;  %5894 = vmatprep.subr.bf16.mxu1 %v8587_v7  ;;  %v8675_v6 = vld [vmem:[%s13009_s1 + $0x1c4] ss:$8 sps:$4 sm:$0xff]  }
  0x39   :  { %6468 = vmatprep.subr.bf16.mxu0 %v8589_v8  ;;  %v8678_v7 = vld [vmem:[%s13009_s1 + $0xfc4] ss:$8 sps:$4 sm:$0xff]   ;;  %v8673_v8 = vld [vmem:[%s13009_s1 + $0x1c0] ss:$8 sps:$4 sm:$0xff]  }
  0x3b   :  { %5895 = vmatpush1.bf16.msra.mxu1 %v8591_v9  ;;  %v8676_v9 = vld [vmem:[%s13009_s1 + $0xfc0] ss:$8 sps:$4 sm:$0xff]  }
  0x3c   :  { %6469 = vmatpush1.bf16.msra.mxu0 %v8592_v10  ;;  %5896 = vmatprep.subr.bf16.mxu1 %v8593_v11  ;;  %v8681_v10 = vld [vmem:[%s13009_s1 + $0x1d4] ss:$8 sps:$4 sm:$0xff]  }
  0x3d   :  { %6470 = vmatprep.subr.bf16.mxu0 %v8595_v12  ;;  %v8684_v11 = vld [vmem:[%s13009_s1 + $0xfd4] ss:$8 sps:$4 sm:$0xff]   ;;  %v8679_v12 = vld [vmem:[%s13009_s1 + $0x1d0] ss:$8 sps:$4 sm:$0xff]  }
  0x3f   :  { %5897 = vmatpush1.bf16.msra.mxu1 %v8597_v13  ;;  %v8682_v13 = vld [vmem:[%s13009_s1 + $0xfd0] ss:$8 sps:$4 sm:$0xff]  }
  0x40   :  { %6471 = vmatpush1.bf16.msra.mxu0 %v8598_v14  ;;  %5907 = vmatprep.subr.bf16.mxu1 %v8602_v15  ;;  %v8687_v14 = vld [vmem:[%s13009_s1 + $0x1e4] ss:$8 sps:$4 sm:$0xff]  }
  0x41   :  { %6481 = vmatprep.subr.bf16.mxu0 %v8606_v16  ;;  %v8690_v15 = vld [vmem:[%s13009_s1 + $0xfe4] ss:$8 sps:$4 sm:$0xff]   ;;  %v938_v16 = vcombine.high %v10078_v52, %v10078_v52  ;;  %v8696_v52 = vld [vmem:[%s13009_s1 + $0xff4] ss:$8 sps:$4 sm:$0xff]  }
  0x42   :  { %5899 = vmatmul.mubr.bf16.vlgmr.msra.gmra.mrb[0].mxu1 %v10149_v17 }
  0x43   :  { %6473 = vmatmul.mubr.bf16.vlgmr.msra.gmra.mrb[0].mxu0 %v10152_v18  ;;  %5908 = vmatpush1.bf16.msra.mxu1 %v8600_v19  ;;  %v8685_v19 = vld [vmem:[%s13009_s1 + $0x1e0] ss:$8 sps:$4 sm:$0xff]  }
  0x44   :  { %6482 = vmatpush1.bf16.msra.mxu0 %v8604_v20  ;;  %5909 = vmatprep.subr.bf16.mxu1 %v8609_v21  ;;  %v8688_v20 = vld [vmem:[%s13009_s1 + $0xfe0] ss:$8 sps:$4 sm:$0xff]   ;;  %v8693_v21 = vld [vmem:[%s13009_s1 + $0x1f4] ss:$8 sps:$4 sm:$0xff]  }
  0x45   :  { %6483 = vmatprep.subr.bf16.mxu0 %v8612_v22  ;;  %5939 = vmatprep.mubr.bf16.mxu1 %v985_v23  ;;  %v10339_v22 = vrot.slane %v938_v16, %v10067_v49  ;;  %v8691_v23 = vld [vmem:[%s13009_s1 + $0x1f0] ss:$8 sps:$4 sm:$0xff]  }
  0x46   :  { %6513 = vmatprep.mubr.bf16.mxu0 %v1133_v24  ;;  %v8694_v24 = vld [vmem:[%s13009_s1 + $0xff0] ss:$8 sps:$4 sm:$0xff]  }
  0x47   :  { %5910 = vmatpush1.bf16.msra.mxu1 %v8607_v25  ;;  %v8699_v25 = vld [vmem:[%s13009_s1 + $0x204] ss:$8 sps:$4 sm:$0xff]   ;;  %v8763_v16 = vld [vmem:[%s13009_s1 + $0x2b0] ss:$8 sps:$4 sm:$0xff]  }
  0x48   :  { %6484 = vmatpush1.bf16.msra.mxu0 %v8610_v26  ;;  %5911 = vmatprep.subr.bf16.mxu1 %v8615_v27  ;;  %v8702_v26 = vld [vmem:[%s13009_s1 + $0x1004] ss:$8 sps:$4 sm:$0xff]   ;;  %v954_v27 = vcombine.high %v10339_v22, %v10339_v22 }
  0x49   :  { %6485 = vmatprep.subr.bf16.mxu0 %v8618_v28  ;;  %v983_v28 = vcombine.high %v10149_v17, %v10149_v17  ;;  %v8708_v17 = vld [vmem:[%s13009_s1 + $0x1014] ss:$8 sps:$4 sm:$0xff]  }
  0x4b   :  { %5912 = vmatpush1.bf16.msra.mxu1 %v8613_v29  ;;  %v1131_v29 = vcombine.high %v10152_v18, %v10152_v18  ;;  %v10372_v18 = vrot.slane %v954_v27, %v10067_v49  ;;  %v8778_v27 = vld [vmem:[%s13009_s1 + $0x10d0] ss:$8 sps:$4 sm:$0xff]  }
  0x4c   :  { %6486 = vmatpush1.bf16.msra.mxu0 %v8616_v30  ;;  %5913 = vmatprep.subr.bf16.mxu1 %v8621_v31  ;;  %v8697_v30 = vld [vmem:[%s13009_s1 + $0x200] ss:$8 sps:$4 sm:$0xff]  }
  0x4d   :  { %6487 = vmatprep.subr.bf16.mxu0 %v8624_v32  ;;  %v8700_v31 = vld [vmem:[%s13009_s1 + $0x1000] ss:$8 sps:$4 sm:$0xff]   ;;  %v8705_v32 = vld [vmem:[%s13009_s1 + $0x214] ss:$8 sps:$4 sm:$0xff]  }
  0x4f   :  { %5914 = vmatpush1.bf16.msra.mxu1 %v8619_v33  ;;  %v10377_v33 = vld [vmem:[%s13010_s0 + $0x20] sm:$0xff] }
  0x50   :  { %6488 = vmatpush1.bf16.msra.mxu0 %v8622_v34  ;;  %5915 = vmatprep.subr.bf16.mxu1 %v8627_v35  ;;  %v8703_v34 = vld [vmem:[%s13009_s1 + $0x210] ss:$8 sps:$4 sm:$0xff]   ;;  %v10384_v35 = vrot.slane %v10377_v33, %v10067_v49 }
  0x51   :  { %6489 = vmatprep.subr.bf16.mxu0 %v8630_v36  ;;  %v8706_v36 = vld [vmem:[%s13009_s1 + $0x1010] ss:$8 sps:$4 sm:$0xff]  }
  0x53   :  { %5916 = vmatpush1.bf16.msra.mxu1 %v8625_v37  ;;  %v8711_v37 = vld [vmem:[%s13009_s1 + $0x224] ss:$8 sps:$4 sm:$0xff]  }
  0x54   :  { %6490 = vmatpush1.bf16.msra.mxu0 %v8628_v38  ;;  %5917 = vmatprep.subr.bf16.mxu1 %v8633_v39  ;;  %v8714_v38 = vld [vmem:[%s13009_s1 + $0x1024] ss:$8 sps:$4 sm:$0xff]   ;;  %v1149_v39 = vcombine.high %v10384_v35, %v10384_v35 }
  0x55   :  { %6491 = vmatprep.subr.bf16.mxu0 %v8636_v40  ;;  %v8709_v40 = vld [vmem:[%s13009_s1 + $0x220] ss:$8 sps:$4 sm:$0xff]  }
  0x57   :  { %5918 = vmatpush1.bf16.msra.mxu1 %v8631_v41  ;;  %v10402_v41 = vrot.slane %v1149_v39, %v10067_v49  ;;  %v8793_v39 = vld [vmem:[%s13009_s1 + $0x300] ss:$8 sps:$4 sm:$0xff]  }
  0x58   :  { %6492 = vmatpush1.bf16.msra.mxu0 %v8634_v42  ;;  %5919 = vmatprep.subr.bf16.mxu1 %v8639_v44  ;;  %v8712_v42 = vld [vmem:[%s13009_s1 + $0x1020] ss:$8 sps:$4 sm:$0xff]   ;;  %v8717_v44 = vld [vmem:[%s13009_s1 + $0x234] ss:$8 sps:$4 sm:$0xff]  }
  0x59   :  { %6493 = vmatprep.subr.bf16.mxu0 %v8642_v45  ;;  %v8720_v45 = vld [vmem:[%s13009_s1 + $0x1034] ss:$8 sps:$4 sm:$0xff]  }
  0x5b   :  { %5920 = vmatpush1.bf16.msra.mxu1 %v8637_v46  ;;  %v8715_v46 = vld [vmem:[%s13009_s1 + $0x230] ss:$8 sps:$4 sm:$0xff]  }
  0x5c   :  { %6494 = vmatpush1.bf16.msra.mxu0 %v8640_v47  ;;  %5921 = vmatprep.subr.bf16.mxu1 %v8645_v48  ;;  %v8718_v47 = vld [vmem:[%s13009_s1 + $0x1030] ss:$8 sps:$4 sm:$0xff]   ;;  %v8723_v48 = vld [vmem:[%s13009_s1 + $0x244] ss:$8 sps:$4 sm:$0xff]  }
  0x5d   :  { %6495 = vmatprep.subr.bf16.mxu0 %v8648_v50  ;;  %v8726_v50 = vld [vmem:[%s13009_s1 + $0x1044] ss:$8 sps:$4 sm:$0xff]  }
  0x5f   :  { %5922 = vmatpush1.bf16.msra.mxu1 %v8643_v51  ;;  %v8721_v51 = vld [vmem:[%s13009_s1 + $0x240] ss:$8 sps:$4 sm:$0xff]  }
  0x60   :  { %6496 = vmatpush1.bf16.msra.mxu0 %v8646_v53  ;;  %5923 = vmatprep.subr.bf16.mxu1 %v8651_v54  ;;  %v8724_v53 = vld [vmem:[%s13009_s1 + $0x1040] ss:$8 sps:$4 sm:$0xff]   ;;  %v8729_v54 = vld [vmem:[%s13009_s1 + $0x254] ss:$8 sps:$4 sm:$0xff]  }
  0x61   :  { %6497 = vmatprep.subr.bf16.mxu0 %v8654_v55  ;;  %v8732_v55 = vld [vmem:[%s13009_s1 + $0x1054] ss:$8 sps:$4 sm:$0xff]  }
  0x63   :  { %5924 = vmatpush1.bf16.msra.mxu1 %v8649_v56  ;;  %v8727_v56 = vld [vmem:[%s13009_s1 + $0x250] ss:$8 sps:$4 sm:$0xff]  }
  0x64   :  { %6498 = vmatpush1.bf16.msra.mxu0 %v8652_v57  ;;  %5925 = vmatprep.subr.bf16.mxu1 %v8657_v58  ;;  %v8730_v57 = vld [vmem:[%s13009_s1 + $0x1050] ss:$8 sps:$4 sm:$0xff]   ;;  %v8735_v58 = vld [vmem:[%s13009_s1 + $0x264] ss:$8 sps:$4 sm:$0xff]  }
  0x65   :  { %6499 = vmatprep.subr.bf16.mxu0 %v8660_v59  ;;  %v8738_v59 = vld [vmem:[%s13009_s1 + $0x1064] ss:$8 sps:$4 sm:$0xff]  }
  0x67   :  { %5926 = vmatpush1.bf16.msra.mxu1 %v8655_v60  ;;  %v8733_v60 = vld [vmem:[%s13009_s1 + $0x260] ss:$8 sps:$4 sm:$0xff]  }
  0x68   :  { %6500 = vmatpush1.bf16.msra.mxu0 %v8658_v61  ;;  %5927 = vmatprep.subr.bf16.mxu1 %v8663_v62  ;;  %v8736_v61 = vld [vmem:[%s13009_s1 + $0x1060] ss:$8 sps:$4 sm:$0xff]   ;;  %v8741_v62 = vld [vmem:[%s13009_s1 + $0x274] ss:$8 sps:$4 sm:$0xff]  }
  0x69   :  { %6501 = vmatprep.subr.bf16.mxu0 %v8666_v63  ;;  %v8744_v63 = vld [vmem:[%s13009_s1 + $0x1074] ss:$8 sps:$4 sm:$0xff]  }
  0x6b   :  { %5928 = vmatpush1.bf16.msra.mxu1 %v8661_v0  ;;  %v8739_v0 = vld [vmem:[%s13009_s1 + $0x270] ss:$8 sps:$4 sm:$0xff]  }
  0x6c   :  { %6502 = vmatpush1.bf16.msra.mxu0 %v8664_v1  ;;  %5929 = vmatprep.subr.bf16.mxu1 %v8669_v2  ;;  %v8742_v1 = vld [vmem:[%s13009_s1 + $0x1070] ss:$8 sps:$4 sm:$0xff]   ;;  %v8747_v2 = vld [vmem:[%s13009_s1 + $0x284] ss:$8 sps:$4 sm:$0xff]  }
  0x6d   :  { %6503 = vmatprep.subr.bf16.mxu0 %v8672_v3  ;;  %v8750_v3 = vld [vmem:[%s13009_s1 + $0x1084] ss:$8 sps:$4 sm:$0xff]  }
  0x6f   :  { %5930 = vmatpush1.bf16.msra.mxu1 %v8667_v4  ;;  %v8745_v4 = vld [vmem:[%s13009_s1 + $0x280] ss:$8 sps:$4 sm:$0xff]  }
  0x70   :  { %6504 = vmatpush1.bf16.msra.mxu0 %v8670_v5  ;;  %5931 = vmatprep.subr.bf16.mxu1 %v8675_v6  ;;  %v8748_v5 = vld [vmem:[%s13009_s1 + $0x1080] ss:$8 sps:$4 sm:$0xff]   ;;  %v8753_v6 = vld [vmem:[%s13009_s1 + $0x294] ss:$8 sps:$4 sm:$0xff]  }
  0x71   :  { %6505 = vmatprep.subr.bf16.mxu0 %v8678_v7  ;;  %v8756_v7 = vld [vmem:[%s13009_s1 + $0x1094] ss:$8 sps:$4 sm:$0xff]  }
  0x73   :  { %5932 = vmatpush1.bf16.msra.mxu1 %v8673_v8  ;;  %v8751_v8 = vld [vmem:[%s13009_s1 + $0x290] ss:$8 sps:$4 sm:$0xff]  }
  0x74   :  { %6506 = vmatpush1.bf16.msra.mxu0 %v8676_v9  ;;  %5933 = vmatprep.subr.bf16.mxu1 %v8681_v10  ;;  %v8754_v9 = vld [vmem:[%s13009_s1 + $0x1090] ss:$8 sps:$4 sm:$0xff]   ;;  %v8759_v10 = vld [vmem:[%s13009_s1 + $0x2a4] ss:$8 sps:$4 sm:$0xff]  }
  0x75   :  { %6507 = vmatprep.subr.bf16.mxu0 %v8684_v11  ;;  %v8762_v11 = vld [vmem:[%s13009_s1 + $0x10a4] ss:$8 sps:$4 sm:$0xff]  }
  0x77   :  { %5934 = vmatpush1.bf16.msra.mxu1 %v8679_v12  ;;  %v8757_v12 = vld [vmem:[%s13009_s1 + $0x2a0] ss:$8 sps:$4 sm:$0xff]  }
  0x78   :  { %6508 = vmatpush1.bf16.msra.mxu0 %v8682_v13  ;;  %5935 = vmatprep.subr.bf16.mxu1 %v8687_v14  ;;  %v8760_v13 = vld [vmem:[%s13009_s1 + $0x10a0] ss:$8 sps:$4 sm:$0xff]   ;;  %v8765_v14 = vld [vmem:[%s13009_s1 + $0x2b4] ss:$8 sps:$4 sm:$0xff]  }
  0x79   :  { %6509 = vmatprep.subr.bf16.mxu0 %v8690_v15  ;;  %v8768_v15 = vld [vmem:[%s13009_s1 + $0x10b4] ss:$8 sps:$4 sm:$0xff]  }
  0x7b   :  { %5936 = vmatpush1.bf16.msra.mxu1 %v8685_v19  ;;  %v8766_v19 = vld [vmem:[%s13009_s1 + $0x10b0] ss:$8 sps:$4 sm:$0xff]  }
  0x7c   :  { %6510 = vmatpush1.bf16.msra.mxu0 %v8688_v20  ;;  %5937 = vmatprep.subr.bf16.mxu1 %v8693_v21  ;;  %v8771_v20 = vld [vmem:[%s13009_s1 + $0x2c4] ss:$8 sps:$4 sm:$0xff]  }
  0x7d   :  { %6511 = vmatprep.subr.bf16.mxu0 %v8696_v52  ;;  %v8774_v21 = vld [vmem:[%s13009_s1 + $0x10c4] ss:$8 sps:$4 sm:$0xff]   ;;  %v8769_v52 = vld [vmem:[%s13009_s1 + $0x2c0] ss:$8 sps:$4 sm:$0xff]  }
  0x7f   :  { %5938 = vmatpush1.bf16.msra.mxu1 %v8691_v23  ;;  %v8772_v23 = vld [vmem:[%s13009_s1 + $0x10c0] ss:$8 sps:$4 sm:$0xff]  }
  0x80   :  { %6512 = vmatpush1.bf16.msra.mxu0 %v8694_v24  ;;  %5948 = vmatprep.subr.bf16.mxu1 %v8699_v25  ;;  %v8777_v24 = vld [vmem:[%s13009_s1 + $0x2d4] ss:$8 sps:$4 sm:$0xff]  }
  0x81   :  { %6522 = vmatprep.subr.bf16.mxu0 %v8702_v26  ;;  %v8780_v25 = vld [vmem:[%s13009_s1 + $0x10d4] ss:$8 sps:$4 sm:$0xff]   ;;  %v8775_v26 = vld [vmem:[%s13009_s1 + $0x2d0] ss:$8 sps:$4 sm:$0xff]  }
  0x82   :  { %5940 = vmatmul.mubr.bf16.vlgmr.msra.gmra.mrb[0].mxu1 %v983_v28  ;;  %v8783_v28 = vld [vmem:[%s13009_s1 + $0x2e4] ss:$8 sps:$4 sm:$0xff]  }
  0x83   :  { %6514 = vmatmul.mubr.bf16.vlgmr.msra.gmra.mrb[0].mxu0 %v1131_v29  ;;  %5949 = vmatpush1.bf16.msra.mxu1 %v8697_v30  ;;  %v8786_v29 = vld [vmem:[%s13009_s1 + $0x10e4] ss:$8 sps:$4 sm:$0xff]   ;;  %v8781_v30 = vld [vmem:[%s13009_s1 + $0x2e0] ss:$8 sps:$4 sm:$0xff]  }
  0x84   :  { %6523 = vmatpush1.bf16.msra.mxu0 %v8700_v31  ;;  %5950 = vmatprep.subr.bf16.mxu1 %v8705_v32  ;;  %v8784_v31 = vld [vmem:[%s13009_s1 + $0x10e0] ss:$8 sps:$4 sm:$0xff]   ;;  %v8789_v32 = vld [vmem:[%s13009_s1 + $0x2f4] ss:$8 sps:$4 sm:$0xff]  }
  0x85   :  { %6524 = vmatprep.subr.bf16.mxu0 %v8708_v17  ;;  %5980 = vmatprep.mubr.bf16.mxu1 %v10372_v18  ;;  %v8792_v17 = vld [vmem:[%s13009_s1 + $0x10f4] ss:$8 sps:$4 sm:$0xff]  }
  0x86   :  { %6554 = vmatprep.mubr.bf16.mxu0 %v10402_v41 }
  0x87   :  { %5951 = vmatpush1.bf16.msra.mxu1 %v8703_v34  ;;  %v8787_v34 = vld [vmem:[%s13009_s1 + $0x2f0] ss:$8 sps:$4 sm:$0xff]  }
  0x88   :  { %6525 = vmatpush1.bf16.msra.mxu0 %v8706_v36  ;;  %5952 = vmatprep.subr.bf16.mxu1 %v8711_v37  ;;  %v8790_v36 = vld [vmem:[%s13009_s1 + $0x10f0] ss:$8 sps:$4 sm:$0xff]   ;;  %v8795_v37 = vld [vmem:[%s13009_s1 + $0x304] ss:$8 sps:$4 sm:$0xff]  }
  0x89   :  { %6526 = vmatprep.subr.bf16.mxu0 %v8714_v38  ;;  %v8798_v38 = vld [vmem:[%s13009_s1 + $0x1104] ss:$8 sps:$4 sm:$0xff]  }
  0x8b   :  { %5953 = vmatpush1.bf16.msra.mxu1 %v8709_v40  ;;  %v10575_v40 = vrot.slane %v10339_v22, %v10067_v49  ;;  %v8804_v22 = vld [vmem:[%s13009_s1 + $0x1114] ss:$8 sps:$4 sm:$0xff]  }
  0x8c   :  { %6527 = vmatpush1.bf16.msra.mxu0 %v8712_v42  ;;  %5954 = vmatprep.subr.bf16.mxu1 %v8717_v44  ;;  %v10579_v42 = vrot.slane %v10384_v35, %v10067_v49  ;;  %v8796_v44 = vld [vmem:[%s13009_s1 + $0x1100] ss:$8 sps:$4 sm:$0xff]   ;;  %v986_v35 = vcombine.high %v10372_v18, %v10372_v18  ;;  %v8807_v18 = vld [vmem:[%s13009_s1 + $0x324] ss:$8 sps:$4 sm:$0xff]  }
  0x8d   :  { %6528 = vmatprep.subr.bf16.mxu0 %v8720_v45  ;;  %v8801_v45 = vld [vmem:[%s13009_s1 + $0x314] ss:$8 sps:$4 sm:$0xff]  }
  0x8f   :  { %5955 = vmatpush1.bf16.msra.mxu1 %v8715_v46  ;;  %v1181_v46 = vcombine.high %v10402_v41, %v10402_v41  ;;  %v8810_v41 = vld [vmem:[%s13009_s1 + $0x1124] ss:$8 sps:$4 sm:$0xff]  }
  0x90   :  { %6529 = vmatpush1.bf16.msra.mxu0 %v8718_v47  ;;  %5956 = vmatprep.subr.bf16.mxu1 %v8723_v48  ;;  %v8799_v47 = vld [vmem:[%s13009_s1 + $0x310] ss:$8 sps:$4 sm:$0xff]  }
  0x91   :  { %6530 = vmatprep.subr.bf16.mxu0 %v8726_v50  ;;  %v8802_v48 = vld [vmem:[%s13009_s1 + $0x1110] ss:$8 sps:$4 sm:$0xff]   ;;  %v8805_v50 = vld [vmem:[%s13009_s1 + $0x320] ss:$8 sps:$4 sm:$0xff]  }
  0x93   :  { %5957 = vmatpush1.bf16.msra.mxu1 %v8721_v51  ;;  %v8808_v51 = vld [vmem:[%s13009_s1 + $0x1120] ss:$8 sps:$4 sm:$0xff]  }
  0x94   :  { %6531 = vmatpush1.bf16.msra.mxu0 %v8724_v53  ;;  %5958 = vmatprep.subr.bf16.mxu1 %v8729_v54  ;;  %v8813_v53 = vld [vmem:[%s13009_s1 + $0x334] ss:$8 sps:$4 sm:$0xff]  }
  0x95   :  { %6532 = vmatprep.subr.bf16.mxu0 %v8732_v55  ;;  %v8816_v54 = vld [vmem:[%s13009_s1 + $0x1134] ss:$8 sps:$4 sm:$0xff]   ;;  %v8811_v55 = vld [vmem:[%s13009_s1 + $0x330] ss:$8 sps:$4 sm:$0xff]  }
  0x97   :  { %5959 = vmatpush1.bf16.msra.mxu1 %v8727_v56  ;;  %v8814_v56 = vld [vmem:[%s13009_s1 + $0x1130] ss:$8 sps:$4 sm:$0xff]  }
  0x98   :  { %6533 = vmatpush1.bf16.msra.mxu0 %v8730_v57  ;;  %5960 = vmatprep.subr.bf16.mxu1 %v8735_v58  ;;  %v8819_v57 = vld [vmem:[%s13009_s1 + $0x344] ss:$8 sps:$4 sm:$0xff]  }
  0x99   :  { %6534 = vmatprep.subr.bf16.mxu0 %v8738_v59  ;;  %v8822_v58 = vld [vmem:[%s13009_s1 + $0x1144] ss:$8 sps:$4 sm:$0xff]   ;;  %v8817_v59 = vld [vmem:[%s13009_s1 + $0x340] ss:$8 sps:$4 sm:$0xff]  }
  0x9b   :  { %5961 = vmatpush1.bf16.msra.mxu1 %v8733_v60  ;;  %v8820_v60 = vld [vmem:[%s13009_s1 + $0x1140] ss:$8 sps:$4 sm:$0xff]  }
  0x9c   :  { %6535 = vmatpush1.bf16.msra.mxu0 %v8736_v61  ;;  %5962 = vmatprep.subr.bf16.mxu1 %v8741_v62  ;;  %v8825_v61 = vld [vmem:[%s13009_s1 + $0x354] ss:$8 sps:$4 sm:$0xff]  }
  0x9d   :  { %6536 = vmatprep.subr.bf16.mxu0 %v8744_v63  ;;  %v8828_v62 = vld [vmem:[%s13009_s1 + $0x1154] ss:$8 sps:$4 sm:$0xff]   ;;  %v8823_v63 = vld [vmem:[%s13009_s1 + $0x350] ss:$8 sps:$4 sm:$0xff]  }
  0x9f   :  { %5963 = vmatpush1.bf16.msra.mxu1 %v8739_v0  ;;  %v8826_v0 = vld [vmem:[%s13009_s1 + $0x1150] ss:$8 sps:$4 sm:$0xff]  }
  0xa0   :  { %6537 = vmatpush1.bf16.msra.mxu0 %v8742_v1  ;;  %5964 = vmatprep.subr.bf16.mxu1 %v8747_v2  ;;  %v8831_v1 = vld [vmem:[%s13009_s1 + $0x364] ss:$8 sps:$4 sm:$0xff]  }
  0xa1   :  { %6538 = vmatprep.subr.bf16.mxu0 %v8750_v3  ;;  %v8834_v2 = vld [vmem:[%s13009_s1 + $0x1164] ss:$8 sps:$4 sm:$0xff]   ;;  %v8829_v3 = vld [vmem:[%s13009_s1 + $0x360] ss:$8 sps:$4 sm:$0xff]  }
  0xa3   :  { %5965 = vmatpush1.bf16.msra.mxu1 %v8745_v4  ;;  %v8832_v4 = vld [vmem:[%s13009_s1 + $0x1160] ss:$8 sps:$4 sm:$0xff]  }
  0xa4   :  { %6539 = vmatpush1.bf16.msra.mxu0 %v8748_v5  ;;  %5966 = vmatprep.subr.bf16.mxu1 %v8753_v6  ;;  %v8837_v5 = vld [vmem:[%s13009_s1 + $0x374] ss:$8 sps:$4 sm:$0xff]  }
  0xa5   :  { %6540 = vmatprep.subr.bf16.mxu0 %v8756_v7  ;;  %v8840_v6 = vld [vmem:[%s13009_s1 + $0x1174] ss:$8 sps:$4 sm:$0xff]   ;;  %v8835_v7 = vld [vmem:[%s13009_s1 + $0x370] ss:$8 sps:$4 sm:$0xff]  }
  0xa7   :  { %5967 = vmatpush1.bf16.msra.mxu1 %v8751_v8  ;;  %v8838_v8 = vld [vmem:[%s13009_s1 + $0x1170] ss:$8 sps:$4 sm:$0xff]  }
  0xa8   :  { %6541 = vmatpush1.bf16.msra.mxu0 %v8754_v9  ;;  %5968 = vmatprep.subr.bf16.mxu1 %v8759_v10  ;;  %v8843_v9 = vld [vmem:[%s13009_s1 + $0x384] ss:$8 sps:$4 sm:$0xff]  }
  0xa9   :  { %6542 = vmatprep.subr.bf16.mxu0 %v8762_v11  ;;  %v8846_v10 = vld [vmem:[%s13009_s1 + $0x1184] ss:$8 sps:$4 sm:$0xff]   ;;  %v8841_v11 = vld [vmem:[%s13009_s1 + $0x380] ss:$8 sps:$4 sm:$0xff]  }
  0xab   :  { %5969 = vmatpush1.bf16.msra.mxu1 %v8757_v12  ;;  %v8844_v12 = vld [vmem:[%s13009_s1 + $0x1180] ss:$8 sps:$4 sm:$0xff]  }
  0xac   :  { %6543 = vmatpush1.bf16.msra.mxu0 %v8760_v13  ;;  %5970 = vmatprep.subr.bf16.mxu1 %v8765_v14  ;;  %v8849_v13 = vld [vmem:[%s13009_s1 + $0x394] ss:$8 sps:$4 sm:$0xff]  }
  0xad   :  { %6544 = vmatprep.subr.bf16.mxu0 %v8768_v15  ;;  %v8852_v14 = vld [vmem:[%s13009_s1 + $0x1194] ss:$8 sps:$4 sm:$0xff]   ;;  %v8847_v15 = vld [vmem:[%s13009_s1 + $0x390] ss:$8 sps:$4 sm:$0xff]  }
  0xaf   :  { %5971 = vmatpush1.bf16.msra.mxu1 %v8763_v16  ;;  %v8850_v16 = vld [vmem:[%s13009_s1 + $0x1190] ss:$8 sps:$4 sm:$0xff]  }
  0xb0   :  { %6545 = vmatpush1.bf16.msra.mxu0 %v8766_v19  ;;  %5972 = vmatprep.subr.bf16.mxu1 %v8771_v20  ;;  %v8855_v19 = vld [vmem:[%s13009_s1 + $0x3a4] ss:$8 sps:$4 sm:$0xff]  }
  0xb1   :  { %6546 = vmatprep.subr.bf16.mxu0 %v8774_v21  ;;  %v8858_v20 = vld [vmem:[%s13009_s1 + $0x11a4] ss:$8 sps:$4 sm:$0xff]   ;;  %v8853_v21 = vld [vmem:[%s13009_s1 + $0x3a0] ss:$8 sps:$4 sm:$0xff]  }
  0xb3   :  { %5973 = vmatpush1.bf16.msra.mxu1 %v8769_v52  ;;  %v8856_v52 = vld [vmem:[%s13009_s1 + $0x11a0] ss:$8 sps:$4 sm:$0xff]  }
  0xb4   :  { %6547 = vmatpush1.bf16.msra.mxu0 %v8772_v23  ;;  %5974 = vmatprep.subr.bf16.mxu1 %v8777_v24  ;;  %v8861_v23 = vld [vmem:[%s13009_s1 + $0x3b4] ss:$8 sps:$4 sm:$0xff]  }
  0xb5   :  { %6548 = vmatprep.subr.bf16.mxu0 %v8780_v25  ;;  %v8864_v24 = vld [vmem:[%s13009_s1 + $0x11b4] ss:$8 sps:$4 sm:$0xff]   ;;  %v8859_v25 = vld [vmem:[%s13009_s1 + $0x3b0] ss:$8 sps:$4 sm:$0xff]  }
  0xb7   :  { %5975 = vmatpush1.bf16.msra.mxu1 %v8775_v26  ;;  %v8862_v26 = vld [vmem:[%s13009_s1 + $0x11b0] ss:$8 sps:$4 sm:$0xff]  }
  0xb8   :  { %6549 = vmatpush1.bf16.msra.mxu0 %v8778_v27  ;;  %5976 = vmatprep.subr.bf16.mxu1 %v8783_v28  ;;  %v8867_v27 = vld [vmem:[%s13009_s1 + $0x3c4] ss:$8 sps:$4 sm:$0xff]  }
  0xb9   :  { %6550 = vmatprep.subr.bf16.mxu0 %v8786_v29  ;;  %v8870_v28 = vld [vmem:[%s13009_s1 + $0x11c4] ss:$8 sps:$4 sm:$0xff]   ;;  %v8865_v29 = vld [vmem:[%s13009_s1 + $0x3c0] ss:$8 sps:$4 sm:$0xff]  }
  0xbb   :  { %5977 = vmatpush1.bf16.msra.mxu1 %v8781_v30  ;;  %v8868_v30 = vld [vmem:[%s13009_s1 + $0x11c0] ss:$8 sps:$4 sm:$0xff]  }
  0xbc   :  { %6551 = vmatpush1.bf16.msra.mxu0 %v8784_v31  ;;  %5978 = vmatprep.subr.bf16.mxu1 %v8789_v32  ;;  %v8873_v31 = vld [vmem:[%s13009_s1 + $0x3d4] ss:$8 sps:$4 sm:$0xff]  }
  0xbd   :  { %6552 = vmatprep.subr.bf16.mxu0 %v8792_v17  ;;  %v8876_v32 = vld [vmem:[%s13009_s1 + $0x11d4] ss:$8 sps:$4 sm:$0xff]   ;;  %v8871_v17 = vld [vmem:[%s13009_s1 + $0x3d0] ss:$8 sps:$4 sm:$0xff]  }
  0xbf   :  { %5979 = vmatpush1.bf16.msra.mxu1 %v8787_v34  ;;  %v8874_v34 = vld [vmem:[%s13009_s1 + $0x11d0] ss:$8 sps:$4 sm:$0xff]  }
  0xc0   :  { %6553 = vmatpush1.bf16.msra.mxu0 %v8790_v36  ;;  %5989 = vmatprep.subr.bf16.mxu1 %v8795_v37  ;;  %v8879_v36 = vld [vmem:[%s13009_s1 + $0x3e4] ss:$8 sps:$4 sm:$0xff]  }
  0xc1   :  { %6563 = vmatprep.subr.bf16.mxu0 %v8798_v38  ;;  %v8882_v37 = vld [vmem:[%s13009_s1 + $0x11e4] ss:$8 sps:$4 sm:$0xff]   ;;  %v8877_v38 = vld [vmem:[%s13009_s1 + $0x3e0] ss:$8 sps:$4 sm:$0xff]  }
  0xc2   :  { %5981 = vmatmul.mubr.bf16.vlgmr.msra.gmra.mrb[0].mxu1 %v10575_v40 }
  0xc3   :  { %6555 = vmatmul.mubr.bf16.vlgmr.msra.gmra.mrb[0].mxu0 %v10579_v42  ;;  %5990 = vmatpush1.bf16.msra.mxu1 %v8793_v39  ;;  %v1134_v39 = vcombine.high %v10377_v33, %v10377_v33  ;;  %v8888_v33 = vld [vmem:[%s13009_s1 + $0x11f4] ss:$8 sps:$4 sm:$0xff]  }
  0xc4   :  { %6564 = vmatpush1.bf16.msra.mxu0 %v8796_v44  ;;  %5991 = vmatprep.subr.bf16.mxu1 %v8801_v45  ;;  %v8880_v44 = vld [vmem:[%s13009_s1 + $0x11e0] ss:$8 sps:$4 sm:$0xff]  }
  0xc5   :  { %6565 = vmatprep.subr.bf16.mxu0 %v8804_v22  ;;  %6021 = vmatprep.mubr.bf16.mxu1 %v986_v35  ;;  %v10763_v45 = vld.sshfl [vmem:[%s13010_s0 + $0x8] sm:$0xff pattern:$0x75316420]  ;;  %v8885_v22 = vld [vmem:[%s13009_s1 + $0x3f4] ss:$8 sps:$4 sm:$0xff]   ;;  %v10772_v35 = vrot.slane %v1134_v39, %v10067_v49 }
  0xc6   :  { %6595 = vmatprep.mubr.bf16.mxu0 %v1181_v46  ;;  %v8883_v46 = vld [vmem:[%s13009_s1 + $0x3f0] ss:$8 sps:$4 sm:$0xff]   ;;  %v8963_v39 = vld [vmem:[%s13009_s1 + $0x4c4] ss:$8 sps:$4 sm:$0xff]  }
  0xc7   :  { %5992 = vmatpush1.bf16.msra.mxu1 %v8799_v47  ;;  %v8886_v47 = vld [vmem:[%s13009_s1 + $0x11f0] ss:$8 sps:$4 sm:$0xff]  }
  0xc8   :  { %6566 = vmatpush1.bf16.msra.mxu0 %v8802_v48  ;;  %5993 = vmatprep.subr.bf16.mxu1 %v8807_v18  ;;  %v8891_v48 = vld [vmem:[%s13009_s1 + $0x404] ss:$8 sps:$4 sm:$0xff]  }
  0xc9   :  { %6567 = vmatprep.subr.bf16.mxu0 %v8810_v41  ;;  %v8894_v18 = vld [vmem:[%s13009_s1 + $0x1204] ss:$8 sps:$4 sm:$0xff]   ;;  %v1002_v41 = vcombine.high %v10763_v45, %v10763_v45 }
  0xcb   :  { %5994 = vmatpush1.bf16.msra.mxu1 %v8805_v50  ;;  %v1150_v50 = vcombine.high %v10772_v35, %v10772_v35 }
  0xcc   :  { %6568 = vmatpush1.bf16.msra.mxu0 %v8808_v51  ;;  %5995 = vmatprep.subr.bf16.mxu1 %v8813_v53  ;;  %v8889_v51 = vld [vmem:[%s13009_s1 + $0x400] ss:$8 sps:$4 sm:$0xff]  }
  0xcd   :  { %6569 = vmatprep.subr.bf16.mxu0 %v8816_v54  ;;  %v8892_v53 = vld [vmem:[%s13009_s1 + $0x1200] ss:$8 sps:$4 sm:$0xff]   ;;  %v984_v54 = vcombine.high %v10575_v40, %v10575_v40  ;;  %v10810_v40 = vrot.slane %v1150_v50, %v10067_v49  ;;  %v8978_v50 = vld [vmem:[%s13009_s1 + $0x12e4] ss:$8 sps:$4 sm:$0xff]  }
  0xcf   :  { %5996 = vmatpush1.bf16.msra.mxu1 %v8811_v55  ;;  %v1179_v55 = vcombine.high %v10579_v42, %v10579_v42  ;;  %v8895_v42 = vld [vmem:[%s13009_s1 + $0x410] ss:$8 sps:$4 sm:$0xff]  }
  0xd0   :  { %6570 = vmatpush1.bf16.msra.mxu0 %v8814_v56  ;;  %5997 = vmatprep.subr.bf16.mxu1 %v8819_v57  ;;  %v8897_v56 = vld [vmem:[%s13009_s1 + $0x414] ss:$8 sps:$4 sm:$0xff]  }
  0xd1   :  { %6571 = vmatprep.subr.bf16.mxu0 %v8822_v58  ;;  %v8900_v57 = vld [vmem:[%s13009_s1 + $0x1214] ss:$8 sps:$4 sm:$0xff]   ;;  %v10807_v58 = vrot.slane %v1002_v41, %v10067_v49  ;;  %v8975_v41 = vld [vmem:[%s13009_s1 + $0x4e4] ss:$8 sps:$4 sm:$0xff]  }
  0xd3   :  { %5998 = vmatpush1.bf16.msra.mxu1 %v8817_v59  ;;  %v8898_v59 = vld [vmem:[%s13009_s1 + $0x1210] ss:$8 sps:$4 sm:$0xff]  }
  0xd4   :  { %6572 = vmatpush1.bf16.msra.mxu0 %v8820_v60  ;;  %5999 = vmatprep.subr.bf16.mxu1 %v8825_v61  ;;  %v8903_v60 = vld [vmem:[%s13009_s1 + $0x424] ss:$8 sps:$4 sm:$0xff]  }
  0xd5   :  { %6573 = vmatprep.subr.bf16.mxu0 %v8828_v62  ;;  %v8906_v61 = vld [vmem:[%s13009_s1 + $0x1224] ss:$8 sps:$4 sm:$0xff]   ;;  %v8901_v62 = vld [vmem:[%s13009_s1 + $0x420] ss:$8 sps:$4 sm:$0xff]  }
  0xd7   :  { %6000 = vmatpush1.bf16.msra.mxu1 %v8823_v63  ;;  %v8904_v63 = vld [vmem:[%s13009_s1 + $0x1220] ss:$8 sps:$4 sm:$0xff]  }
  0xd8   :  { %6574 = vmatpush1.bf16.msra.mxu0 %v8826_v0  ;;  %6001 = vmatprep.subr.bf16.mxu1 %v8831_v1  ;;  %v8909_v0 = vld [vmem:[%s13009_s1 + $0x434] ss:$8 sps:$4 sm:$0xff]  }
  0xd9   :  { %6575 = vmatprep.subr.bf16.mxu0 %v8834_v2  ;;  %v8912_v1 = vld [vmem:[%s13009_s1 + $0x1234] ss:$8 sps:$4 sm:$0xff]   ;;  %v8907_v2 = vld [vmem:[%s13009_s1 + $0x430] ss:$8 sps:$4 sm:$0xff]  }
  0xdb   :  { %6002 = vmatpush1.bf16.msra.mxu1 %v8829_v3  ;;  %v8910_v3 = vld [vmem:[%s13009_s1 + $0x1230] ss:$8 sps:$4 sm:$0xff]  }
  0xdc   :  { %6576 = vmatpush1.bf16.msra.mxu0 %v8832_v4  ;;  %6003 = vmatprep.subr.bf16.mxu1 %v8837_v5  ;;  %v8915_v4 = vld [vmem:[%s13009_s1 + $0x444] ss:$8 sps:$4 sm:$0xff]  }
  0xdd   :  { %6577 = vmatprep.subr.bf16.mxu0 %v8840_v6  ;;  %v8918_v5 = vld [vmem:[%s13009_s1 + $0x1244] ss:$8 sps:$4 sm:$0xff]   ;;  %v8913_v6 = vld [vmem:[%s13009_s1 + $0x440] ss:$8 sps:$4 sm:$0xff]  }
  0xdf   :  { %6004 = vmatpush1.bf16.msra.mxu1 %v8835_v7  ;;  %v8916_v7 = vld [vmem:[%s13009_s1 + $0x1240] ss:$8 sps:$4 sm:$0xff]  }
  0xe0   :  { %6578 = vmatpush1.bf16.msra.mxu0 %v8838_v8  ;;  %6005 = vmatprep.subr.bf16.mxu1 %v8843_v9  ;;  %v8921_v8 = vld [vmem:[%s13009_s1 + $0x454] ss:$8 sps:$4 sm:$0xff]  }
  0xe1   :  { %6579 = vmatprep.subr.bf16.mxu0 %v8846_v10  ;;  %v8924_v9 = vld [vmem:[%s13009_s1 + $0x1254] ss:$8 sps:$4 sm:$0xff]   ;;  %v8919_v10 = vld [vmem:[%s13009_s1 + $0x450] ss:$8 sps:$4 sm:$0xff]  }
  0xe3   :  { %6006 = vmatpush1.bf16.msra.mxu1 %v8841_v11  ;;  %v8922_v11 = vld [vmem:[%s13009_s1 + $0x1250] ss:$8 sps:$4 sm:$0xff]  }
  0xe4   :  { %6580 = vmatpush1.bf16.msra.mxu0 %v8844_v12  ;;  %6007 = vmatprep.subr.bf16.mxu1 %v8849_v13  ;;  %v8927_v12 = vld [vmem:[%s13009_s1 + $0x464] ss:$8 sps:$4 sm:$0xff]  }
  0xe5   :  { %6581 = vmatprep.subr.bf16.mxu0 %v8852_v14  ;;  %v8930_v13 = vld [vmem:[%s13009_s1 + $0x1264] ss:$8 sps:$4 sm:$0xff]   ;;  %v8925_v14 = vld [vmem:[%s13009_s1 + $0x460] ss:$8 sps:$4 sm:$0xff]  }
  0xe7   :  { %6008 = vmatpush1.bf16.msra.mxu1 %v8847_v15  ;;  %v8928_v15 = vld [vmem:[%s13009_s1 + $0x1260] ss:$8 sps:$4 sm:$0xff]  }
  0xe8   :  { %6582 = vmatpush1.bf16.msra.mxu0 %v8850_v16  ;;  %6009 = vmatprep.subr.bf16.mxu1 %v8855_v19  ;;  %v8933_v16 = vld [vmem:[%s13009_s1 + $0x474] ss:$8 sps:$4 sm:$0xff]  }
  0xe9   :  { %6583 = vmatprep.subr.bf16.mxu0 %v8858_v20  ;;  %v8936_v19 = vld [vmem:[%s13009_s1 + $0x1274] ss:$8 sps:$4 sm:$0xff]   ;;  %v8931_v20 = vld [vmem:[%s13009_s1 + $0x470] ss:$8 sps:$4 sm:$0xff]  }
  0xeb   :  { %6010 = vmatpush1.bf16.msra.mxu1 %v8853_v21  ;;  %v8934_v21 = vld [vmem:[%s13009_s1 + $0x1270] ss:$8 sps:$4 sm:$0xff]  }
  0xec   :  { %6584 = vmatpush1.bf16.msra.mxu0 %v8856_v52  ;;  %6011 = vmatprep.subr.bf16.mxu1 %v8861_v23  ;;  %v8939_v52 = vld [vmem:[%s13009_s1 + $0x484] ss:$8 sps:$4 sm:$0xff]  }
  0xed   :  { %6585 = vmatprep.subr.bf16.mxu0 %v8864_v24  ;;  %v8942_v23 = vld [vmem:[%s13009_s1 + $0x1284] ss:$8 sps:$4 sm:$0xff]   ;;  %v8937_v24 = vld [vmem:[%s13009_s1 + $0x480] ss:$8 sps:$4 sm:$0xff]  }
  0xef   :  { %6012 = vmatpush1.bf16.msra.mxu1 %v8859_v25  ;;  %v8940_v25 = vld [vmem:[%s13009_s1 + $0x1280] ss:$8 sps:$4 sm:$0xff]  }
  0xf0   :  { %6586 = vmatpush1.bf16.msra.mxu0 %v8862_v26  ;;  %6013 = vmatprep.subr.bf16.mxu1 %v8867_v27  ;;  %v8945_v26 = vld [vmem:[%s13009_s1 + $0x494] ss:$8 sps:$4 sm:$0xff]  }
  0xf1   :  { %6587 = vmatprep.subr.bf16.mxu0 %v8870_v28  ;;  %v8948_v27 = vld [vmem:[%s13009_s1 + $0x1294] ss:$8 sps:$4 sm:$0xff]   ;;  %v8943_v28 = vld [vmem:[%s13009_s1 + $0x490] ss:$8 sps:$4 sm:$0xff]  }
  0xf3   :  { %6014 = vmatpush1.bf16.msra.mxu1 %v8865_v29  ;;  %v8946_v29 = vld [vmem:[%s13009_s1 + $0x1290] ss:$8 sps:$4 sm:$0xff]  }
  0xf4   :  { %6588 = vmatpush1.bf16.msra.mxu0 %v8868_v30  ;;  %6015 = vmatprep.subr.bf16.mxu1 %v8873_v31  ;;  %v8951_v30 = vld [vmem:[%s13009_s1 + $0x4a4] ss:$8 sps:$4 sm:$0xff]  }
  0xf5   :  { %6589 = vmatprep.subr.bf16.mxu0 %v8876_v32  ;;  %v8954_v31 = vld [vmem:[%s13009_s1 + $0x12a4] ss:$8 sps:$4 sm:$0xff]   ;;  %v8949_v32 = vld [vmem:[%s13009_s1 + $0x4a0] ss:$8 sps:$4 sm:$0xff]  }
  0xf7   :  { %6016 = vmatpush1.bf16.msra.mxu1 %v8871_v17  ;;  %v8952_v17 = vld [vmem:[%s13009_s1 + $0x12a0] ss:$8 sps:$4 sm:$0xff]  }
  0xf8   :  { %6590 = vmatpush1.bf16.msra.mxu0 %v8874_v34  ;;  %6017 = vmatprep.subr.bf16.mxu1 %v8879_v36  ;;  %v8957_v34 = vld [vmem:[%s13009_s1 + $0x4b4] ss:$8 sps:$4 sm:$0xff]  }
  0xf9   :  { %6591 = vmatprep.subr.bf16.mxu0 %v8882_v37  ;;  %v8960_v36 = vld [vmem:[%s13009_s1 + $0x12b4] ss:$8 sps:$4 sm:$0xff]   ;;  %v8955_v37 = vld [vmem:[%s13009_s1 + $0x4b0] ss:$8 sps:$4 sm:$0xff]  }
  0xfb   :  { %6018 = vmatpush1.bf16.msra.mxu1 %v8877_v38  ;;  %v8958_v38 = vld [vmem:[%s13009_s1 + $0x12b0] ss:$8 sps:$4 sm:$0xff]  }
  0xfc   :  { %6592 = vmatpush1.bf16.msra.mxu0 %v8880_v44  ;;  %6019 = vmatprep.subr.bf16.mxu1 %v8885_v22  ;;  %v8966_v44 = vld [vmem:[%s13009_s1 + $0x12c4] ss:$8 sps:$4 sm:$0xff]   ;;  %v8961_v22 = vld [vmem:[%s13009_s1 + $0x4c0] ss:$8 sps:$4 sm:$0xff]  }
  0xfd   :  { %6593 = vmatprep.subr.bf16.mxu0 %v8888_v33  ;;  %v8964_v33 = vld [vmem:[%s13009_s1 + $0x12c0] ss:$8 sps:$4 sm:$0xff]  }
  0xff   :  { %6020 = vmatpush1.bf16.msra.mxu1 %v8883_v46  ;;  %v8969_v46 = vld [vmem:[%s13009_s1 + $0x4d4] ss:$8 sps:$4 sm:$0xff]  }
 0x100   :  { %6594 = vmatpush1.bf16.msra.mxu0 %v8886_v47  ;;  %6030 = vmatprep.subr.bf16.mxu1 %v8891_v48  ;;  %v8972_v47 = vld [vmem:[%s13009_s1 + $0x12d4] ss:$8 sps:$4 sm:$0xff]   ;;  %v8967_v48 = vld [vmem:[%s13009_s1 + $0x4d0] ss:$8 sps:$4 sm:$0xff]  }
 0x101   :  { %6604 = vmatprep.subr.bf16.mxu0 %v8894_v18  ;;  %v8970_v18 = vld [vmem:[%s13009_s1 + $0x12d0] ss:$8 sps:$4 sm:$0xff]  }
 0x102   :  { %6022 = vmatmul.mubr.bf16.vlgmr.msra.gmra.mrb[0].mxu1 %v984_v54  ;;  %v8981_v54 = vld [vmem:[%s13009_s1 + $0x4f4] ss:$8 sps:$4 sm:$0xff]  }
 0x103   :  { %6596 = vmatmul.mubr.bf16.vlgmr.msra.gmra.mrb[0].mxu0 %v1179_v55  ;;  %6031 = vmatpush1.bf16.msra.mxu1 %v8889_v51  ;;  %v8973_v51 = vld [vmem:[%s13009_s1 + $0x4e0] ss:$8 sps:$4 sm:$0xff]   ;;  %v8984_v55 = vld [vmem:[%s13009_s1 + $0x12f4] ss:$8 sps:$4 sm:$0xff]  }
 0x104   :  { %6605 = vmatpush1.bf16.msra.mxu0 %v8892_v53  ;;  %6032 = vmatprep.subr.bf16.mxu1 %v8897_v56  ;;  %v8976_v53 = vld [vmem:[%s13009_s1 + $0x12e0] ss:$8 sps:$4 sm:$0xff]   ;;  %v8979_v56 = vld [vmem:[%s13009_s1 + $0x4f0] ss:$8 sps:$4 sm:$0xff]  }
 0x105   :  { %6606 = vmatprep.subr.bf16.mxu0 %v8900_v57  ;;  %6062 = vmatprep.mubr.bf16.mxu1 %v10807_v58  ;;  %v8982_v57 = vld [vmem:[%s13009_s1 + $0x12f0] ss:$8 sps:$4 sm:$0xff]  }
 0x106   :  { %6636 = vmatprep.mubr.bf16.mxu0 %v10810_v40 }
 0x107   :  { %6033 = vmatpush1.bf16.msra.mxu1 %v8895_v42  ;;  %v8987_v42 = vld [vmem:[%s13009_s1 + $0x504] ss:$8 sps:$4 sm:$0xff]  }
 0x108   :  { %6607 = vmatpush1.bf16.msra.mxu0 %v8898_v59  ;;  %6034 = vmatprep.subr.bf16.mxu1 %v8903_v60  ;;  %v8991_v59 = vld [vmem:[%s13009_s1 + $0x1304] ss:$8 sps:$4 sm:$0xff]   ;;  %v10996_v60 = vrot.slane %v10763_v45, %v10067_v49  ;;  %v8994_v45 = vld [vmem:[%s13009_s1 + $0x514] ss:$8 sps:$4 sm:$0xff]  }
 0x109   :  { %6608 = vmatprep.subr.bf16.mxu0 %v8906_v61  ;;  %v11000_v61 = vrot.slane %v10772_v35, %v10067_v49  ;;  %v8997_v35 = vld [vmem:[%s13009_s1 + $0x1314] ss:$8 sps:$4 sm:$0xff]  }
 0x10b   :  { %6035 = vmatpush1.bf16.msra.mxu1 %v8901_v62  ;;  %v8985_v62 = vld [vmem:[%s13009_s1 + $0x500] ss:$8 sps:$4 sm:$0xff]  }
 0x10c   :  { %6609 = vmatpush1.bf16.msra.mxu0 %v8904_v63  ;;  %6036 = vmatprep.subr.bf16.mxu1 %v8909_v0  ;;  %v8989_v63 = vld [vmem:[%s13009_s1 + $0x1300] ss:$8 sps:$4 sm:$0xff]   ;;  %v1034_v0 = vcombine.high %v10807_v58, %v10807_v58  ;;  %v9000_v58 = vld [vmem:[%s13009_s1 + $0x524] ss:$8 sps:$4 sm:$0xff]  }
 0x10d   :  { %6610 = vmatprep.subr.bf16.mxu0 %v8912_v1  ;;  %v1182_v1 = vcombine.high %v10810_v40, %v10810_v40  ;;  %v9003_v40 = vld [vmem:[%s13009_s1 + $0x1324] ss:$8 sps:$4 sm:$0xff]  }
 0x10f   :  { %6037 = vmatpush1.bf16.msra.mxu1 %v8907_v2  ;;  %v8992_v2 = vld [vmem:[%s13009_s1 + $0x510] ss:$8 sps:$4 sm:$0xff]  }
 0x110   :  { %6611 = vmatpush1.bf16.msra.mxu0 %v8910_v3  ;;  %6038 = vmatprep.subr.bf16.mxu1 %v8915_v4  ;;  %v8995_v3 = vld [vmem:[%s13009_s1 + $0x1310] ss:$8 sps:$4 sm:$0xff]   ;;  %v8998_v4 = vld [vmem:[%s13009_s1 + $0x520] ss:$8 sps:$4 sm:$0xff]  }
 0x111   :  { %6612 = vmatprep.subr.bf16.mxu0 %v8918_v5  ;;  %v9001_v5 = vld [vmem:[%s13009_s1 + $0x1320] ss:$8 sps:$4 sm:$0xff]  }
 0x113   :  { %6039 = vmatpush1.bf16.msra.mxu1 %v8913_v6  ;;  %v9006_v6 = vld [vmem:[%s13009_s1 + $0x534] ss:$8 sps:$4 sm:$0xff]  }
 0x114   :  { %6613 = vmatpush1.bf16.msra.mxu0 %v8916_v7  ;;  %6040 = vmatprep.subr.bf16.mxu1 %v8921_v8  ;;  %v9009_v7 = vld [vmem:[%s13009_s1 + $0x1334] ss:$8 sps:$4 sm:$0xff]   ;;  %v9004_v8 = vld [vmem:[%s13009_s1 + $0x530] ss:$8 sps:$4 sm:$0xff]  }
 0x115   :  { %6614 = vmatprep.subr.bf16.mxu0 %v8924_v9  ;;  %v9007_v9 = vld [vmem:[%s13009_s1 + $0x1330] ss:$8 sps:$4 sm:$0xff]  }
 0x117   :  { %6041 = vmatpush1.bf16.msra.mxu1 %v8919_v10  ;;  %v9012_v10 = vld [vmem:[%s13009_s1 + $0x544] ss:$8 sps:$4 sm:$0xff]  }
 0x118   :  { %6615 = vmatpush1.bf16.msra.mxu0 %v8922_v11  ;;  %6042 = vmatprep.subr.bf16.mxu1 %v8927_v12  ;;  %v9015_v11 = vld [vmem:[%s13009_s1 + $0x1344] ss:$8 sps:$4 sm:$0xff]   ;;  %v9010_v12 = vld [vmem:[%s13009_s1 + $0x540] ss:$8 sps:$4 sm:$0xff]  }
 0x119   :  { %6616 = vmatprep.subr.bf16.mxu0 %v8930_v13  ;;  %v9013_v13 = vld [vmem:[%s13009_s1 + $0x1340] ss:$8 sps:$4 sm:$0xff]  }
 0x11b   :  { %6043 = vmatpush1.bf16.msra.mxu1 %v8925_v14  ;;  %v9018_v14 = vld [vmem:[%s13009_s1 + $0x554] ss:$8 sps:$4 sm:$0xff]  }
 0x11c   :  { %6617 = vmatpush1.bf16.msra.mxu0 %v8928_v15  ;;  %6044 = vmatprep.subr.bf16.mxu1 %v8933_v16  ;;  %v9021_v15 = vld [vmem:[%s13009_s1 + $0x1354] ss:$8 sps:$4 sm:$0xff]   ;;  %v9016_v16 = vld [vmem:[%s13009_s1 + $0x550] ss:$8 sps:$4 sm:$0xff]  }
 0x11d   :  { %6618 = vmatprep.subr.bf16.mxu0 %v8936_v19  ;;  %v9019_v19 = vld [vmem:[%s13009_s1 + $0x1350] ss:$8 sps:$4 sm:$0xff]  }
 0x11f   :  { %6045 = vmatpush1.bf16.msra.mxu1 %v8931_v20  ;;  %v9024_v20 = vld [vmem:[%s13009_s1 + $0x564] ss:$8 sps:$4 sm:$0xff]  }
 0x120   :  { %6619 = vmatpush1.bf16.msra.mxu0 %v8934_v21  ;;  %6046 = vmatprep.subr.bf16.mxu1 %v8939_v52  ;;  %v9027_v21 = vld [vmem:[%s13009_s1 + $0x1364] ss:$8 sps:$4 sm:$0xff]   ;;  %v9022_v52 = vld [vmem:[%s13009_s1 + $0x560] ss:$8 sps:$4 sm:$0xff]  }
 0x121   :  { %6620 = vmatprep.subr.bf16.mxu0 %v8942_v23  ;;  %v9025_v23 = vld [vmem:[%s13009_s1 + $0x1360] ss:$8 sps:$4 sm:$0xff]  }
 0x123   :  { %6047 = vmatpush1.bf16.msra.mxu1 %v8937_v24  ;;  %v9030_v24 = vld [vmem:[%s13009_s1 + $0x574] ss:$8 sps:$4 sm:$0xff]  }
 0x124   :  { %6621 = vmatpush1.bf16.msra.mxu0 %v8940_v25  ;;  %6048 = vmatprep.subr.bf16.mxu1 %v8945_v26  ;;  %v9033_v25 = vld [vmem:[%s13009_s1 + $0x1374] ss:$8 sps:$4 sm:$0xff]   ;;  %v9028_v26 = vld [vmem:[%s13009_s1 + $0x570] ss:$8 sps:$4 sm:$0xff]  }
 0x125   :  { %6622 = vmatprep.subr.bf16.mxu0 %v8948_v27  ;;  %v9031_v27 = vld [vmem:[%s13009_s1 + $0x1370] ss:$8 sps:$4 sm:$0xff]  }
 0x127   :  { %6049 = vmatpush1.bf16.msra.mxu1 %v8943_v28  ;;  %v9036_v28 = vld [vmem:[%s13009_s1 + $0x584] ss:$8 sps:$4 sm:$0xff]  }
 0x128   :  { %6623 = vmatpush1.bf16.msra.mxu0 %v8946_v29  ;;  %6050 = vmatprep.subr.bf16.mxu1 %v8951_v30  ;;  %v9039_v29 = vld [vmem:[%s13009_s1 + $0x1384] ss:$8 sps:$4 sm:$0xff]   ;;  %v9034_v30 = vld [vmem:[%s13009_s1 + $0x580] ss:$8 sps:$4 sm:$0xff]  }
 0x129   :  { %6624 = vmatprep.subr.bf16.mxu0 %v8954_v31  ;;  %v9037_v31 = vld [vmem:[%s13009_s1 + $0x1380] ss:$8 sps:$4 sm:$0xff]  }
 0x12b   :  { %6051 = vmatpush1.bf16.msra.mxu1 %v8949_v32  ;;  %v9042_v32 = vld [vmem:[%s13009_s1 + $0x594] ss:$8 sps:$4 sm:$0xff]  }
 0x12c   :  { %6625 = vmatpush1.bf16.msra.mxu0 %v8952_v17  ;;  %6052 = vmatprep.subr.bf16.mxu1 %v8957_v34  ;;  %v9045_v17 = vld [vmem:[%s13009_s1 + $0x1394] ss:$8 sps:$4 sm:$0xff]   ;;  %v9040_v34 = vld [vmem:[%s13009_s1 + $0x590] ss:$8 sps:$4 sm:$0xff]  }
 0x12d   :  { %6626 = vmatprep.subr.bf16.mxu0 %v8960_v36  ;;  %v9043_v36 = vld [vmem:[%s13009_s1 + $0x1390] ss:$8 sps:$4 sm:$0xff]  }
 0x12f   :  { %6053 = vmatpush1.bf16.msra.mxu1 %v8955_v37  ;;  %v9048_v37 = vld [vmem:[%s13009_s1 + $0x5a4] ss:$8 sps:$4 sm:$0xff]  }
 0x130   :  { %6627 = vmatpush1.bf16.msra.mxu0 %v8958_v38  ;;  %6054 = vmatprep.subr.bf16.mxu1 %v8963_v39  ;;  %v9051_v38 = vld [vmem:[%s13009_s1 + $0x13a4] ss:$8 sps:$4 sm:$0xff]   ;;  %v9046_v39 = vld [vmem:[%s13009_s1 + $0x5a0] ss:$8 sps:$4 sm:$0xff]  }
 0x131   :  { %6628 = vmatprep.subr.bf16.mxu0 %v8966_v44  ;;  %v9049_v44 = vld [vmem:[%s13009_s1 + $0x13a0] ss:$8 sps:$4 sm:$0xff]  }
 0x133   :  { %6055 = vmatpush1.bf16.msra.mxu1 %v8961_v22  ;;  %v9054_v22 = vld [vmem:[%s13009_s1 + $0x5b4] ss:$8 sps:$4 sm:$0xff]  }
 0x134   :  { %6629 = vmatpush1.bf16.msra.mxu0 %v8964_v33  ;;  %6056 = vmatprep.subr.bf16.mxu1 %v8969_v46  ;;  %v9057_v33 = vld [vmem:[%s13009_s1 + $0x13b4] ss:$8 sps:$4 sm:$0xff]   ;;  %v9052_v46 = vld [vmem:[%s13009_s1 + $0x5b0] ss:$8 sps:$4 sm:$0xff]  }
 0x135   :  { %6630 = vmatprep.subr.bf16.mxu0 %v8972_v47  ;;  %v9055_v47 = vld [vmem:[%s13009_s1 + $0x13b0] ss:$8 sps:$4 sm:$0xff]  }
 0x137   :  { %6057 = vmatpush1.bf16.msra.mxu1 %v8967_v48  ;;  %v9060_v48 = vld [vmem:[%s13009_s1 + $0x5c4] ss:$8 sps:$4 sm:$0xff]  }
 0x138   :  { %6631 = vmatpush1.bf16.msra.mxu0 %v8970_v18  ;;  %6058 = vmatprep.subr.bf16.mxu1 %v8975_v41  ;;  %v9063_v18 = vld [vmem:[%s13009_s1 + $0x13c4] ss:$8 sps:$4 sm:$0xff]   ;;  %v9058_v41 = vld [vmem:[%s13009_s1 + $0x5c0] ss:$8 sps:$4 sm:$0xff]  }
 0x139   :  { %6632 = vmatprep.subr.bf16.mxu0 %v8978_v50  ;;  %v9061_v50 = vld [vmem:[%s13009_s1 + $0x13c0] ss:$8 sps:$4 sm:$0xff]  }
 0x13b   :  { %6059 = vmatpush1.bf16.msra.mxu1 %v8973_v51  ;;  %v9066_v51 = vld [vmem:[%s13009_s1 + $0x5d4] ss:$8 sps:$4 sm:$0xff]  }
 0x13c   :  { %6633 = vmatpush1.bf16.msra.mxu0 %v8976_v53  ;;  %6060 = vmatprep.subr.bf16.mxu1 %v8981_v54  ;;  %v9069_v53 = vld [vmem:[%s13009_s1 + $0x13d4] ss:$8 sps:$4 sm:$0xff]   ;;  %v9064_v54 = vld [vmem:[%s13009_s1 + $0x5d0] ss:$8 sps:$4 sm:$0xff]  }
 0x13d   :  { %6634 = vmatprep.subr.bf16.mxu0 %v8984_v55  ;;  %v9067_v55 = vld [vmem:[%s13009_s1 + $0x13d0] ss:$8 sps:$4 sm:$0xff]  }
 0x13f   :  { %6061 = vmatpush1.bf16.msra.mxu1 %v8979_v56  ;;  %v9072_v56 = vld [vmem:[%s13009_s1 + $0x5e4] ss:$8 sps:$4 sm:$0xff]  }
 0x140   :  { %6635 = vmatpush1.bf16.msra.mxu0 %v8982_v57  ;;  %6071 = vmatprep.subr.bf16.mxu1 %v8987_v42  ;;  %v9075_v57 = vld [vmem:[%s13009_s1 + $0x13e4] ss:$8 sps:$4 sm:$0xff]  }
 0x141   :  { %6645 = vmatprep.subr.bf16.mxu0 %v8991_v59  ;;  %v11179_v42 = vld.sshfl [vmem:[%s13010_s0 + $0x28] sm:$0xff pattern:$0x75316420] }
 0x142   :  { %6063 = vmatmul.mubr.bf16.vlgmr.msra.gmra.mrb[0].mxu1 %v10996_v60  ;;  %v9889_v59 = vld [vmem:[%s13010_s0 + $0x8] sm:$0xff] }
 0x143   :  { %6637 = vmatmul.mubr.bf16.vlgmr.msra.gmra.mrb[0].mxu0 %v11000_v61  ;;  %6072 = vmatpush1.bf16.msra.mxu1 %v8985_v62  ;;  %v987_v62 = vcombine.high %v9889_v59, %v9889_v59  ;;  %v9148_v59 = vld [vmem:[%s13009_s1 + $0x6b0] ss:$8 sps:$4 sm:$0xff]  }
 0x144   :  { %6646 = vmatpush1.bf16.msra.mxu0 %v8989_v63  ;;  %6073 = vmatprep.subr.bf16.mxu1 %v8994_v45  ;;  %v9070_v63 = vld [vmem:[%s13009_s1 + $0x5e0] ss:$8 sps:$4 sm:$0xff]  }
 0x145   :  { %6647 = vmatprep.subr.bf16.mxu0 %v8997_v35  ;;  %6103 = vmatprep.mubr.bf16.mxu1 %v1034_v0  ;;  %v9073_v45 = vld [vmem:[%s13009_s1 + $0x13e0] ss:$8 sps:$4 sm:$0xff]   ;;  %v9078_v35 = vld [vmem:[%s13009_s1 + $0x5f4] ss:$8 sps:$4 sm:$0xff]  }
 0x146   :  { %6677 = vmatprep.mubr.bf16.mxu0 %v1182_v1  ;;  %v9081_v0 = vld [vmem:[%s13009_s1 + $0x13f4] ss:$8 sps:$4 sm:$0xff]   ;;  %v11197_v1 = vrot.slane %v987_v62, %v10067_v49  ;;  %v9151_v62 = vld [vmem:[%s13009_s1 + $0x14b0] ss:$8 sps:$4 sm:$0xff]  }
 0x147   :  { %6074 = vmatpush1.bf16.msra.mxu1 %v8992_v2  ;;  %v9076_v2 = vld [vmem:[%s13009_s1 + $0x5f0] ss:$8 sps:$4 sm:$0xff]  }
 0x148   :  { %6648 = vmatpush1.bf16.msra.mxu0 %v8995_v3  ;;  %6075 = vmatprep.subr.bf16.mxu1 %v9000_v58  ;;  %v9079_v3 = vld [vmem:[%s13009_s1 + $0x13f0] ss:$8 sps:$4 sm:$0xff]   ;;  %v9084_v58 = vld [vmem:[%s13009_s1 + $0x604] ss:$8 sps:$4 sm:$0xff]  }
 0x149   :  { %6649 = vmatprep.subr.bf16.mxu0 %v9003_v40  ;;  %v9087_v40 = vld [vmem:[%s13009_s1 + $0x1404] ss:$8 sps:$4 sm:$0xff]  }
 0x14b   :  { %6076 = vmatpush1.bf16.msra.mxu1 %v8998_v4  ;;  %v1003_v4 = vcombine.high %v11197_v1, %v11197_v1 }
 0x14c   :  { %6650 = vmatpush1.bf16.msra.mxu0 %v9001_v5  ;;  %6077 = vmatprep.subr.bf16.mxu1 %v9006_v6  ;;  %v1198_v5 = vcombine.high %v11179_v42, %v11179_v42  ;;  %v1032_v6 = vcombine.high %v10996_v60, %v10996_v60  ;;  %v9093_v60 = vld [vmem:[%s13009_s1 + $0x1414] ss:$8 sps:$4 sm:$0xff]  }
 0x14d   :  { %6651 = vmatprep.subr.bf16.mxu0 %v9009_v7  ;;  %v1180_v7 = vcombine.high %v11000_v61, %v11000_v61  ;;  %v11232_v61 = vrot.slane %v1003_v4, %v10067_v49  ;;  %v9168_v4 = vld [vmem:[%s13009_s1 + $0x6e4] ss:$8 sps:$4 sm:$0xff]  }
 0x14f   :  { %6078 = vmatpush1.bf16.msra.mxu1 %v9004_v8  ;;  %v9082_v8 = vld [vmem:[%s13009_s1 + $0x600] ss:$8 sps:$4 sm:$0xff]  }
 0x150   :  { %6652 = vmatpush1.bf16.msra.mxu0 %v9007_v9  ;;  %6079 = vmatprep.subr.bf16.mxu1 %v9012_v10  ;;  %v9085_v9 = vld [vmem:[%s13009_s1 + $0x1400] ss:$8 sps:$4 sm:$0xff]   ;;  %v9090_v10 = vld [vmem:[%s13009_s1 + $0x614] ss:$8 sps:$4 sm:$0xff]  }
 0x151   :  { %6653 = vmatprep.subr.bf16.mxu0 %v9015_v11  ;;  %v11235_v11 = vrot.slane %v1198_v5, %v10067_v49  ;;  %v9171_v5 = vld [vmem:[%s13009_s1 + $0x14e4] ss:$8 sps:$4 sm:$0xff]  }
 0x153   :  { %6080 = vmatpush1.bf16.msra.mxu1 %v9010_v12  ;;  %v9088_v12 = vld [vmem:[%s13009_s1 + $0x610] ss:$8 sps:$4 sm:$0xff]  }
 0x154   :  { %6654 = vmatpush1.bf16.msra.mxu0 %v9013_v13  ;;  %6081 = vmatprep.subr.bf16.mxu1 %v9018_v14  ;;  %v9091_v13 = vld [vmem:[%s13009_s1 + $0x1410] ss:$8 sps:$4 sm:$0xff]   ;;  %v9096_v14 = vld [vmem:[%s13009_s1 + $0x624] ss:$8 sps:$4 sm:$0xff]  }
 0x155   :  { %6655 = vmatprep.subr.bf16.mxu0 %v9021_v15  ;;  %v9099_v15 = vld [vmem:[%s13009_s1 + $0x1424] ss:$8 sps:$4 sm:$0xff]  }
 0x157   :  { %6082 = vmatpush1.bf16.msra.mxu1 %v9016_v16  ;;  %v9094_v16 = vld [vmem:[%s13009_s1 + $0x620] ss:$8 sps:$4 sm:$0xff]  }
 0x158   :  { %6656 = vmatpush1.bf16.msra.mxu0 %v9019_v19  ;;  %6083 = vmatprep.subr.bf16.mxu1 %v9024_v20  ;;  %v9097_v19 = vld [vmem:[%s13009_s1 + $0x1420] ss:$8 sps:$4 sm:$0xff]   ;;  %v9102_v20 = vld [vmem:[%s13009_s1 + $0x634] ss:$8 sps:$4 sm:$0xff]  }
 0x159   :  { %6657 = vmatprep.subr.bf16.mxu0 %v9027_v21  ;;  %v9105_v21 = vld [vmem:[%s13009_s1 + $0x1434] ss:$8 sps:$4 sm:$0xff]  }
 0x15b   :  { %6084 = vmatpush1.bf16.msra.mxu1 %v9022_v52  ;;  %v9100_v52 = vld [vmem:[%s13009_s1 + $0x630] ss:$8 sps:$4 sm:$0xff]  }
 0x15c   :  { %6658 = vmatpush1.bf16.msra.mxu0 %v9025_v23  ;;  %6085 = vmatprep.subr.bf16.mxu1 %v9030_v24  ;;  %v9103_v23 = vld [vmem:[%s13009_s1 + $0x1430] ss:$8 sps:$4 sm:$0xff]   ;;  %v9108_v24 = vld [vmem:[%s13009_s1 + $0x644] ss:$8 sps:$4 sm:$0xff]  }
 0x15d   :  { %6659 = vmatprep.subr.bf16.mxu0 %v9033_v25  ;;  %v9111_v25 = vld [vmem:[%s13009_s1 + $0x1444] ss:$8 sps:$4 sm:$0xff]  }
 0x15f   :  { %6086 = vmatpush1.bf16.msra.mxu1 %v9028_v26  ;;  %v9106_v26 = vld [vmem:[%s13009_s1 + $0x640] ss:$8 sps:$4 sm:$0xff]  }
 0x160   :  { %6660 = vmatpush1.bf16.msra.mxu0 %v9031_v27  ;;  %6087 = vmatprep.subr.bf16.mxu1 %v9036_v28  ;;  %v9109_v27 = vld [vmem:[%s13009_s1 + $0x1440] ss:$8 sps:$4 sm:$0xff]   ;;  %v9114_v28 = vld [vmem:[%s13009_s1 + $0x654] ss:$8 sps:$4 sm:$0xff]  }
 0x161   :  { %6661 = vmatprep.subr.bf16.mxu0 %v9039_v29  ;;  %v9117_v29 = vld [vmem:[%s13009_s1 + $0x1454] ss:$8 sps:$4 sm:$0xff]  }
 0x163   :  { %6088 = vmatpush1.bf16.msra.mxu1 %v9034_v30  ;;  %v9112_v30 = vld [vmem:[%s13009_s1 + $0x650] ss:$8 sps:$4 sm:$0xff]  }
 0x164   :  { %6662 = vmatpush1.bf16.msra.mxu0 %v9037_v31  ;;  %6089 = vmatprep.subr.bf16.mxu1 %v9042_v32  ;;  %v9115_v31 = vld [vmem:[%s13009_s1 + $0x1450] ss:$8 sps:$4 sm:$0xff]   ;;  %v9120_v32 = vld [vmem:[%s13009_s1 + $0x664] ss:$8 sps:$4 sm:$0xff]  }
 0x165   :  { %6663 = vmatprep.subr.bf16.mxu0 %v9045_v17  ;;  %v9123_v17 = vld [vmem:[%s13009_s1 + $0x1464] ss:$8 sps:$4 sm:$0xff]  }
 0x167   :  { %6090 = vmatpush1.bf16.msra.mxu1 %v9040_v34  ;;  %v9118_v34 = vld [vmem:[%s13009_s1 + $0x660] ss:$8 sps:$4 sm:$0xff]  }
 0x168   :  { %6664 = vmatpush1.bf16.msra.mxu0 %v9043_v36  ;;  %6091 = vmatprep.subr.bf16.mxu1 %v9048_v37  ;;  %v9121_v36 = vld [vmem:[%s13009_s1 + $0x1460] ss:$8 sps:$4 sm:$0xff]   ;;  %v9126_v37 = vld [vmem:[%s13009_s1 + $0x674] ss:$8 sps:$4 sm:$0xff]  }
 0x169   :  { %6665 = vmatprep.subr.bf16.mxu0 %v9051_v38  ;;  %v9129_v38 = vld [vmem:[%s13009_s1 + $0x1474] ss:$8 sps:$4 sm:$0xff]  }
 0x16b   :  { %6092 = vmatpush1.bf16.msra.mxu1 %v9046_v39  ;;  %v9124_v39 = vld [vmem:[%s13009_s1 + $0x670] ss:$8 sps:$4 sm:$0xff]  }
 0x16c   :  { %6666 = vmatpush1.bf16.msra.mxu0 %v9049_v44  ;;  %6093 = vmatprep.subr.bf16.mxu1 %v9054_v22  ;;  %v9127_v44 = vld [vmem:[%s13009_s1 + $0x1470] ss:$8 sps:$4 sm:$0xff]   ;;  %v9132_v22 = vld [vmem:[%s13009_s1 + $0x684] ss:$8 sps:$4 sm:$0xff]  }
 0x16d   :  { %6667 = vmatprep.subr.bf16.mxu0 %v9057_v33  ;;  %v9135_v33 = vld [vmem:[%s13009_s1 + $0x1484] ss:$8 sps:$4 sm:$0xff]  }
 0x16f   :  { %6094 = vmatpush1.bf16.msra.mxu1 %v9052_v46  ;;  %v9130_v46 = vld [vmem:[%s13009_s1 + $0x680] ss:$8 sps:$4 sm:$0xff]  }
 0x170   :  { %6668 = vmatpush1.bf16.msra.mxu0 %v9055_v47  ;;  %6095 = vmatprep.subr.bf16.mxu1 %v9060_v48  ;;  %v9133_v47 = vld [vmem:[%s13009_s1 + $0x1480] ss:$8 sps:$4 sm:$0xff]   ;;  %v9138_v48 = vld [vmem:[%s13009_s1 + $0x694] ss:$8 sps:$4 sm:$0xff]  }
 0x171   :  { %6669 = vmatprep.subr.bf16.mxu0 %v9063_v18  ;;  %v9141_v18 = vld [vmem:[%s13009_s1 + $0x1494] ss:$8 sps:$4 sm:$0xff]  }
 0x173   :  { %6096 = vmatpush1.bf16.msra.mxu1 %v9058_v41  ;;  %v9136_v41 = vld [vmem:[%s13009_s1 + $0x690] ss:$8 sps:$4 sm:$0xff]  }
 0x174   :  { %6670 = vmatpush1.bf16.msra.mxu0 %v9061_v50  ;;  %6097 = vmatprep.subr.bf16.mxu1 %v9066_v51  ;;  %v9139_v50 = vld [vmem:[%s13009_s1 + $0x1490] ss:$8 sps:$4 sm:$0xff]   ;;  %v9144_v51 = vld [vmem:[%s13009_s1 + $0x6a4] ss:$8 sps:$4 sm:$0xff]  }
 0x175   :  { %6671 = vmatprep.subr.bf16.mxu0 %v9069_v53  ;;  %v9147_v53 = vld [vmem:[%s13009_s1 + $0x14a4] ss:$8 sps:$4 sm:$0xff]  }
 0x177   :  { %6098 = vmatpush1.bf16.msra.mxu1 %v9064_v54  ;;  %v9142_v54 = vld [vmem:[%s13009_s1 + $0x6a0] ss:$8 sps:$4 sm:$0xff]  }
 0x178   :  { %6672 = vmatpush1.bf16.msra.mxu0 %v9067_v55  ;;  %6099 = vmatprep.subr.bf16.mxu1 %v9072_v56  ;;  %v9145_v55 = vld [vmem:[%s13009_s1 + $0x14a0] ss:$8 sps:$4 sm:$0xff]   ;;  %v9150_v56 = vld [vmem:[%s13009_s1 + $0x6b4] ss:$8 sps:$4 sm:$0xff]  }
 0x179   :  { %6673 = vmatprep.subr.bf16.mxu0 %v9075_v57  ;;  %v9153_v57 = vld [vmem:[%s13009_s1 + $0x14b4] ss:$8 sps:$4 sm:$0xff]  }
 0x17b   :  { %6100 = vmatpush1.bf16.msra.mxu1 %v9070_v63  ;;  %v9156_v63 = vld [vmem:[%s13009_s1 + $0x6c4] ss:$8 sps:$4 sm:$0xff]  }
 0x17c   :  { %6674 = vmatpush1.bf16.msra.mxu0 %v9073_v45  ;;  %6101 = vmatprep.subr.bf16.mxu1 %v9078_v35  ;;  %v9159_v45 = vld [vmem:[%s13009_s1 + $0x14c4] ss:$8 sps:$4 sm:$0xff]   ;;  %v9154_v35 = vld [vmem:[%s13009_s1 + $0x6c0] ss:$8 sps:$4 sm:$0xff]  }
 0x17d   :  { %6675 = vmatprep.subr.bf16.mxu0 %v9081_v0  ;;  %v9157_v0 = vld [vmem:[%s13009_s1 + $0x14c0] ss:$8 sps:$4 sm:$0xff]  }
 0x17f   :  { %6102 = vmatpush1.bf16.msra.mxu1 %v9076_v2  ;;  %v9162_v2 = vld [vmem:[%s13009_s1 + $0x6d4] ss:$8 sps:$4 sm:$0xff]  }
 0x180   :  { %6676 = vmatpush1.bf16.msra.mxu0 %v9079_v3  ;;  %6112 = vmatprep.subr.bf16.mxu1 %v9084_v58  ;;  %v9165_v3 = vld [vmem:[%s13009_s1 + $0x14d4] ss:$8 sps:$4 sm:$0xff]   ;;  %v9160_v58 = vld [vmem:[%s13009_s1 + $0x6d0] ss:$8 sps:$4 sm:$0xff]  }
 0x181   :  { %6686 = vmatprep.subr.bf16.mxu0 %v9087_v40  ;;  %v9163_v40 = vld [vmem:[%s13009_s1 + $0x14d0] ss:$8 sps:$4 sm:$0xff]  }
 0x182   :  { %6104 = vmatmul.mubr.bf16.vlgmr.msra.gmra.mrb[0].mxu1 %v1032_v6  ;;  %v9166_v6 = vld [vmem:[%s13009_s1 + $0x6e0] ss:$8 sps:$4 sm:$0xff]  }
 0x183   :  { %6678 = vmatmul.mubr.bf16.vlgmr.msra.gmra.mrb[0].mxu0 %v1180_v7  ;;  %6113 = vmatpush1.bf16.msra.mxu1 %v9082_v8  ;;  %v9169_v7 = vld [vmem:[%s13009_s1 + $0x14e0] ss:$8 sps:$4 sm:$0xff]   ;;  %v9174_v8 = vld [vmem:[%s13009_s1 + $0x6f4] ss:$8 sps:$4 sm:$0xff]  }
 0x184   :  { %6687 = vmatpush1.bf16.msra.mxu0 %v9085_v9  ;;  %6114 = vmatprep.subr.bf16.mxu1 %v9090_v10  ;;  %v9177_v9 = vld [vmem:[%s13009_s1 + $0x14f4] ss:$8 sps:$4 sm:$0xff]   ;;  %v9172_v10 = vld [vmem:[%s13009_s1 + $0x6f0] ss:$8 sps:$4 sm:$0xff]  }
 0x185   :  { %6688 = vmatprep.subr.bf16.mxu0 %v9093_v60  ;;  %6144 = vmatprep.mubr.bf16.mxu1 %v11232_v61  ;;  %v9175_v60 = vld [vmem:[%s13009_s1 + $0x14f0] ss:$8 sps:$4 sm:$0xff]  }
 0x186   :  { %6718 = vmatprep.mubr.bf16.mxu0 %v11235_v11 }
 0x187   :  { %6115 = vmatpush1.bf16.msra.mxu1 %v9088_v12  ;;  %v9181_v12 = vld [vmem:[%s13009_s1 + $0x704] ss:$8 sps:$4 sm:$0xff]  }
 0x188   :  { %6689 = vmatpush1.bf16.msra.mxu0 %v9091_v13  ;;  %6116 = vmatprep.subr.bf16.mxu1 %v9096_v14  ;;  %v9184_v13 = vld [vmem:[%s13009_s1 + $0x1504] ss:$8 sps:$4 sm:$0xff]   ;;  %v11421_v14 = vrot.slane %v11197_v1, %v10067_v49  ;;  %v9187_v1 = vld [vmem:[%s13009_s1 + $0x714] ss:$8 sps:$4 sm:$0xff]  }
 0x189   :  { %6690 = vmatprep.subr.bf16.mxu0 %v9099_v15  ;;  %v11425_v15 = vrot.slane %v11179_v42, %v10067_v49  ;;  %v9190_v42 = vld [vmem:[%s13009_s1 + $0x1514] ss:$8 sps:$4 sm:$0xff]  }
 0x18b   :  { %6117 = vmatpush1.bf16.msra.mxu1 %v9094_v16  ;;  %v9179_v16 = vld [vmem:[%s13009_s1 + $0x700] ss:$8 sps:$4 sm:$0xff]  }
 0x18c   :  { %6691 = vmatpush1.bf16.msra.mxu0 %v9097_v19  ;;  %6118 = vmatprep.subr.bf16.mxu1 %v9102_v20  ;;  %v9182_v19 = vld [vmem:[%s13009_s1 + $0x1500] ss:$8 sps:$4 sm:$0xff]   ;;  %v1035_v20 = vcombine.high %v11232_v61, %v11232_v61  ;;  %v9193_v61 = vld [vmem:[%s13009_s1 + $0x724] ss:$8 sps:$4 sm:$0xff]  }
 0x18d   :  { %6692 = vmatprep.subr.bf16.mxu0 %v9105_v21  ;;  %v1230_v21 = vcombine.high %v11235_v11, %v11235_v11  ;;  %v9196_v11 = vld [vmem:[%s13009_s1 + $0x1524] ss:$8 sps:$4 sm:$0xff]  }
 0x18f   :  { %6119 = vmatpush1.bf16.msra.mxu1 %v9100_v52  ;;  %v9185_v52 = vld [vmem:[%s13009_s1 + $0x710] ss:$8 sps:$4 sm:$0xff]  }
 0x190   :  { %6693 = vmatpush1.bf16.msra.mxu0 %v9103_v23  ;;  %6120 = vmatprep.subr.bf16.mxu1 %v9108_v24  ;;  %v9188_v23 = vld [vmem:[%s13009_s1 + $0x1510] ss:$8 sps:$4 sm:$0xff]   ;;  %v9191_v24 = vld [vmem:[%s13009_s1 + $0x720] ss:$8 sps:$4 sm:$0xff]  }
 0x191   :  { %6694 = vmatprep.subr.bf16.mxu0 %v9111_v25  ;;  %v9194_v25 = vld [vmem:[%s13009_s1 + $0x1520] ss:$8 sps:$4 sm:$0xff]  }
 0x193   :  { %6121 = vmatpush1.bf16.msra.mxu1 %v9106_v26  ;;  %v9199_v26 = vld [vmem:[%s13009_s1 + $0x734] ss:$8 sps:$4 sm:$0xff]  }
 0x194   :  { %6695 = vmatpush1.bf16.msra.mxu0 %v9109_v27  ;;  %6122 = vmatprep.subr.bf16.mxu1 %v9114_v28  ;;  %v9202_v27 = vld [vmem:[%s13009_s1 + $0x1534] ss:$8 sps:$4 sm:$0xff]   ;;  %v9197_v28 = vld [vmem:[%s13009_s1 + $0x730] ss:$8 sps:$4 sm:$0xff]  }
 0x195   :  { %6696 = vmatprep.subr.bf16.mxu0 %v9117_v29  ;;  %v9200_v29 = vld [vmem:[%s13009_s1 + $0x1530] ss:$8 sps:$4 sm:$0xff]  }
 0x197   :  { %6123 = vmatpush1.bf16.msra.mxu1 %v9112_v30  ;;  %v9205_v30 = vld [vmem:[%s13009_s1 + $0x744] ss:$8 sps:$4 sm:$0xff]  }
 0x198   :  { %6697 = vmatpush1.bf16.msra.mxu0 %v9115_v31  ;;  %6124 = vmatprep.subr.bf16.mxu1 %v9120_v32  ;;  %v9208_v31 = vld [vmem:[%s13009_s1 + $0x1544] ss:$8 sps:$4 sm:$0xff]   ;;  %v9203_v32 = vld [vmem:[%s13009_s1 + $0x740] ss:$8 sps:$4 sm:$0xff]  }
 0x199   :  { %6698 = vmatprep.subr.bf16.mxu0 %v9123_v17  ;;  %v9206_v17 = vld [vmem:[%s13009_s1 + $0x1540] ss:$8 sps:$4 sm:$0xff]  }
 0x19b   :  { %6125 = vmatpush1.bf16.msra.mxu1 %v9118_v34  ;;  %v9211_v34 = vld [vmem:[%s13009_s1 + $0x754] ss:$8 sps:$4 sm:$0xff]  }
 0x19c   :  { %6699 = vmatpush1.bf16.msra.mxu0 %v9121_v36  ;;  %6126 = vmatprep.subr.bf16.mxu1 %v9126_v37  ;;  %v9214_v36 = vld [vmem:[%s13009_s1 + $0x1554] ss:$8 sps:$4 sm:$0xff]   ;;  %v9209_v37 = vld [vmem:[%s13009_s1 + $0x750] ss:$8 sps:$4 sm:$0xff]  }
 0x19d   :  { %6700 = vmatprep.subr.bf16.mxu0 %v9129_v38  ;;  %v9212_v38 = vld [vmem:[%s13009_s1 + $0x1550] ss:$8 sps:$4 sm:$0xff]  }
 0x19f   :  { %6127 = vmatpush1.bf16.msra.mxu1 %v9124_v39  ;;  %v9217_v39 = vld [vmem:[%s13009_s1 + $0x764] ss:$8 sps:$4 sm:$0xff]  }
 0x1a0   :  { %6701 = vmatpush1.bf16.msra.mxu0 %v9127_v44  ;;  %6128 = vmatprep.subr.bf16.mxu1 %v9132_v22  ;;  %v9220_v44 = vld [vmem:[%s13009_s1 + $0x1564] ss:$8 sps:$4 sm:$0xff]   ;;  %v9215_v22 = vld [vmem:[%s13009_s1 + $0x760] ss:$8 sps:$4 sm:$0xff]  }
 0x1a1   :  { %6702 = vmatprep.subr.bf16.mxu0 %v9135_v33  ;;  %v9218_v33 = vld [vmem:[%s13009_s1 + $0x1560] ss:$8 sps:$4 sm:$0xff]  }
 0x1a3   :  { %6129 = vmatpush1.bf16.msra.mxu1 %v9130_v46  ;;  %v9223_v46 = vld [vmem:[%s13009_s1 + $0x774] ss:$8 sps:$4 sm:$0xff]  }
 0x1a4   :  { %6703 = vmatpush1.bf16.msra.mxu0 %v9133_v47  ;;  %6130 = vmatprep.subr.bf16.mxu1 %v9138_v48  ;;  %v9226_v47 = vld [vmem:[%s13009_s1 + $0x1574] ss:$8 sps:$4 sm:$0xff]   ;;  %v9221_v48 = vld [vmem:[%s13009_s1 + $0x770] ss:$8 sps:$4 sm:$0xff]  }
 0x1a5   :  { %6704 = vmatprep.subr.bf16.mxu0 %v9141_v18  ;;  %v9224_v18 = vld [vmem:[%s13009_s1 + $0x1570] ss:$8 sps:$4 sm:$0xff]  }
 0x1a7   :  { %6131 = vmatpush1.bf16.msra.mxu1 %v9136_v41  ;;  %v9229_v41 = vld [vmem:[%s13009_s1 + $0x784] ss:$8 sps:$4 sm:$0xff]  }
 0x1a8   :  { %6705 = vmatpush1.bf16.msra.mxu0 %v9139_v50  ;;  %6132 = vmatprep.subr.bf16.mxu1 %v9144_v51  ;;  %v9232_v50 = vld [vmem:[%s13009_s1 + $0x1584] ss:$8 sps:$4 sm:$0xff]   ;;  %v9227_v51 = vld [vmem:[%s13009_s1 + $0x780] ss:$8 sps:$4 sm:$0xff]  }
 0x1a9   :  { %6706 = vmatprep.subr.bf16.mxu0 %v9147_v53  ;;  %v9230_v53 = vld [vmem:[%s13009_s1 + $0x1580] ss:$8 sps:$4 sm:$0xff]  }
 0x1ab   :  { %6133 = vmatpush1.bf16.msra.mxu1 %v9142_v54  ;;  %v9235_v54 = vld [vmem:[%s13009_s1 + $0x794] ss:$8 sps:$4 sm:$0xff]  }
 0x1ac   :  { %6707 = vmatpush1.bf16.msra.mxu0 %v9145_v55  ;;  %6134 = vmatprep.subr.bf16.mxu1 %v9150_v56  ;;  %v9238_v55 = vld [vmem:[%s13009_s1 + $0x1594] ss:$8 sps:$4 sm:$0xff]   ;;  %v9233_v56 = vld [vmem:[%s13009_s1 + $0x790] ss:$8 sps:$4 sm:$0xff]  }
 0x1ad   :  { %6708 = vmatprep.subr.bf16.mxu0 %v9153_v57  ;;  %v9236_v57 = vld [vmem:[%s13009_s1 + $0x1590] ss:$8 sps:$4 sm:$0xff]  }
 0x1af   :  { %6135 = vmatpush1.bf16.msra.mxu1 %v9148_v59  ;;  %v9241_v59 = vld [vmem:[%s13009_s1 + $0x7a4] ss:$8 sps:$4 sm:$0xff]  }
 0x1b0   :  { %6709 = vmatpush1.bf16.msra.mxu0 %v9151_v62  ;;  %6136 = vmatprep.subr.bf16.mxu1 %v9156_v63  ;;  %v9244_v62 = vld [vmem:[%s13009_s1 + $0x15a4] ss:$8 sps:$4 sm:$0xff]   ;;  %v9239_v63 = vld [vmem:[%s13009_s1 + $0x7a0] ss:$8 sps:$4 sm:$0xff]  }
 0x1b1   :  { %6710 = vmatprep.subr.bf16.mxu0 %v9159_v45  ;;  %v9242_v45 = vld [vmem:[%s13009_s1 + $0x15a0] ss:$8 sps:$4 sm:$0xff]  }
 0x1b3   :  { %6137 = vmatpush1.bf16.msra.mxu1 %v9154_v35  ;;  %v9247_v35 = vld [vmem:[%s13009_s1 + $0x7b4] ss:$8 sps:$4 sm:$0xff]  }
 0x1b4   :  { %6711 = vmatpush1.bf16.msra.mxu0 %v9157_v0  ;;  %6138 = vmatprep.subr.bf16.mxu1 %v9162_v2  ;;  %v9250_v0 = vld [vmem:[%s13009_s1 + $0x15b4] ss:$8 sps:$4 sm:$0xff]   ;;  %v9245_v2 = vld [vmem:[%s13009_s1 + $0x7b0] ss:$8 sps:$4 sm:$0xff]  }
 0x1b5   :  { %6712 = vmatprep.subr.bf16.mxu0 %v9165_v3  ;;  %v9248_v3 = vld [vmem:[%s13009_s1 + $0x15b0] ss:$8 sps:$4 sm:$0xff]  }
 0x1b7   :  { %6139 = vmatpush1.bf16.msra.mxu1 %v9160_v58  ;;  %v9253_v58 = vld [vmem:[%s13009_s1 + $0x7c4] ss:$8 sps:$4 sm:$0xff]  }
 0x1b8   :  { %6713 = vmatpush1.bf16.msra.mxu0 %v9163_v40  ;;  %6140 = vmatprep.subr.bf16.mxu1 %v9168_v4  ;;  %v9256_v40 = vld [vmem:[%s13009_s1 + $0x15c4] ss:$8 sps:$4 sm:$0xff]   ;;  %v9251_v4 = vld [vmem:[%s13009_s1 + $0x7c0] ss:$8 sps:$4 sm:$0xff]  }
 0x1b9   :  { %6714 = vmatprep.subr.bf16.mxu0 %v9171_v5  ;;  %v9254_v5 = vld [vmem:[%s13009_s1 + $0x15c0] ss:$8 sps:$4 sm:$0xff]  }
 0x1bb   :  { %6141 = vmatpush1.bf16.msra.mxu1 %v9166_v6  ;;  %v9259_v6 = vld [vmem:[%s13009_s1 + $0x7d4] ss:$8 sps:$4 sm:$0xff]  }
 0x1bc   :  { %6715 = vmatpush1.bf16.msra.mxu0 %v9169_v7  ;;  %6142 = vmatprep.subr.bf16.mxu1 %v9174_v8  ;;  %v9262_v7 = vld [vmem:[%s13009_s1 + $0x15d4] ss:$8 sps:$4 sm:$0xff]   ;;  %v9257_v8 = vld [vmem:[%s13009_s1 + $0x7d0] ss:$8 sps:$4 sm:$0xff]  }
 0x1bd   :  { %6716 = vmatprep.subr.bf16.mxu0 %v9177_v9  ;;  %v9260_v9 = vld [vmem:[%s13009_s1 + $0x15d0] ss:$8 sps:$4 sm:$0xff]  }
 0x1bf   :  { %6143 = vmatpush1.bf16.msra.mxu1 %v9172_v10  ;;  %v9265_v10 = vld [vmem:[%s13009_s1 + $0x7e4] ss:$8 sps:$4 sm:$0xff]  }
 0x1c0   :  { %6717 = vmatpush1.bf16.msra.mxu0 %v9175_v60  ;;  %6153 = vmatprep.subr.bf16.mxu1 %v9181_v12  ;;  %v9268_v60 = vld [vmem:[%s13009_s1 + $0x15e4] ss:$8 sps:$4 sm:$0xff]   ;;  %v11604_v12 = vld [vmem:[%s13010_s0 + $0x10] sm:$0xff] }
 0x1c1   :  { %6727 = vmatprep.subr.bf16.mxu0 %v9184_v13  ;;  %v9890_v13 = vld [vmem:[%s13010_s0 + $0x28] sm:$0xff] }
 0x1c2   :  { %6145 = vmatmul.mubr.bf16.vlgmr.msra.gmra.mrb[0].mxu1 %v11421_v14 }
 0x1c3   :  { %6719 = vmatmul.mubr.bf16.vlgmr.msra.gmra.mrb[0].mxu0 %v11425_v15  ;;  %6154 = vmatpush1.bf16.msra.mxu1 %v9179_v16  ;;  %v1183_v16 = vcombine.high %v9890_v13, %v9890_v13  ;;  %v9346_v13 = vld [vmem:[%s13009_s1 + $0x16b4] ss:$8 sps:$4 sm:$0xff]  }
 0x1c4   :  { %6728 = vmatpush1.bf16.msra.mxu0 %v9182_v19  ;;  %6155 = vmatprep.subr.bf16.mxu1 %v9187_v1  ;;  %v9263_v19 = vld [vmem:[%s13009_s1 + $0x7e0] ss:$8 sps:$4 sm:$0xff]  }
 0x1c5   :  { %6729 = vmatprep.subr.bf16.mxu0 %v9190_v42  ;;  %6185 = vmatprep.mubr.bf16.mxu1 %v1035_v20  ;;  %v9266_v1 = vld [vmem:[%s13009_s1 + $0x15e0] ss:$8 sps:$4 sm:$0xff]   ;;  %v9271_v42 = vld [vmem:[%s13009_s1 + $0x7f4] ss:$8 sps:$4 sm:$0xff]  }
 0x1c6   :  { %6759 = vmatprep.mubr.bf16.mxu0 %v1230_v21  ;;  %v9274_v20 = vld [vmem:[%s13009_s1 + $0x15f4] ss:$8 sps:$4 sm:$0xff]   ;;  %v11623_v21 = vrot.slane %v11604_v12, %v10067_v49 }
 0x1c7   :  { %6156 = vmatpush1.bf16.msra.mxu1 %v9185_v52  ;;  %v11626_v52 = vrot.slane %v1183_v16, %v10067_v49  ;;  %v9341_v16 = vld [vmem:[%s13009_s1 + $0x8b0] ss:$8 sps:$4 sm:$0xff]  }
 0x1c8   :  { %6730 = vmatpush1.bf16.msra.mxu0 %v9188_v23  ;;  %6157 = vmatprep.subr.bf16.mxu1 %v9193_v61  ;;  %v9269_v23 = vld [vmem:[%s13009_s1 + $0x7f0] ss:$8 sps:$4 sm:$0xff]  }
 0x1c9   :  { %6731 = vmatprep.subr.bf16.mxu0 %v9196_v11  ;;  %v9272_v61 = vld [vmem:[%s13009_s1 + $0x15f0] ss:$8 sps:$4 sm:$0xff]   ;;  %v9277_v11 = vld [vmem:[%s13009_s1 + $0x804] ss:$8 sps:$4 sm:$0xff]  }
 0x1cb   :  { %6158 = vmatpush1.bf16.msra.mxu1 %v9191_v24  ;;  %v9280_v24 = vld [vmem:[%s13009_s1 + $0x1604] ss:$8 sps:$4 sm:$0xff]  }
 0x1cc   :  { %6732 = vmatpush1.bf16.msra.mxu0 %v9194_v25  ;;  %6159 = vmatprep.subr.bf16.mxu1 %v9199_v26  ;;  %v1051_v25 = vcombine.high %v11623_v21, %v11623_v21  ;;  %v1199_v26 = vcombine.high %v11626_v52, %v11626_v52 }
 0x1cd   :  { %6733 = vmatprep.subr.bf16.mxu0 %v9202_v27  ;;  %v1033_v27 = vcombine.high %v11421_v14, %v11421_v14  ;;  %v9286_v14 = vld [vmem:[%s13009_s1 + $0x1614] ss:$8 sps:$4 sm:$0xff]  }
 0x1cf   :  { %6160 = vmatpush1.bf16.msra.mxu1 %v9197_v28  ;;  %v1228_v28 = vcombine.high %v11425_v15, %v11425_v15  ;;  %v11661_v15 = vrot.slane %v1051_v25, %v10067_v49  ;;  %v9356_v25 = vld [vmem:[%s13009_s1 + $0x16d0] ss:$8 sps:$4 sm:$0xff]  }
 0x1d0   :  { %6734 = vmatpush1.bf16.msra.mxu0 %v9200_v29  ;;  %6161 = vmatprep.subr.bf16.mxu1 %v9205_v30  ;;  %v9275_v29 = vld [vmem:[%s13009_s1 + $0x800] ss:$8 sps:$4 sm:$0xff]  }
 0x1d1   :  { %6735 = vmatprep.subr.bf16.mxu0 %v9208_v31  ;;  %v9278_v30 = vld [vmem:[%s13009_s1 + $0x1600] ss:$8 sps:$4 sm:$0xff]   ;;  %v9283_v31 = vld [vmem:[%s13009_s1 + $0x814] ss:$8 sps:$4 sm:$0xff]  }
 0x1d3   :  { %6162 = vmatpush1.bf16.msra.mxu1 %v9203_v32  ;;  %v11664_v32 = vrot.slane %v1199_v26, %v10067_v49  ;;  %v9361_v26 = vld [vmem:[%s13009_s1 + $0x8e4] ss:$8 sps:$4 sm:$0xff]  }
 0x1d4   :  { %6736 = vmatpush1.bf16.msra.mxu0 %v9206_v17  ;;  %6163 = vmatprep.subr.bf16.mxu1 %v9211_v34  ;;  %v9281_v17 = vld [vmem:[%s13009_s1 + $0x810] ss:$8 sps:$4 sm:$0xff]  }
 0x1d5   :  { %6737 = vmatprep.subr.bf16.mxu0 %v9214_v36  ;;  %v9284_v34 = vld [vmem:[%s13009_s1 + $0x1610] ss:$8 sps:$4 sm:$0xff]   ;;  %v9289_v36 = vld [vmem:[%s13009_s1 + $0x824] ss:$8 sps:$4 sm:$0xff]  }
 0x1d7   :  { %6164 = vmatpush1.bf16.msra.mxu1 %v9209_v37  ;;  %v9292_v37 = vld [vmem:[%s13009_s1 + $0x1624] ss:$8 sps:$4 sm:$0xff]  }
 0x1d8   :  { %6738 = vmatpush1.bf16.msra.mxu0 %v9212_v38  ;;  %6165 = vmatprep.subr.bf16.mxu1 %v9217_v39  ;;  %v9287_v38 = vld [vmem:[%s13009_s1 + $0x820] ss:$8 sps:$4 sm:$0xff]  }
 0x1d9   :  { %6739 = vmatprep.subr.bf16.mxu0 %v9220_v44  ;;  %v9290_v39 = vld [vmem:[%s13009_s1 + $0x1620] ss:$8 sps:$4 sm:$0xff]   ;;  %v9295_v44 = vld [vmem:[%s13009_s1 + $0x834] ss:$8 sps:$4 sm:$0xff]  }
 0x1db   :  { %6166 = vmatpush1.bf16.msra.mxu1 %v9215_v22  ;;  %v9298_v22 = vld [vmem:[%s13009_s1 + $0x1634] ss:$8 sps:$4 sm:$0xff]  }
 0x1dc   :  { %6740 = vmatpush1.bf16.msra.mxu0 %v9218_v33  ;;  %6167 = vmatprep.subr.bf16.mxu1 %v9223_v46  ;;  %v9293_v33 = vld [vmem:[%s13009_s1 + $0x830] ss:$8 sps:$4 sm:$0xff]  }
 0x1dd   :  { %6741 = vmatprep.subr.bf16.mxu0 %v9226_v47  ;;  %v9296_v46 = vld [vmem:[%s13009_s1 + $0x1630] ss:$8 sps:$4 sm:$0xff]   ;;  %v9301_v47 = vld [vmem:[%s13009_s1 + $0x844] ss:$8 sps:$4 sm:$0xff]  }
 0x1df   :  { %6168 = vmatpush1.bf16.msra.mxu1 %v9221_v48  ;;  %v9304_v48 = vld [vmem:[%s13009_s1 + $0x1644] ss:$8 sps:$4 sm:$0xff]  }
 0x1e0   :  { %6742 = vmatpush1.bf16.msra.mxu0 %v9224_v18  ;;  %6169 = vmatprep.subr.bf16.mxu1 %v9229_v41  ;;  %v9299_v18 = vld [vmem:[%s13009_s1 + $0x840] ss:$8 sps:$4 sm:$0xff]  }
 0x1e1   :  { %6743 = vmatprep.subr.bf16.mxu0 %v9232_v50  ;;  %v9302_v41 = vld [vmem:[%s13009_s1 + $0x1640] ss:$8 sps:$4 sm:$0xff]   ;;  %v9307_v50 = vld [vmem:[%s13009_s1 + $0x854] ss:$8 sps:$4 sm:$0xff]  }
 0x1e3   :  { %6170 = vmatpush1.bf16.msra.mxu1 %v9227_v51  ;;  %v9310_v51 = vld [vmem:[%s13009_s1 + $0x1654] ss:$8 sps:$4 sm:$0xff]  }
 0x1e4   :  { %6744 = vmatpush1.bf16.msra.mxu0 %v9230_v53  ;;  %6171 = vmatprep.subr.bf16.mxu1 %v9235_v54  ;;  %v9305_v53 = vld [vmem:[%s13009_s1 + $0x850] ss:$8 sps:$4 sm:$0xff]  }
 0x1e5   :  { %6745 = vmatprep.subr.bf16.mxu0 %v9238_v55  ;;  %v9308_v54 = vld [vmem:[%s13009_s1 + $0x1650] ss:$8 sps:$4 sm:$0xff]   ;;  %v9313_v55 = vld [vmem:[%s13009_s1 + $0x864] ss:$8 sps:$4 sm:$0xff]  }
 0x1e7   :  { %6172 = vmatpush1.bf16.msra.mxu1 %v9233_v56  ;;  %v9316_v56 = vld [vmem:[%s13009_s1 + $0x1664] ss:$8 sps:$4 sm:$0xff]  }
 0x1e8   :  { %6746 = vmatpush1.bf16.msra.mxu0 %v9236_v57  ;;  %6173 = vmatprep.subr.bf16.mxu1 %v9241_v59  ;;  %v9311_v57 = vld [vmem:[%s13009_s1 + $0x860] ss:$8 sps:$4 sm:$0xff]  }
 0x1e9   :  { %6747 = vmatprep.subr.bf16.mxu0 %v9244_v62  ;;  %v9314_v59 = vld [vmem:[%s13009_s1 + $0x1660] ss:$8 sps:$4 sm:$0xff]   ;;  %v9319_v62 = vld [vmem:[%s13009_s1 + $0x874] ss:$8 sps:$4 sm:$0xff]  }
 0x1eb   :  { %6174 = vmatpush1.bf16.msra.mxu1 %v9239_v63  ;;  %v9322_v63 = vld [vmem:[%s13009_s1 + $0x1674] ss:$8 sps:$4 sm:$0xff]  }
 0x1ec   :  { %6748 = vmatpush1.bf16.msra.mxu0 %v9242_v45  ;;  %6175 = vmatprep.subr.bf16.mxu1 %v9247_v35  ;;  %v9317_v45 = vld [vmem:[%s13009_s1 + $0x870] ss:$8 sps:$4 sm:$0xff]  }
 0x1ed   :  { %6749 = vmatprep.subr.bf16.mxu0 %v9250_v0  ;;  %v9320_v35 = vld [vmem:[%s13009_s1 + $0x1670] ss:$8 sps:$4 sm:$0xff]   ;;  %v9325_v0 = vld [vmem:[%s13009_s1 + $0x884] ss:$8 sps:$4 sm:$0xff]  }
 0x1ef   :  { %6176 = vmatpush1.bf16.msra.mxu1 %v9245_v2  ;;  %v9328_v2 = vld [vmem:[%s13009_s1 + $0x1684] ss:$8 sps:$4 sm:$0xff]  }
 0x1f0   :  { %6750 = vmatpush1.bf16.msra.mxu0 %v9248_v3  ;;  %6177 = vmatprep.subr.bf16.mxu1 %v9253_v58  ;;  %v9323_v3 = vld [vmem:[%s13009_s1 + $0x880] ss:$8 sps:$4 sm:$0xff]  }
 0x1f1   :  { %6751 = vmatprep.subr.bf16.mxu0 %v9256_v40  ;;  %v9326_v58 = vld [vmem:[%s13009_s1 + $0x1680] ss:$8 sps:$4 sm:$0xff]   ;;  %v9331_v40 = vld [vmem:[%s13009_s1 + $0x894] ss:$8 sps:$4 sm:$0xff]  }
 0x1f3   :  { %6178 = vmatpush1.bf16.msra.mxu1 %v9251_v4  ;;  %v9334_v4 = vld [vmem:[%s13009_s1 + $0x1694] ss:$8 sps:$4 sm:$0xff]  }
 0x1f4   :  { %6752 = vmatpush1.bf16.msra.mxu0 %v9254_v5  ;;  %6179 = vmatprep.subr.bf16.mxu1 %v9259_v6  ;;  %v9329_v5 = vld [vmem:[%s13009_s1 + $0x890] ss:$8 sps:$4 sm:$0xff]  }
 0x1f5   :  { %6753 = vmatprep.subr.bf16.mxu0 %v9262_v7  ;;  %v9332_v6 = vld [vmem:[%s13009_s1 + $0x1690] ss:$8 sps:$4 sm:$0xff]   ;;  %v9337_v7 = vld [vmem:[%s13009_s1 + $0x8a4] ss:$8 sps:$4 sm:$0xff]  }
 0x1f7   :  { %6180 = vmatpush1.bf16.msra.mxu1 %v9257_v8  ;;  %v9340_v8 = vld [vmem:[%s13009_s1 + $0x16a4] ss:$8 sps:$4 sm:$0xff]  }
 0x1f8   :  { %6754 = vmatpush1.bf16.msra.mxu0 %v9260_v9  ;;  %6181 = vmatprep.subr.bf16.mxu1 %v9265_v10  ;;  %v9335_v9 = vld [vmem:[%s13009_s1 + $0x8a0] ss:$8 sps:$4 sm:$0xff]  }
 0x1f9   :  { %6755 = vmatprep.subr.bf16.mxu0 %v9268_v60  ;;  %v9338_v10 = vld [vmem:[%s13009_s1 + $0x16a0] ss:$8 sps:$4 sm:$0xff]   ;;  %v9343_v60 = vld [vmem:[%s13009_s1 + $0x8b4] ss:$8 sps:$4 sm:$0xff]  }
 0x1fb   :  { %6182 = vmatpush1.bf16.msra.mxu1 %v9263_v19  ;;  %v9344_v19 = vld [vmem:[%s13009_s1 + $0x16b0] ss:$8 sps:$4 sm:$0xff]  }
 0x1fc   :  { %6756 = vmatpush1.bf16.msra.mxu0 %v9266_v1  ;;  %6183 = vmatprep.subr.bf16.mxu1 %v9271_v42  ;;  %v9349_v1 = vld [vmem:[%s13009_s1 + $0x8c4] ss:$8 sps:$4 sm:$0xff]  }
 0x1fd   :  { %6757 = vmatprep.subr.bf16.mxu0 %v9274_v20  ;;  %v9352_v42 = vld [vmem:[%s13009_s1 + $0x16c4] ss:$8 sps:$4 sm:$0xff]   ;;  %v9347_v20 = vld [vmem:[%s13009_s1 + $0x8c0] ss:$8 sps:$4 sm:$0xff]  }
 0x1ff   :  { %6184 = vmatpush1.bf16.msra.mxu1 %v9269_v23  ;;  %v9350_v23 = vld [vmem:[%s13009_s1 + $0x16c0] ss:$8 sps:$4 sm:$0xff]  }
 0x200   :  { %6758 = vmatpush1.bf16.msra.mxu0 %v9272_v61  ;;  %6194 = vmatprep.subr.bf16.mxu1 %v9277_v11  ;;  %v9355_v61 = vld [vmem:[%s13009_s1 + $0x8d4] ss:$8 sps:$4 sm:$0xff]  }
 0x201   :  { %6768 = vmatprep.subr.bf16.mxu0 %v9280_v24  ;;  %v9358_v11 = vld [vmem:[%s13009_s1 + $0x16d4] ss:$8 sps:$4 sm:$0xff]   ;;  %v9353_v24 = vld [vmem:[%s13009_s1 + $0x8d0] ss:$8 sps:$4 sm:$0xff]  }
 0x202   :  { %6186 = vmatmul.mubr.bf16.vlgmr.msra.gmra.mrb[0].mxu1 %v1033_v27  ;;  %v9364_v27 = vld [vmem:[%s13009_s1 + $0x16e4] ss:$8 sps:$4 sm:$0xff]  }
 0x203   :  { %6760 = vmatmul.mubr.bf16.vlgmr.msra.gmra.mrb[0].mxu0 %v1228_v28  ;;  %6195 = vmatpush1.bf16.msra.mxu1 %v9275_v29  ;;  %v9359_v28 = vld [vmem:[%s13009_s1 + $0x8e0] ss:$8 sps:$4 sm:$0xff]  }
 0x204   :  { %6769 = vmatpush1.bf16.msra.mxu0 %v9278_v30  ;;  %6196 = vmatprep.subr.bf16.mxu1 %v9283_v31  ;;  %v9362_v29 = vld [vmem:[%s13009_s1 + $0x16e0] ss:$8 sps:$4 sm:$0xff]   ;;  %v9367_v30 = vld [vmem:[%s13009_s1 + $0x8f4] ss:$8 sps:$4 sm:$0xff]  }
 0x205   :  { %6770 = vmatprep.subr.bf16.mxu0 %v9286_v14  ;;  %6226 = vmatprep.mubr.bf16.mxu1 %v11661_v15  ;;  %v9370_v31 = vld [vmem:[%s13009_s1 + $0x16f4] ss:$8 sps:$4 sm:$0xff]   ;;  %v9365_v14 = vld [vmem:[%s13009_s1 + $0x8f0] ss:$8 sps:$4 sm:$0xff]  }
 0x206   :  { %6800 = vmatprep.mubr.bf16.mxu0 %v11664_v32 }
 0x207   :  { %6197 = vmatpush1.bf16.msra.mxu1 %v9281_v17  ;;  %v9368_v17 = vld [vmem:[%s13009_s1 + $0x16f0] ss:$8 sps:$4 sm:$0xff]  }
 0x208   :  { %6771 = vmatpush1.bf16.msra.mxu0 %v9284_v34  ;;  %6198 = vmatprep.subr.bf16.mxu1 %v9289_v36  ;;  %v9373_v34 = vld [vmem:[%s13009_s1 + $0x904] ss:$8 sps:$4 sm:$0xff]  }
 0x209   :  { %6772 = vmatprep.subr.bf16.mxu0 %v9292_v37  ;;  %v9377_v36 = vld [vmem:[%s13009_s1 + $0x1704] ss:$8 sps:$4 sm:$0xff]   ;;  %v11850_v37 = vrot.slane %v11623_v21, %v10067_v49  ;;  %v9380_v21 = vld [vmem:[%s13009_s1 + $0x914] ss:$8 sps:$4 sm:$0xff]  }
 0x20b   :  { %6199 = vmatpush1.bf16.msra.mxu1 %v9287_v38  ;;  %v11854_v38 = vrot.slane %v11626_v52, %v10067_v49  ;;  %v9383_v52 = vld [vmem:[%s13009_s1 + $0x1714] ss:$8 sps:$4 sm:$0xff]  }
 0x20c   :  { %6773 = vmatpush1.bf16.msra.mxu0 %v9290_v39  ;;  %6200 = vmatprep.subr.bf16.mxu1 %v9295_v44  ;;  %v9371_v39 = vld [vmem:[%s13009_s1 + $0x900] ss:$8 sps:$4 sm:$0xff]  }
 0x20d   :  { %6774 = vmatprep.subr.bf16.mxu0 %v9298_v22  ;;  %v9375_v44 = vld [vmem:[%s13009_s1 + $0x1700] ss:$8 sps:$4 sm:$0xff]   ;;  %v1083_v22 = vcombine.high %v11661_v15, %v11661_v15  ;;  %v9386_v15 = vld [vmem:[%s13009_s1 + $0x924] ss:$8 sps:$4 sm:$0xff]  }
 0x20f   :  { %6201 = vmatpush1.bf16.msra.mxu1 %v9293_v33  ;;  %v1231_v33 = vcombine.high %v11664_v32, %v11664_v32  ;;  %v9389_v32 = vld [vmem:[%s13009_s1 + $0x1724] ss:$8 sps:$4 sm:$0xff]  }
 0x210   :  { %6775 = vmatpush1.bf16.msra.mxu0 %v9296_v46  ;;  %6202 = vmatprep.subr.bf16.mxu1 %v9301_v47  ;;  %v9378_v46 = vld [vmem:[%s13009_s1 + $0x910] ss:$8 sps:$4 sm:$0xff]  }
 0x211   :  { %6776 = vmatprep.subr.bf16.mxu0 %v9304_v48  ;;  %v9381_v47 = vld [vmem:[%s13009_s1 + $0x1710] ss:$8 sps:$4 sm:$0xff]   ;;  %v9384_v48 = vld [vmem:[%s13009_s1 + $0x920] ss:$8 sps:$4 sm:$0xff]  }
 0x213   :  { %6203 = vmatpush1.bf16.msra.mxu1 %v9299_v18  ;;  %v9387_v18 = vld [vmem:[%s13009_s1 + $0x1720] ss:$8 sps:$4 sm:$0xff]  }
 0x214   :  { %6777 = vmatpush1.bf16.msra.mxu0 %v9302_v41  ;;  %6204 = vmatprep.subr.bf16.mxu1 %v9307_v50  ;;  %v9392_v41 = vld [vmem:[%s13009_s1 + $0x934] ss:$8 sps:$4 sm:$0xff]  }
 0x215   :  { %6778 = vmatprep.subr.bf16.mxu0 %v9310_v51  ;;  %v9395_v50 = vld [vmem:[%s13009_s1 + $0x1734] ss:$8 sps:$4 sm:$0xff]   ;;  %v9390_v51 = vld [vmem:[%s13009_s1 + $0x930] ss:$8 sps:$4 sm:$0xff]  }
 0x217   :  { %6205 = vmatpush1.bf16.msra.mxu1 %v9305_v53  ;;  %v9393_v53 = vld [vmem:[%s13009_s1 + $0x1730] ss:$8 sps:$4 sm:$0xff]  }
 0x218   :  { %6779 = vmatpush1.bf16.msra.mxu0 %v9308_v54  ;;  %6206 = vmatprep.subr.bf16.mxu1 %v9313_v55  ;;  %v9398_v54 = vld [vmem:[%s13009_s1 + $0x944] ss:$8 sps:$4 sm:$0xff]  }
 0x219   :  { %6780 = vmatprep.subr.bf16.mxu0 %v9316_v56  ;;  %v9401_v55 = vld [vmem:[%s13009_s1 + $0x1744] ss:$8 sps:$4 sm:$0xff]   ;;  %v9396_v56 = vld [vmem:[%s13009_s1 + $0x940] ss:$8 sps:$4 sm:$0xff]  }
 0x21b   :  { %6207 = vmatpush1.bf16.msra.mxu1 %v9311_v57  ;;  %v9399_v57 = vld [vmem:[%s13009_s1 + $0x1740] ss:$8 sps:$4 sm:$0xff]  }
 0x21c   :  { %6781 = vmatpush1.bf16.msra.mxu0 %v9314_v59  ;;  %6208 = vmatprep.subr.bf16.mxu1 %v9319_v62  ;;  %v9404_v59 = vld [vmem:[%s13009_s1 + $0x954] ss:$8 sps:$4 sm:$0xff]  }
 0x21d   :  { %6782 = vmatprep.subr.bf16.mxu0 %v9322_v63  ;;  %v9407_v62 = vld [vmem:[%s13009_s1 + $0x1754] ss:$8 sps:$4 sm:$0xff]   ;;  %v9402_v63 = vld [vmem:[%s13009_s1 + $0x950] ss:$8 sps:$4 sm:$0xff]  }
 0x21f   :  { %6209 = vmatpush1.bf16.msra.mxu1 %v9317_v45  ;;  %v9405_v45 = vld [vmem:[%s13009_s1 + $0x1750] ss:$8 sps:$4 sm:$0xff]  }
 0x220   :  { %6783 = vmatpush1.bf16.msra.mxu0 %v9320_v35  ;;  %6210 = vmatprep.subr.bf16.mxu1 %v9325_v0  ;;  %v9410_v35 = vld [vmem:[%s13009_s1 + $0x964] ss:$8 sps:$4 sm:$0xff]  }
 0x221   :  { %6784 = vmatprep.subr.bf16.mxu0 %v9328_v2  ;;  %v9413_v0 = vld [vmem:[%s13009_s1 + $0x1764] ss:$8 sps:$4 sm:$0xff]   ;;  %v9408_v2 = vld [vmem:[%s13009_s1 + $0x960] ss:$8 sps:$4 sm:$0xff]  }
 0x223   :  { %6211 = vmatpush1.bf16.msra.mxu1 %v9323_v3  ;;  %v9411_v3 = vld [vmem:[%s13009_s1 + $0x1760] ss:$8 sps:$4 sm:$0xff]  }
 0x224   :  { %6785 = vmatpush1.bf16.msra.mxu0 %v9326_v58  ;;  %6212 = vmatprep.subr.bf16.mxu1 %v9331_v40  ;;  %v9416_v58 = vld [vmem:[%s13009_s1 + $0x974] ss:$8 sps:$4 sm:$0xff]  }
 0x225   :  { %6786 = vmatprep.subr.bf16.mxu0 %v9334_v4  ;;  %v9419_v40 = vld [vmem:[%s13009_s1 + $0x1774] ss:$8 sps:$4 sm:$0xff]   ;;  %v9414_v4 = vld [vmem:[%s13009_s1 + $0x970] ss:$8 sps:$4 sm:$0xff]  }
 0x227   :  { %6213 = vmatpush1.bf16.msra.mxu1 %v9329_v5  ;;  %v9417_v5 = vld [vmem:[%s13009_s1 + $0x1770] ss:$8 sps:$4 sm:$0xff]  }
 0x228   :  { %6787 = vmatpush1.bf16.msra.mxu0 %v9332_v6  ;;  %6214 = vmatprep.subr.bf16.mxu1 %v9337_v7  ;;  %v9422_v6 = vld [vmem:[%s13009_s1 + $0x984] ss:$8 sps:$4 sm:$0xff]  }
 0x229   :  { %6788 = vmatprep.subr.bf16.mxu0 %v9340_v8  ;;  %v9425_v7 = vld [vmem:[%s13009_s1 + $0x1784] ss:$8 sps:$4 sm:$0xff]   ;;  %v9420_v8 = vld [vmem:[%s13009_s1 + $0x980] ss:$8 sps:$4 sm:$0xff]  }
 0x22b   :  { %6215 = vmatpush1.bf16.msra.mxu1 %v9335_v9  ;;  %v9423_v9 = vld [vmem:[%s13009_s1 + $0x1780] ss:$8 sps:$4 sm:$0xff]  }
 0x22c   :  { %6789 = vmatpush1.bf16.msra.mxu0 %v9338_v10  ;;  %6216 = vmatprep.subr.bf16.mxu1 %v9343_v60  ;;  %v9428_v10 = vld [vmem:[%s13009_s1 + $0x994] ss:$8 sps:$4 sm:$0xff]  }
 0x22d   :  { %6790 = vmatprep.subr.bf16.mxu0 %v9346_v13  ;;  %v9431_v60 = vld [vmem:[%s13009_s1 + $0x1794] ss:$8 sps:$4 sm:$0xff]   ;;  %v9426_v13 = vld [vmem:[%s13009_s1 + $0x990] ss:$8 sps:$4 sm:$0xff]  }
 0x22f   :  { %6217 = vmatpush1.bf16.msra.mxu1 %v9341_v16  ;;  %v9429_v16 = vld [vmem:[%s13009_s1 + $0x1790] ss:$8 sps:$4 sm:$0xff]  }
 0x230   :  { %6791 = vmatpush1.bf16.msra.mxu0 %v9344_v19  ;;  %6218 = vmatprep.subr.bf16.mxu1 %v9349_v1  ;;  %v9434_v19 = vld [vmem:[%s13009_s1 + $0x9a4] ss:$8 sps:$4 sm:$0xff]  }
 0x231   :  { %6792 = vmatprep.subr.bf16.mxu0 %v9352_v42  ;;  %v9437_v1 = vld [vmem:[%s13009_s1 + $0x17a4] ss:$8 sps:$4 sm:$0xff]   ;;  %v9432_v42 = vld [vmem:[%s13009_s1 + $0x9a0] ss:$8 sps:$4 sm:$0xff]  }
 0x233   :  { %6219 = vmatpush1.bf16.msra.mxu1 %v9347_v20  ;;  %v9435_v20 = vld [vmem:[%s13009_s1 + $0x17a0] ss:$8 sps:$4 sm:$0xff]  }
 0x234   :  { %6793 = vmatpush1.bf16.msra.mxu0 %v9350_v23  ;;  %6220 = vmatprep.subr.bf16.mxu1 %v9355_v61  ;;  %v9440_v23 = vld [vmem:[%s13009_s1 + $0x9b4] ss:$8 sps:$4 sm:$0xff]  }
 0x235   :  { %6794 = vmatprep.subr.bf16.mxu0 %v9358_v11  ;;  %v9443_v61 = vld [vmem:[%s13009_s1 + $0x17b4] ss:$8 sps:$4 sm:$0xff]   ;;  %v9438_v11 = vld [vmem:[%s13009_s1 + $0x9b0] ss:$8 sps:$4 sm:$0xff]  }
 0x237   :  { %6221 = vmatpush1.bf16.msra.mxu1 %v9353_v24  ;;  %v9441_v24 = vld [vmem:[%s13009_s1 + $0x17b0] ss:$8 sps:$4 sm:$0xff]  }
 0x238   :  { %6795 = vmatpush1.bf16.msra.mxu0 %v9356_v25  ;;  %6222 = vmatprep.subr.bf16.mxu1 %v9361_v26  ;;  %v9446_v25 = vld [vmem:[%s13009_s1 + $0x9c4] ss:$8 sps:$4 sm:$0xff]  }
 0x239   :  { %6796 = vmatprep.subr.bf16.mxu0 %v9364_v27  ;;  %v9449_v26 = vld [vmem:[%s13009_s1 + $0x17c4] ss:$8 sps:$4 sm:$0xff]   ;;  %v9444_v27 = vld [vmem:[%s13009_s1 + $0x9c0] ss:$8 sps:$4 sm:$0xff]  }
 0x23b   :  { %6223 = vmatpush1.bf16.msra.mxu1 %v9359_v28  ;;  %v9447_v28 = vld [vmem:[%s13009_s1 + $0x17c0] ss:$8 sps:$4 sm:$0xff]  }
 0x23c   :  { %6797 = vmatpush1.bf16.msra.mxu0 %v9362_v29  ;;  %6224 = vmatprep.subr.bf16.mxu1 %v9367_v30  ;;  %v9452_v29 = vld [vmem:[%s13009_s1 + $0x9d4] ss:$8 sps:$4 sm:$0xff]  }
 0x23d   :  { %6798 = vmatprep.subr.bf16.mxu0 %v9370_v31  ;;  %v9455_v30 = vld [vmem:[%s13009_s1 + $0x17d4] ss:$8 sps:$4 sm:$0xff]   ;;  %v9450_v31 = vld [vmem:[%s13009_s1 + $0x9d0] ss:$8 sps:$4 sm:$0xff]  }
 0x23f   :  { %6225 = vmatpush1.bf16.msra.mxu1 %v9365_v14  ;;  %v9453_v14 = vld [vmem:[%s13009_s1 + $0x17d0] ss:$8 sps:$4 sm:$0xff]  }
 0x240   :  { %6799 = vmatpush1.bf16.msra.mxu0 %v9368_v17  ;;  %6235 = vmatprep.subr.bf16.mxu1 %v9373_v34  ;;  %v9458_v17 = vld [vmem:[%s13009_s1 + $0x9e4] ss:$8 sps:$4 sm:$0xff]  }
 0x241   :  { %6809 = vmatprep.subr.bf16.mxu0 %v9377_v36  ;;  %v9461_v34 = vld [vmem:[%s13009_s1 + $0x17e4] ss:$8 sps:$4 sm:$0xff]   ;;  %v1036_v36 = vcombine.high %v11604_v12, %v11604_v12  ;;  %v9464_v12 = vld [vmem:[%s13009_s1 + $0x9f4] ss:$8 sps:$4 sm:$0xff]  }
 0x242   :  { %6227 = vmatmul.mubr.bf16.vlgmr.msra.gmra.mrb[0].mxu1 %v11850_v37 }
 0x243   :  { %6801 = vmatmul.mubr.bf16.vlgmr.msra.gmra.mrb[0].mxu0 %v11854_v38  ;;  %6236 = vmatpush1.bf16.msra.mxu1 %v9371_v39  ;;  %v12035_v39 = vld [vmem:[%s13010_s0 + $0x30] sm:$0xff] }
 0x244   :  { %6810 = vmatpush1.bf16.msra.mxu0 %v9375_v44  ;;  %6237 = vmatprep.subr.bf16.mxu1 %v9380_v21  ;;  %v9456_v44 = vld [vmem:[%s13009_s1 + $0x9e0] ss:$8 sps:$4 sm:$0xff]  }
 0x245   :  { %6811 = vmatprep.subr.bf16.mxu0 %v9383_v52  ;;  %6267 = vmatprep.mubr.bf16.mxu1 %v1083_v22  ;;  %v9459_v21 = vld [vmem:[%s13009_s1 + $0x17e0] ss:$8 sps:$4 sm:$0xff]   ;;  %v9467_v52 = vld [vmem:[%s13009_s1 + $0x17f4] ss:$8 sps:$4 sm:$0xff]   ;;  %v12050_v22 = vrot.slane %v1036_v36, %v10067_v49  ;;  %v9534_v36 = vld [vmem:[%s13009_s1 + $0xab0] ss:$8 sps:$4 sm:$0xff]  }
 0x246   :  { %6841 = vmatprep.mubr.bf16.mxu0 %v1231_v33  ;;  %v12054_v33 = vrot.slane %v12035_v39, %v10067_v49 }
 0x247   :  { %6238 = vmatpush1.bf16.msra.mxu1 %v9378_v46  ;;  %v9462_v46 = vld [vmem:[%s13009_s1 + $0x9f0] ss:$8 sps:$4 sm:$0xff]  }
 0x248   :  { %6812 = vmatpush1.bf16.msra.mxu0 %v9381_v47  ;;  %6239 = vmatprep.subr.bf16.mxu1 %v9386_v15  ;;  %v9465_v47 = vld [vmem:[%s13009_s1 + $0x17f0] ss:$8 sps:$4 sm:$0xff]   ;;  %v9470_v15 = vld [vmem:[%s13009_s1 + $0xa04] ss:$8 sps:$4 sm:$0xff]  }
 0x249   :  { %6813 = vmatprep.subr.bf16.mxu0 %v9389_v32  ;;  %v9473_v32 = vld [vmem:[%s13009_s1 + $0x1804] ss:$8 sps:$4 sm:$0xff]  }
 0x24b   :  { %6240 = vmatpush1.bf16.msra.mxu1 %v9384_v48  ;;  %v1052_v48 = vcombine.high %v12050_v22, %v12050_v22 }
 0x24c   :  { %6814 = vmatpush1.bf16.msra.mxu0 %v9387_v18  ;;  %6241 = vmatprep.subr.bf16.mxu1 %v9392_v41  ;;  %v1247_v18 = vcombine.high %v12054_v33, %v12054_v33  ;;  %v1081_v41 = vcombine.high %v11850_v37, %v11850_v37  ;;  %v9479_v37 = vld [vmem:[%s13009_s1 + $0x1814] ss:$8 sps:$4 sm:$0xff]  }
 0x24d   :  { %6815 = vmatprep.subr.bf16.mxu0 %v9395_v50  ;;  %v1229_v50 = vcombine.high %v11854_v38, %v11854_v38  ;;  %v12089_v38 = vrot.slane %v1052_v48, %v10067_v49  ;;  %v9549_v48 = vld [vmem:[%s13009_s1 + $0x18d0] ss:$8 sps:$4 sm:$0xff]  }
 0x24f   :  { %6242 = vmatpush1.bf16.msra.mxu1 %v9390_v51  ;;  %v9468_v51 = vld [vmem:[%s13009_s1 + $0xa00] ss:$8 sps:$4 sm:$0xff]  }
 0x250   :  { %6816 = vmatpush1.bf16.msra.mxu0 %v9393_v53  ;;  %6243 = vmatprep.subr.bf16.mxu1 %v9398_v54  ;;  %v9471_v53 = vld [vmem:[%s13009_s1 + $0x1800] ss:$8 sps:$4 sm:$0xff]   ;;  %v9476_v54 = vld [vmem:[%s13009_s1 + $0xa14] ss:$8 sps:$4 sm:$0xff]  }
 0x251   :  { %6817 = vmatprep.subr.bf16.mxu0 %v9401_v55  ;;  %v12092_v55 = vrot.slane %v1247_v18, %v10067_v49  ;;  %v9554_v18 = vld [vmem:[%s13009_s1 + $0xae4] ss:$8 sps:$4 sm:$0xff]  }
 0x253   :  { %6244 = vmatpush1.bf16.msra.mxu1 %v9396_v56  ;;  %v9474_v56 = vld [vmem:[%s13009_s1 + $0xa10] ss:$8 sps:$4 sm:$0xff]  }
 0x254   :  { %6818 = vmatpush1.bf16.msra.mxu0 %v9399_v57  ;;  %6245 = vmatprep.subr.bf16.mxu1 %v9404_v59  ;;  %v9477_v57 = vld [vmem:[%s13009_s1 + $0x1810] ss:$8 sps:$4 sm:$0xff]   ;;  %v9482_v59 = vld [vmem:[%s13009_s1 + $0xa24] ss:$8 sps:$4 sm:$0xff]  }
 0x255   :  { %6819 = vmatprep.subr.bf16.mxu0 %v9407_v62  ;;  %v9485_v62 = vld [vmem:[%s13009_s1 + $0x1824] ss:$8 sps:$4 sm:$0xff]  }
 0x257   :  { %6246 = vmatpush1.bf16.msra.mxu1 %v9402_v63  ;;  %v9480_v63 = vld [vmem:[%s13009_s1 + $0xa20] ss:$8 sps:$4 sm:$0xff]  }
 0x258   :  { %6820 = vmatpush1.bf16.msra.mxu0 %v9405_v45  ;;  %6247 = vmatprep.subr.bf16.mxu1 %v9410_v35  ;;  %v9483_v45 = vld [vmem:[%s13009_s1 + $0x1820] ss:$8 sps:$4 sm:$0xff]   ;;  %v9488_v35 = vld [vmem:[%s13009_s1 + $0xa34] ss:$8 sps:$4 sm:$0xff]  }
 0x259   :  { %6821 = vmatprep.subr.bf16.mxu0 %v9413_v0  ;;  %v9491_v0 = vld [vmem:[%s13009_s1 + $0x1834] ss:$8 sps:$4 sm:$0xff]  }
 0x25b   :  { %6248 = vmatpush1.bf16.msra.mxu1 %v9408_v2  ;;  %v9486_v2 = vld [vmem:[%s13009_s1 + $0xa30] ss:$8 sps:$4 sm:$0xff]  }
 0x25c   :  { %6822 = vmatpush1.bf16.msra.mxu0 %v9411_v3  ;;  %6249 = vmatprep.subr.bf16.mxu1 %v9416_v58  ;;  %v9489_v3 = vld [vmem:[%s13009_s1 + $0x1830] ss:$8 sps:$4 sm:$0xff]   ;;  %v9494_v58 = vld [vmem:[%s13009_s1 + $0xa44] ss:$8 sps:$4 sm:$0xff]  }
 0x25d   :  { %6823 = vmatprep.subr.bf16.mxu0 %v9419_v40  ;;  %v9497_v40 = vld [vmem:[%s13009_s1 + $0x1844] ss:$8 sps:$4 sm:$0xff]  }
 0x25f   :  { %6250 = vmatpush1.bf16.msra.mxu1 %v9414_v4  ;;  %v9492_v4 = vld [vmem:[%s13009_s1 + $0xa40] ss:$8 sps:$4 sm:$0xff]  }
 0x260   :  { %6824 = vmatpush1.bf16.msra.mxu0 %v9417_v5  ;;  %6251 = vmatprep.subr.bf16.mxu1 %v9422_v6  ;;  %v9495_v5 = vld [vmem:[%s13009_s1 + $0x1840] ss:$8 sps:$4 sm:$0xff]   ;;  %v9500_v6 = vld [vmem:[%s13009_s1 + $0xa54] ss:$8 sps:$4 sm:$0xff]  }
 0x261   :  { %6825 = vmatprep.subr.bf16.mxu0 %v9425_v7  ;;  %v9503_v7 = vld [vmem:[%s13009_s1 + $0x1854] ss:$8 sps:$4 sm:$0xff]  }
 0x263   :  { %6252 = vmatpush1.bf16.msra.mxu1 %v9420_v8  ;;  %v9498_v8 = vld [vmem:[%s13009_s1 + $0xa50] ss:$8 sps:$4 sm:$0xff]  }
 0x264   :  { %6826 = vmatpush1.bf16.msra.mxu0 %v9423_v9  ;;  %6253 = vmatprep.subr.bf16.mxu1 %v9428_v10  ;;  %v9501_v9 = vld [vmem:[%s13009_s1 + $0x1850] ss:$8 sps:$4 sm:$0xff]   ;;  %v9506_v10 = vld [vmem:[%s13009_s1 + $0xa64] ss:$8 sps:$4 sm:$0xff]  }
 0x265   :  { %6827 = vmatprep.subr.bf16.mxu0 %v9431_v60  ;;  %v9509_v60 = vld [vmem:[%s13009_s1 + $0x1864] ss:$8 sps:$4 sm:$0xff]  }
 0x267   :  { %6254 = vmatpush1.bf16.msra.mxu1 %v9426_v13  ;;  %v9504_v13 = vld [vmem:[%s13009_s1 + $0xa60] ss:$8 sps:$4 sm:$0xff]  }
 0x268   :  { %6828 = vmatpush1.bf16.msra.mxu0 %v9429_v16  ;;  %6255 = vmatprep.subr.bf16.mxu1 %v9434_v19  ;;  %v9507_v16 = vld [vmem:[%s13009_s1 + $0x1860] ss:$8 sps:$4 sm:$0xff]   ;;  %v9512_v19 = vld [vmem:[%s13009_s1 + $0xa74] ss:$8 sps:$4 sm:$0xff]  }
 0x269   :  { %6829 = vmatprep.subr.bf16.mxu0 %v9437_v1  ;;  %v9515_v1 = vld [vmem:[%s13009_s1 + $0x1874] ss:$8 sps:$4 sm:$0xff]  }
 0x26b   :  { %6256 = vmatpush1.bf16.msra.mxu1 %v9432_v42  ;;  %v9510_v42 = vld [vmem:[%s13009_s1 + $0xa70] ss:$8 sps:$4 sm:$0xff]  }
 0x26c   :  { %6830 = vmatpush1.bf16.msra.mxu0 %v9435_v20  ;;  %6257 = vmatprep.subr.bf16.mxu1 %v9440_v23  ;;  %v9513_v20 = vld [vmem:[%s13009_s1 + $0x1870] ss:$8 sps:$4 sm:$0xff]   ;;  %v9518_v23 = vld [vmem:[%s13009_s1 + $0xa84] ss:$8 sps:$4 sm:$0xff]  }
 0x26d   :  { %6831 = vmatprep.subr.bf16.mxu0 %v9443_v61  ;;  %v9521_v61 = vld [vmem:[%s13009_s1 + $0x1884] ss:$8 sps:$4 sm:$0xff]  }
 0x26f   :  { %6258 = vmatpush1.bf16.msra.mxu1 %v9438_v11  ;;  %v9516_v11 = vld [vmem:[%s13009_s1 + $0xa80] ss:$8 sps:$4 sm:$0xff]  }
 0x270   :  { %6832 = vmatpush1.bf16.msra.mxu0 %v9441_v24  ;;  %6259 = vmatprep.subr.bf16.mxu1 %v9446_v25  ;;  %v9519_v24 = vld [vmem:[%s13009_s1 + $0x1880] ss:$8 sps:$4 sm:$0xff]   ;;  %v9524_v25 = vld [vmem:[%s13009_s1 + $0xa94] ss:$8 sps:$4 sm:$0xff]  }
 0x271   :  { %6833 = vmatprep.subr.bf16.mxu0 %v9449_v26  ;;  %v9527_v26 = vld [vmem:[%s13009_s1 + $0x1894] ss:$8 sps:$4 sm:$0xff]  }
 0x273   :  { %6260 = vmatpush1.bf16.msra.mxu1 %v9444_v27  ;;  %v9522_v27 = vld [vmem:[%s13009_s1 + $0xa90] ss:$8 sps:$4 sm:$0xff]  }
 0x274   :  { %6834 = vmatpush1.bf16.msra.mxu0 %v9447_v28  ;;  %6261 = vmatprep.subr.bf16.mxu1 %v9452_v29  ;;  %v9525_v28 = vld [vmem:[%s13009_s1 + $0x1890] ss:$8 sps:$4 sm:$0xff]   ;;  %v9530_v29 = vld [vmem:[%s13009_s1 + $0xaa4] ss:$8 sps:$4 sm:$0xff]  }
 0x275   :  { %6835 = vmatprep.subr.bf16.mxu0 %v9455_v30  ;;  %v9533_v30 = vld [vmem:[%s13009_s1 + $0x18a4] ss:$8 sps:$4 sm:$0xff]  }
 0x277   :  { %6262 = vmatpush1.bf16.msra.mxu1 %v9450_v31  ;;  %v9528_v31 = vld [vmem:[%s13009_s1 + $0xaa0] ss:$8 sps:$4 sm:$0xff]  }
 0x278   :  { %6836 = vmatpush1.bf16.msra.mxu0 %v9453_v14  ;;  %6263 = vmatprep.subr.bf16.mxu1 %v9458_v17  ;;  %v9531_v14 = vld [vmem:[%s13009_s1 + $0x18a0] ss:$8 sps:$4 sm:$0xff]   ;;  %v9536_v17 = vld [vmem:[%s13009_s1 + $0xab4] ss:$8 sps:$4 sm:$0xff]  }
 0x279   :  { %6837 = vmatprep.subr.bf16.mxu0 %v9461_v34  ;;  %v9539_v34 = vld [vmem:[%s13009_s1 + $0x18b4] ss:$8 sps:$4 sm:$0xff]  }
 0x27b   :  { %6264 = vmatpush1.bf16.msra.mxu1 %v9456_v44  ;;  %v9537_v44 = vld [vmem:[%s13009_s1 + $0x18b0] ss:$8 sps:$4 sm:$0xff]  }
 0x27c   :  { %6838 = vmatpush1.bf16.msra.mxu0 %v9459_v21  ;;  %6265 = vmatprep.subr.bf16.mxu1 %v9464_v12  ;;  %v9542_v21 = vld [vmem:[%s13009_s1 + $0xac4] ss:$8 sps:$4 sm:$0xff]  }
 0x27d   :  { %6839 = vmatprep.subr.bf16.mxu0 %v9467_v52  ;;  %v9545_v12 = vld [vmem:[%s13009_s1 + $0x18c4] ss:$8 sps:$4 sm:$0xff]   ;;  %v9540_v52 = vld [vmem:[%s13009_s1 + $0xac0] ss:$8 sps:$4 sm:$0xff]  }
 0x27f   :  { %6266 = vmatpush1.bf16.msra.mxu1 %v9462_v46  ;;  %v9543_v46 = vld [vmem:[%s13009_s1 + $0x18c0] ss:$8 sps:$4 sm:$0xff]  }
 0x280   :  { %6840 = vmatpush1.bf16.msra.mxu0 %v9465_v47  ;;  %6276 = vmatprep.subr.bf16.mxu1 %v9470_v15  ;;  %v9548_v47 = vld [vmem:[%s13009_s1 + $0xad4] ss:$8 sps:$4 sm:$0xff]  }
 0x281   :  { %6850 = vmatprep.subr.bf16.mxu0 %v9473_v32  ;;  %v9551_v15 = vld [vmem:[%s13009_s1 + $0x18d4] ss:$8 sps:$4 sm:$0xff]   ;;  %v9546_v32 = vld [vmem:[%s13009_s1 + $0xad0] ss:$8 sps:$4 sm:$0xff]  }
 0x282   :  { %6268 = vmatmul.mubr.bf16.vlgmr.msra.gmra.mrb[0].mxu1 %v1081_v41  ;;  %v9557_v41 = vld [vmem:[%s13009_s1 + $0x18e4] ss:$8 sps:$4 sm:$0xff]  }
 0x283   :  { %6842 = vmatmul.mubr.bf16.vlgmr.msra.gmra.mrb[0].mxu0 %v1229_v50  ;;  %6277 = vmatpush1.bf16.msra.mxu1 %v9468_v51  ;;  %v9552_v50 = vld [vmem:[%s13009_s1 + $0xae0] ss:$8 sps:$4 sm:$0xff]  }
 0x284   :  { %6851 = vmatpush1.bf16.msra.mxu0 %v9471_v53  ;;  %6278 = vmatprep.subr.bf16.mxu1 %v9476_v54  ;;  %v9555_v51 = vld [vmem:[%s13009_s1 + $0x18e0] ss:$8 sps:$4 sm:$0xff]   ;;  %v9560_v53 = vld [vmem:[%s13009_s1 + $0xaf4] ss:$8 sps:$4 sm:$0xff]  }
 0x285   :  { %6852 = vmatprep.subr.bf16.mxu0 %v9479_v37  ;;  %6308 = vmatprep.mubr.bf16.mxu1 %v12089_v38  ;;  %v9563_v54 = vld [vmem:[%s13009_s1 + $0x18f4] ss:$8 sps:$4 sm:$0xff]   ;;  %v9558_v37 = vld [vmem:[%s13009_s1 + $0xaf0] ss:$8 sps:$4 sm:$0xff]  }
 0x286   :  { %6882 = vmatprep.mubr.bf16.mxu0 %v12092_v55 }
 0x287   :  { %6279 = vmatpush1.bf16.msra.mxu1 %v9474_v56  ;;  %v9561_v56 = vld [vmem:[%s13009_s1 + $0x18f0] ss:$8 sps:$4 sm:$0xff]  }
 0x288   :  { %6853 = vmatpush1.bf16.msra.mxu0 %v9477_v57  ;;  %6280 = vmatprep.subr.bf16.mxu1 %v9482_v59  ;;  %v9567_v57 = vld [vmem:[%s13009_s1 + $0xb04] ss:$8 sps:$4 sm:$0xff]  }
 0x289   :  { %6854 = vmatprep.subr.bf16.mxu0 %v9485_v62  ;;  %v9570_v59 = vld [vmem:[%s13009_s1 + $0x1904] ss:$8 sps:$4 sm:$0xff]   ;;  %v12278_v62 = vrot.slane %v12050_v22, %v10067_v49  ;;  %v9573_v22 = vld [vmem:[%s13009_s1 + $0xb14] ss:$8 sps:$4 sm:$0xff]  }
 0x28b   :  { %6281 = vmatpush1.bf16.msra.mxu1 %v9480_v63  ;;  %v12282_v63 = vrot.slane %v12054_v33, %v10067_v49  ;;  %v9576_v33 = vld [vmem:[%s13009_s1 + $0x1914] ss:$8 sps:$4 sm:$0xff]  }
 0x28c   :  { %6855 = vmatpush1.bf16.msra.mxu0 %v9483_v45  ;;  %6282 = vmatprep.subr.bf16.mxu1 %v9488_v35  ;;  %v9565_v45 = vld [vmem:[%s13009_s1 + $0xb00] ss:$8 sps:$4 sm:$0xff]  }
 0x28d   :  { %6856 = vmatprep.subr.bf16.mxu0 %v9491_v0  ;;  %v9568_v35 = vld [vmem:[%s13009_s1 + $0x1900] ss:$8 sps:$4 sm:$0xff]   ;;  %v1084_v0 = vcombine.high %v12089_v38, %v12089_v38  ;;  %v9579_v38 = vld [vmem:[%s13009_s1 + $0xb24] ss:$8 sps:$4 sm:$0xff]  }
 0x28f   :  { %6283 = vmatpush1.bf16.msra.mxu1 %v9486_v2  ;;  %v1279_v2 = vcombine.high %v12092_v55, %v12092_v55  ;;  %v9582_v55 = vld [vmem:[%s13009_s1 + $0x1924] ss:$8 sps:$4 sm:$0xff]  }
 0x290   :  { %6857 = vmatpush1.bf16.msra.mxu0 %v9489_v3  ;;  %6284 = vmatprep.subr.bf16.mxu1 %v9494_v58  ;;  %v9571_v3 = vld [vmem:[%s13009_s1 + $0xb10] ss:$8 sps:$4 sm:$0xff]  }
 0x291   :  { %6858 = vmatprep.subr.bf16.mxu0 %v9497_v40  ;;  %v9574_v58 = vld [vmem:[%s13009_s1 + $0x1910] ss:$8 sps:$4 sm:$0xff]   ;;  %v9577_v40 = vld [vmem:[%s13009_s1 + $0xb20] ss:$8 sps:$4 sm:$0xff]  }
 0x293   :  { %6285 = vmatpush1.bf16.msra.mxu1 %v9492_v4  ;;  %v9580_v4 = vld [vmem:[%s13009_s1 + $0x1920] ss:$8 sps:$4 sm:$0xff]  }
 0x294   :  { %6859 = vmatpush1.bf16.msra.mxu0 %v9495_v5  ;;  %6286 = vmatprep.subr.bf16.mxu1 %v9500_v6  ;;  %v9585_v5 = vld [vmem:[%s13009_s1 + $0xb34] ss:$8 sps:$4 sm:$0xff]  }
 0x295   :  { %6860 = vmatprep.subr.bf16.mxu0 %v9503_v7  ;;  %v9588_v6 = vld [vmem:[%s13009_s1 + $0x1934] ss:$8 sps:$4 sm:$0xff]   ;;  %v9583_v7 = vld [vmem:[%s13009_s1 + $0xb30] ss:$8 sps:$4 sm:$0xff]  }
 0x297   :  { %6287 = vmatpush1.bf16.msra.mxu1 %v9498_v8  ;;  %v9586_v8 = vld [vmem:[%s13009_s1 + $0x1930] ss:$8 sps:$4 sm:$0xff]  }
 0x298   :  { %6861 = vmatpush1.bf16.msra.mxu0 %v9501_v9  ;;  %6288 = vmatprep.subr.bf16.mxu1 %v9506_v10  ;;  %v9591_v9 = vld [vmem:[%s13009_s1 + $0xb44] ss:$8 sps:$4 sm:$0xff]  }
 0x299   :  { %6862 = vmatprep.subr.bf16.mxu0 %v9509_v60  ;;  %v9594_v10 = vld [vmem:[%s13009_s1 + $0x1944] ss:$8 sps:$4 sm:$0xff]   ;;  %v9589_v60 = vld [vmem:[%s13009_s1 + $0xb40] ss:$8 sps:$4 sm:$0xff]  }
 0x29b   :  { %6289 = vmatpush1.bf16.msra.mxu1 %v9504_v13  ;;  %v9592_v13 = vld [vmem:[%s13009_s1 + $0x1940] ss:$8 sps:$4 sm:$0xff]  }
 0x29c   :  { %6863 = vmatpush1.bf16.msra.mxu0 %v9507_v16  ;;  %6290 = vmatprep.subr.bf16.mxu1 %v9512_v19  ;;  %v9597_v16 = vld [vmem:[%s13009_s1 + $0xb54] ss:$8 sps:$4 sm:$0xff]  }
 0x29d   :  { %6864 = vmatprep.subr.bf16.mxu0 %v9515_v1  ;;  %v9600_v19 = vld [vmem:[%s13009_s1 + $0x1954] ss:$8 sps:$4 sm:$0xff]   ;;  %v9595_v1 = vld [vmem:[%s13009_s1 + $0xb50] ss:$8 sps:$4 sm:$0xff]  }
 0x29f   :  { %6291 = vmatpush1.bf16.msra.mxu1 %v9510_v42  ;;  %v9598_v42 = vld [vmem:[%s13009_s1 + $0x1950] ss:$8 sps:$4 sm:$0xff]  }
 0x2a0   :  { %6865 = vmatpush1.bf16.msra.mxu0 %v9513_v20  ;;  %6292 = vmatprep.subr.bf16.mxu1 %v9518_v23  ;;  %v9603_v20 = vld [vmem:[%s13009_s1 + $0xb64] ss:$8 sps:$4 sm:$0xff]  }
 0x2a1   :  { %6866 = vmatprep.subr.bf16.mxu0 %v9521_v61  ;;  %v9606_v23 = vld [vmem:[%s13009_s1 + $0x1964] ss:$8 sps:$4 sm:$0xff]   ;;  %v9601_v61 = vld [vmem:[%s13009_s1 + $0xb60] ss:$8 sps:$4 sm:$0xff]  }
 0x2a3   :  { %6293 = vmatpush1.bf16.msra.mxu1 %v9516_v11  ;;  %v9604_v11 = vld [vmem:[%s13009_s1 + $0x1960] ss:$8 sps:$4 sm:$0xff]  }
 0x2a4   :  { %6867 = vmatpush1.bf16.msra.mxu0 %v9519_v24  ;;  %6294 = vmatprep.subr.bf16.mxu1 %v9524_v25  ;;  %v9609_v24 = vld [vmem:[%s13009_s1 + $0xb74] ss:$8 sps:$4 sm:$0xff]  }
 0x2a5   :  { %6868 = vmatprep.subr.bf16.mxu0 %v9527_v26  ;;  %v9612_v25 = vld [vmem:[%s13009_s1 + $0x1974] ss:$8 sps:$4 sm:$0xff]   ;;  %v9607_v26 = vld [vmem:[%s13009_s1 + $0xb70] ss:$8 sps:$4 sm:$0xff]  }
 0x2a7   :  { %6295 = vmatpush1.bf16.msra.mxu1 %v9522_v27  ;;  %v9610_v27 = vld [vmem:[%s13009_s1 + $0x1970] ss:$8 sps:$4 sm:$0xff]  }
 0x2a8   :  { %6869 = vmatpush1.bf16.msra.mxu0 %v9525_v28  ;;  %6296 = vmatprep.subr.bf16.mxu1 %v9530_v29  ;;  %v9615_v28 = vld [vmem:[%s13009_s1 + $0xb84] ss:$8 sps:$4 sm:$0xff]  }
 0x2a9   :  { %6870 = vmatprep.subr.bf16.mxu0 %v9533_v30  ;;  %v9618_v29 = vld [vmem:[%s13009_s1 + $0x1984] ss:$8 sps:$4 sm:$0xff]   ;;  %v9613_v30 = vld [vmem:[%s13009_s1 + $0xb80] ss:$8 sps:$4 sm:$0xff]  }
 0x2ab   :  { %6297 = vmatpush1.bf16.msra.mxu1 %v9528_v31  ;;  %v9616_v31 = vld [vmem:[%s13009_s1 + $0x1980] ss:$8 sps:$4 sm:$0xff]  }
 0x2ac   :  { %6871 = vmatpush1.bf16.msra.mxu0 %v9531_v14  ;;  %6298 = vmatprep.subr.bf16.mxu1 %v9536_v17  ;;  %v9621_v14 = vld [vmem:[%s13009_s1 + $0xb94] ss:$8 sps:$4 sm:$0xff]  }
 0x2ad   :  { %6872 = vmatprep.subr.bf16.mxu0 %v9539_v34  ;;  %v9624_v17 = vld [vmem:[%s13009_s1 + $0x1994] ss:$8 sps:$4 sm:$0xff]   ;;  %v9619_v34 = vld [vmem:[%s13009_s1 + $0xb90] ss:$8 sps:$4 sm:$0xff]  }
 0x2af   :  { %6299 = vmatpush1.bf16.msra.mxu1 %v9534_v36  ;;  %v9622_v36 = vld [vmem:[%s13009_s1 + $0x1990] ss:$8 sps:$4 sm:$0xff]  }
 0x2b0   :  { %6873 = vmatpush1.bf16.msra.mxu0 %v9537_v44  ;;  %6300 = vmatprep.subr.bf16.mxu1 %v9542_v21  ;;  %v9627_v44 = vld [vmem:[%s13009_s1 + $0xba4] ss:$8 sps:$4 sm:$0xff]  }
 0x2b1   :  { %6874 = vmatprep.subr.bf16.mxu0 %v9545_v12  ;;  %v9630_v21 = vld [vmem:[%s13009_s1 + $0x19a4] ss:$8 sps:$4 sm:$0xff]   ;;  %v9625_v12 = vld [vmem:[%s13009_s1 + $0xba0] ss:$8 sps:$4 sm:$0xff]  }
 0x2b3   :  { %6301 = vmatpush1.bf16.msra.mxu1 %v9540_v52  ;;  %v9628_v52 = vld [vmem:[%s13009_s1 + $0x19a0] ss:$8 sps:$4 sm:$0xff]  }
 0x2b4   :  { %6875 = vmatpush1.bf16.msra.mxu0 %v9543_v46  ;;  %6302 = vmatprep.subr.bf16.mxu1 %v9548_v47  ;;  %v9633_v46 = vld [vmem:[%s13009_s1 + $0xbb4] ss:$8 sps:$4 sm:$0xff]  }
 0x2b5   :  { %6876 = vmatprep.subr.bf16.mxu0 %v9551_v15  ;;  %v9636_v47 = vld [vmem:[%s13009_s1 + $0x19b4] ss:$8 sps:$4 sm:$0xff]   ;;  %v9631_v15 = vld [vmem:[%s13009_s1 + $0xbb0] ss:$8 sps:$4 sm:$0xff]  }
 0x2b7   :  { %6303 = vmatpush1.bf16.msra.mxu1 %v9546_v32  ;;  %v9634_v32 = vld [vmem:[%s13009_s1 + $0x19b0] ss:$8 sps:$4 sm:$0xff]  }
 0x2b8   :  { %6877 = vmatpush1.bf16.msra.mxu0 %v9549_v48  ;;  %6304 = vmatprep.subr.bf16.mxu1 %v9554_v18  ;;  %v9639_v48 = vld [vmem:[%s13009_s1 + $0xbc4] ss:$8 sps:$4 sm:$0xff]  }
 0x2b9   :  { %6878 = vmatprep.subr.bf16.mxu0 %v9557_v41  ;;  %v9642_v18 = vld [vmem:[%s13009_s1 + $0x19c4] ss:$8 sps:$4 sm:$0xff]   ;;  %v9637_v41 = vld [vmem:[%s13009_s1 + $0xbc0] ss:$8 sps:$4 sm:$0xff]  }
 0x2bb   :  { %6305 = vmatpush1.bf16.msra.mxu1 %v9552_v50  ;;  %v9640_v50 = vld [vmem:[%s13009_s1 + $0x19c0] ss:$8 sps:$4 sm:$0xff]  }
 0x2bc   :  { %6879 = vmatpush1.bf16.msra.mxu0 %v9555_v51  ;;  %6306 = vmatprep.subr.bf16.mxu1 %v9560_v53  ;;  %v9645_v51 = vld [vmem:[%s13009_s1 + $0xbd4] ss:$8 sps:$4 sm:$0xff]  }
 0x2bd   :  { %6880 = vmatprep.subr.bf16.mxu0 %v9563_v54  ;;  %v9648_v53 = vld [vmem:[%s13009_s1 + $0x19d4] ss:$8 sps:$4 sm:$0xff]   ;;  %v9643_v54 = vld [vmem:[%s13009_s1 + $0xbd0] ss:$8 sps:$4 sm:$0xff]  }
 0x2bf   :  { %6307 = vmatpush1.bf16.msra.mxu1 %v9558_v37  ;;  %v9646_v37 = vld [vmem:[%s13009_s1 + $0x19d0] ss:$8 sps:$4 sm:$0xff]  }
 0x2c0   :  { %6881 = vmatpush1.bf16.msra.mxu0 %v9561_v56  ;;  %6317 = vmatprep.subr.bf16.mxu1 %v9567_v57  ;;  %v9651_v56 = vld [vmem:[%s13009_s1 + $0xbe4] ss:$8 sps:$4 sm:$0xff]  }
 0x2c1   :  { %6891 = vmatprep.subr.bf16.mxu0 %v9570_v59  ;;  %v9654_v57 = vld [vmem:[%s13009_s1 + $0x19e4] ss:$8 sps:$4 sm:$0xff]   ;;  %v1232_v59 = vcombine.high %v12035_v39, %v12035_v39  ;;  %v9660_v39 = vld [vmem:[%s13009_s1 + $0x19f4] ss:$8 sps:$4 sm:$0xff]  }
 0x2c2   :  { %6309 = vmatmul.mubr.bf16.vlgmr.msra.gmra.mrb[0].mxu1 %v12278_v62 }
 0x2c3   :  { %6883 = vmatmul.mubr.bf16.vlgmr.msra.gmra.mrb[0].mxu0 %v12282_v63  ;;  %6318 = vmatpush1.bf16.msra.mxu1 %v9565_v45  ;;  %v9649_v45 = vld [vmem:[%s13009_s1 + $0xbe0] ss:$8 sps:$4 sm:$0xff]  }
 0x2c4   :  { %6892 = vmatpush1.bf16.msra.mxu0 %v9568_v35  ;;  %6319 = vmatprep.subr.bf16.mxu1 %v9573_v22  ;;  %v9652_v35 = vld [vmem:[%s13009_s1 + $0x19e0] ss:$8 sps:$4 sm:$0xff]   ;;  %v9657_v22 = vld [vmem:[%s13009_s1 + $0xbf4] ss:$8 sps:$4 sm:$0xff]  }
 0x2c5   :  { %6893 = vmatprep.subr.bf16.mxu0 %v9576_v33  ;;  %6349 = vmatprep.mubr.bf16.mxu1 %v1084_v0  ;;  %v12475_v33 = vld.sshfl [vmem:[%s13010_s0 + $0x18] sm:$0xff pattern:$0x75316420]  ;;  %v12478_v0 = vrot.slane %v1232_v59, %v10067_v49 }
 0x2c6   :  { %6923 = vmatprep.mubr.bf16.mxu0 %v1279_v2  ;;  %v9655_v2 = vld [vmem:[%s13009_s1 + $0xbf0] ss:$8 sps:$4 sm:$0xff]  }
 0x2c7   :  { %6320 = vmatpush1.bf16.msra.mxu1 %v9571_v3  ;;  %v9658_v3 = vld [vmem:[%s13009_s1 + $0x19f0] ss:$8 sps:$4 sm:$0xff]  }
 0x2c8   :  { %6894 = vmatpush1.bf16.msra.mxu0 %v9574_v58  ;;  %6321 = vmatprep.subr.bf16.mxu1 %v9579_v38  ;;  %v9663_v58 = vld [vmem:[%s13009_s1 + $0xc04] ss:$8 sps:$4 sm:$0xff]   ;;  %v9730_v59 = vld [vmem:[%s13009_s1 + $0x1ab0] ss:$8 sps:$4 sm:$0xff]  }
 0x2c9   :  { %6895 = vmatprep.subr.bf16.mxu0 %v9582_v55  ;;  %v9666_v38 = vld [vmem:[%s13009_s1 + $0x1a04] ss:$8 sps:$4 sm:$0xff]   ;;  %v1100_v55 = vcombine.high %v12475_v33, %v12475_v33 }
 0x2cb   :  { %6322 = vmatpush1.bf16.msra.mxu1 %v9577_v40  ;;  %v1248_v40 = vcombine.high %v12478_v0, %v12478_v0 }
 0x2cc   :  { %6896 = vmatpush1.bf16.msra.mxu0 %v9580_v4  ;;  %6323 = vmatprep.subr.bf16.mxu1 %v9585_v5  ;;  %v1082_v4 = vcombine.high %v12278_v62, %v12278_v62  ;;  %v1277_v5 = vcombine.high %v12282_v63, %v12282_v63  ;;  %v9672_v62 = vld [vmem:[%s13009_s1 + $0x1a14] ss:$8 sps:$4 sm:$0xff]   ;;  %v12513_v63 = vrot.slane %v1100_v55, %v10067_v49  ;;  %v9747_v55 = vld [vmem:[%s13009_s1 + $0xce4] ss:$8 sps:$4 sm:$0xff]  }
 0x2cd   :  { %6897 = vmatprep.subr.bf16.mxu0 %v9588_v6  ;;  %v9661_v6 = vld [vmem:[%s13009_s1 + $0xc00] ss:$8 sps:$4 sm:$0xff]  }
 0x2cf   :  { %6324 = vmatpush1.bf16.msra.mxu1 %v9583_v7  ;;  %v9664_v7 = vld [vmem:[%s13009_s1 + $0x1a00] ss:$8 sps:$4 sm:$0xff]  }
 0x2d0   :  { %6898 = vmatpush1.bf16.msra.mxu0 %v9586_v8  ;;  %6325 = vmatprep.subr.bf16.mxu1 %v9591_v9  ;;  %v9669_v8 = vld [vmem:[%s13009_s1 + $0xc14] ss:$8 sps:$4 sm:$0xff]   ;;  %v12516_v9 = vrot.slane %v1248_v40, %v10067_v49  ;;  %v9750_v40 = vld [vmem:[%s13009_s1 + $0x1ae4] ss:$8 sps:$4 sm:$0xff]  }
 0x2d1   :  { %6899 = vmatprep.subr.bf16.mxu0 %v9594_v10  ;;  %v9667_v10 = vld [vmem:[%s13009_s1 + $0xc10] ss:$8 sps:$4 sm:$0xff]  }
 0x2d3   :  { %6326 = vmatpush1.bf16.msra.mxu1 %v9589_v60  ;;  %v9670_v60 = vld [vmem:[%s13009_s1 + $0x1a10] ss:$8 sps:$4 sm:$0xff]  }
 0x2d4   :  { %6900 = vmatpush1.bf16.msra.mxu0 %v9592_v13  ;;  %6327 = vmatprep.subr.bf16.mxu1 %v9597_v16  ;;  %v9675_v13 = vld [vmem:[%s13009_s1 + $0xc24] ss:$8 sps:$4 sm:$0xff]  }
 0x2d5   :  { %6901 = vmatprep.subr.bf16.mxu0 %v9600_v19  ;;  %v9678_v16 = vld [vmem:[%s13009_s1 + $0x1a24] ss:$8 sps:$4 sm:$0xff]   ;;  %v9673_v19 = vld [vmem:[%s13009_s1 + $0xc20] ss:$8 sps:$4 sm:$0xff]  }
 0x2d7   :  { %6328 = vmatpush1.bf16.msra.mxu1 %v9595_v1  ;;  %v9676_v1 = vld [vmem:[%s13009_s1 + $0x1a20] ss:$8 sps:$4 sm:$0xff]  }
 0x2d8   :  { %6902 = vmatpush1.bf16.msra.mxu0 %v9598_v42  ;;  %6329 = vmatprep.subr.bf16.mxu1 %v9603_v20  ;;  %v9681_v42 = vld [vmem:[%s13009_s1 + $0xc34] ss:$8 sps:$4 sm:$0xff]  }
 0x2d9   :  { %6903 = vmatprep.subr.bf16.mxu0 %v9606_v23  ;;  %v9684_v20 = vld [vmem:[%s13009_s1 + $0x1a34] ss:$8 sps:$4 sm:$0xff]   ;;  %v9679_v23 = vld [vmem:[%s13009_s1 + $0xc30] ss:$8 sps:$4 sm:$0xff]  }
 0x2db   :  { %6330 = vmatpush1.bf16.msra.mxu1 %v9601_v61  ;;  %v9682_v61 = vld [vmem:[%s13009_s1 + $0x1a30] ss:$8 sps:$4 sm:$0xff]  }
 0x2dc   :  { %6904 = vmatpush1.bf16.msra.mxu0 %v9604_v11  ;;  %6331 = vmatprep.subr.bf16.mxu1 %v9609_v24  ;;  %v9687_v11 = vld [vmem:[%s13009_s1 + $0xc44] ss:$8 sps:$4 sm:$0xff]  }
 0x2dd   :  { %6905 = vmatprep.subr.bf16.mxu0 %v9612_v25  ;;  %v9690_v24 = vld [vmem:[%s13009_s1 + $0x1a44] ss:$8 sps:$4 sm:$0xff]   ;;  %v9685_v25 = vld [vmem:[%s13009_s1 + $0xc40] ss:$8 sps:$4 sm:$0xff]  }
 0x2df   :  { %6332 = vmatpush1.bf16.msra.mxu1 %v9607_v26  ;;  %v9688_v26 = vld [vmem:[%s13009_s1 + $0x1a40] ss:$8 sps:$4 sm:$0xff]  }
 0x2e0   :  { %6906 = vmatpush1.bf16.msra.mxu0 %v9610_v27  ;;  %6333 = vmatprep.subr.bf16.mxu1 %v9615_v28  ;;  %v9693_v27 = vld [vmem:[%s13009_s1 + $0xc54] ss:$8 sps:$4 sm:$0xff]  }
 0x2e1   :  { %6907 = vmatprep.subr.bf16.mxu0 %v9618_v29  ;;  %v9696_v28 = vld [vmem:[%s13009_s1 + $0x1a54] ss:$8 sps:$4 sm:$0xff]   ;;  %v9691_v29 = vld [vmem:[%s13009_s1 + $0xc50] ss:$8 sps:$4 sm:$0xff]  }
 0x2e3   :  { %6334 = vmatpush1.bf16.msra.mxu1 %v9613_v30  ;;  %v9694_v30 = vld [vmem:[%s13009_s1 + $0x1a50] ss:$8 sps:$4 sm:$0xff]  }
 0x2e4   :  { %6908 = vmatpush1.bf16.msra.mxu0 %v9616_v31  ;;  %6335 = vmatprep.subr.bf16.mxu1 %v9621_v14  ;;  %v9699_v31 = vld [vmem:[%s13009_s1 + $0xc64] ss:$8 sps:$4 sm:$0xff]  }
 0x2e5   :  { %6909 = vmatprep.subr.bf16.mxu0 %v9624_v17  ;;  %v9702_v14 = vld [vmem:[%s13009_s1 + $0x1a64] ss:$8 sps:$4 sm:$0xff]   ;;  %v9697_v17 = vld [vmem:[%s13009_s1 + $0xc60] ss:$8 sps:$4 sm:$0xff]  }
 0x2e7   :  { %6336 = vmatpush1.bf16.msra.mxu1 %v9619_v34  ;;  %v9700_v34 = vld [vmem:[%s13009_s1 + $0x1a60] ss:$8 sps:$4 sm:$0xff]  }
 0x2e8   :  { %6910 = vmatpush1.bf16.msra.mxu0 %v9622_v36  ;;  %6337 = vmatprep.subr.bf16.mxu1 %v9627_v44  ;;  %v9705_v36 = vld [vmem:[%s13009_s1 + $0xc74] ss:$8 sps:$4 sm:$0xff]  }
 0x2e9   :  { %6911 = vmatprep.subr.bf16.mxu0 %v9630_v21  ;;  %v9708_v44 = vld [vmem:[%s13009_s1 + $0x1a74] ss:$8 sps:$4 sm:$0xff]   ;;  %v9703_v21 = vld [vmem:[%s13009_s1 + $0xc70] ss:$8 sps:$4 sm:$0xff]  }
 0x2eb   :  { %6338 = vmatpush1.bf16.msra.mxu1 %v9625_v12  ;;  %v9706_v12 = vld [vmem:[%s13009_s1 + $0x1a70] ss:$8 sps:$4 sm:$0xff]  }
 0x2ec   :  { %6912 = vmatpush1.bf16.msra.mxu0 %v9628_v52  ;;  %6339 = vmatprep.subr.bf16.mxu1 %v9633_v46  ;;  %v9711_v52 = vld [vmem:[%s13009_s1 + $0xc84] ss:$8 sps:$4 sm:$0xff]  }
 0x2ed   :  { %6913 = vmatprep.subr.bf16.mxu0 %v9636_v47  ;;  %v9714_v46 = vld [vmem:[%s13009_s1 + $0x1a84] ss:$8 sps:$4 sm:$0xff]   ;;  %v9709_v47 = vld [vmem:[%s13009_s1 + $0xc80] ss:$8 sps:$4 sm:$0xff]  }
 0x2ef   :  { %6340 = vmatpush1.bf16.msra.mxu1 %v9631_v15  ;;  %v9712_v15 = vld [vmem:[%s13009_s1 + $0x1a80] ss:$8 sps:$4 sm:$0xff]  }
 0x2f0   :  { %6914 = vmatpush1.bf16.msra.mxu0 %v9634_v32  ;;  %6341 = vmatprep.subr.bf16.mxu1 %v9639_v48  ;;  %v9717_v32 = vld [vmem:[%s13009_s1 + $0xc94] ss:$8 sps:$4 sm:$0xff]  }
 0x2f1   :  { %6915 = vmatprep.subr.bf16.mxu0 %v9642_v18  ;;  %v9720_v48 = vld [vmem:[%s13009_s1 + $0x1a94] ss:$8 sps:$4 sm:$0xff]   ;;  %v9715_v18 = vld [vmem:[%s13009_s1 + $0xc90] ss:$8 sps:$4 sm:$0xff]  }
 0x2f3   :  { %6342 = vmatpush1.bf16.msra.mxu1 %v9637_v41  ;;  %v9718_v41 = vld [vmem:[%s13009_s1 + $0x1a90] ss:$8 sps:$4 sm:$0xff]  }
 0x2f4   :  { %6916 = vmatpush1.bf16.msra.mxu0 %v9640_v50  ;;  %6343 = vmatprep.subr.bf16.mxu1 %v9645_v51  ;;  %v9723_v50 = vld [vmem:[%s13009_s1 + $0xca4] ss:$8 sps:$4 sm:$0xff]  }
 0x2f5   :  { %6917 = vmatprep.subr.bf16.mxu0 %v9648_v53  ;;  %v9726_v51 = vld [vmem:[%s13009_s1 + $0x1aa4] ss:$8 sps:$4 sm:$0xff]   ;;  %v9721_v53 = vld [vmem:[%s13009_s1 + $0xca0] ss:$8 sps:$4 sm:$0xff]  }
 0x2f7   :  { %6344 = vmatpush1.bf16.msra.mxu1 %v9643_v54  ;;  %v9724_v54 = vld [vmem:[%s13009_s1 + $0x1aa0] ss:$8 sps:$4 sm:$0xff]  }
 0x2f8   :  { %6918 = vmatpush1.bf16.msra.mxu0 %v9646_v37  ;;  %6345 = vmatprep.subr.bf16.mxu1 %v9651_v56  ;;  %v9729_v37 = vld [vmem:[%s13009_s1 + $0xcb4] ss:$8 sps:$4 sm:$0xff]  }
 0x2f9   :  { %6919 = vmatprep.subr.bf16.mxu0 %v9654_v57  ;;  %v9732_v56 = vld [vmem:[%s13009_s1 + $0x1ab4] ss:$8 sps:$4 sm:$0xff]   ;;  %v9727_v57 = vld [vmem:[%s13009_s1 + $0xcb0] ss:$8 sps:$4 sm:$0xff]  }
 0x2fb   :  { %6346 = vmatpush1.bf16.msra.mxu1 %v9649_v45  ;;  %v9735_v45 = vld [vmem:[%s13009_s1 + $0xcc4] ss:$8 sps:$4 sm:$0xff]  }
 0x2fc   :  { %6920 = vmatpush1.bf16.msra.mxu0 %v9652_v35  ;;  %6347 = vmatprep.subr.bf16.mxu1 %v9657_v22  ;;  %v9738_v35 = vld [vmem:[%s13009_s1 + $0x1ac4] ss:$8 sps:$4 sm:$0xff]   ;;  %v9733_v22 = vld [vmem:[%s13009_s1 + $0xcc0] ss:$8 sps:$4 sm:$0xff]  }
 0x2fd   :  { %6921 = vmatprep.subr.bf16.mxu0 %v9660_v39  ;;  %v9736_v39 = vld [vmem:[%s13009_s1 + $0x1ac0] ss:$8 sps:$4 sm:$0xff]  }
 0x2ff   :  { %6348 = vmatpush1.bf16.msra.mxu1 %v9655_v2  ;;  %v9741_v2 = vld [vmem:[%s13009_s1 + $0xcd4] ss:$8 sps:$4 sm:$0xff]  }
 0x300   :  { %6922 = vmatpush1.bf16.msra.mxu0 %v9658_v3  ;;  %6358 = vmatprep.subr.bf16.mxu1 %v9663_v58  ;;  %v9744_v3 = vld [vmem:[%s13009_s1 + $0x1ad4] ss:$8 sps:$4 sm:$0xff]   ;;  %v9739_v58 = vld [vmem:[%s13009_s1 + $0xcd0] ss:$8 sps:$4 sm:$0xff]  }
 0x301   :  { %6932 = vmatprep.subr.bf16.mxu0 %v9666_v38  ;;  %v9742_v38 = vld [vmem:[%s13009_s1 + $0x1ad0] ss:$8 sps:$4 sm:$0xff]  }
 0x302   :  { %6350 = vmatmul.mubr.bf16.vlgmr.msra.gmra.mrb[0].mxu1 %v1082_v4  ;;  %v9745_v4 = vld [vmem:[%s13009_s1 + $0xce0] ss:$8 sps:$4 sm:$0xff]  }
 0x303   :  { %6924 = vmatmul.mubr.bf16.vlgmr.msra.gmra.mrb[0].mxu0 %v1277_v5  ;;  %6359 = vmatpush1.bf16.msra.mxu1 %v9661_v6  ;;  %v9748_v5 = vld [vmem:[%s13009_s1 + $0x1ae0] ss:$8 sps:$4 sm:$0xff]   ;;  %v9753_v6 = vld [vmem:[%s13009_s1 + $0xcf4] ss:$8 sps:$4 sm:$0xff]  }
 0x304   :  { %6933 = vmatpush1.bf16.msra.mxu0 %v9664_v7  ;;  %6360 = vmatprep.subr.bf16.mxu1 %v9669_v8  ;;  %v9756_v7 = vld [vmem:[%s13009_s1 + $0x1af4] ss:$8 sps:$4 sm:$0xff]   ;;  %v9751_v8 = vld [vmem:[%s13009_s1 + $0xcf0] ss:$8 sps:$4 sm:$0xff]  }
 0x305   :  { %6934 = vmatprep.subr.bf16.mxu0 %v9672_v62  ;;  %6390 = vmatprep.mubr.bf16.mxu1 %v12513_v63  ;;  %v9754_v62 = vld [vmem:[%s13009_s1 + $0x1af0] ss:$8 sps:$4 sm:$0xff]  }
 0x306   :  { %6964 = vmatprep.mubr.bf16.mxu0 %v12516_v9 }
 0x307   :  { %6361 = vmatpush1.bf16.msra.mxu1 %v9667_v10  ;;  %v9759_v10 = vld [vmem:[%s13009_s1 + $0xd04] ss:$8 sps:$4 sm:$0xff]  }
 0x308   :  { %6935 = vmatpush1.bf16.msra.mxu0 %v9670_v60  ;;  %6362 = vmatprep.subr.bf16.mxu1 %v9675_v13  ;;  %v9763_v60 = vld [vmem:[%s13009_s1 + $0x1b04] ss:$8 sps:$4 sm:$0xff]   ;;  %v12702_v13 = vrot.slane %v12475_v33, %v10067_v49  ;;  %v9766_v33 = vld [vmem:[%s13009_s1 + $0xd14] ss:$8 sps:$4 sm:$0xff]  }
 0x309   :  { %6936 = vmatprep.subr.bf16.mxu0 %v9678_v16  ;;  %v12706_v16 = vrot.slane %v12478_v0, %v10067_v49  ;;  %v9769_v0 = vld [vmem:[%s13009_s1 + $0x1b14] ss:$8 sps:$4 sm:$0xff]  }
 0x30b   :  { %6363 = vmatpush1.bf16.msra.mxu1 %v9673_v19  ;;  %v9757_v19 = vld [vmem:[%s13009_s1 + $0xd00] ss:$8 sps:$4 sm:$0xff]  }
 0x30c   :  { %6937 = vmatpush1.bf16.msra.mxu0 %v9676_v1  ;;  %6364 = vmatprep.subr.bf16.mxu1 %v9681_v42  ;;  %v9761_v1 = vld [vmem:[%s13009_s1 + $0x1b00] ss:$8 sps:$4 sm:$0xff]   ;;  %v1132_v42 = vcombine.high %v12513_v63, %v12513_v63  ;;  %v9772_v63 = vld [vmem:[%s13009_s1 + $0xd24] ss:$8 sps:$4 sm:$0xff]  }
 0x30d   :  { %6938 = vmatprep.subr.bf16.mxu0 %v9684_v20  ;;  %v1280_v20 = vcombine.high %v12516_v9, %v12516_v9  ;;  %v9775_v9 = vld [vmem:[%s13009_s1 + $0x1b24] ss:$8 sps:$4 sm:$0xff]  }
 0x30f   :  { %6365 = vmatpush1.bf16.msra.mxu1 %v9679_v23  ;;  %v9764_v23 = vld [vmem:[%s13009_s1 + $0xd10] ss:$8 sps:$4 sm:$0xff]  }
 0x310   :  { %6939 = vmatpush1.bf16.msra.mxu0 %v9682_v61  ;;  %6366 = vmatprep.subr.bf16.mxu1 %v9687_v11  ;;  %v9767_v61 = vld [vmem:[%s13009_s1 + $0x1b10] ss:$8 sps:$4 sm:$0xff]   ;;  %v9770_v11 = vld [vmem:[%s13009_s1 + $0xd20] ss:$8 sps:$4 sm:$0xff]  }
 0x311   :  { %6940 = vmatprep.subr.bf16.mxu0 %v9690_v24  ;;  %v9773_v24 = vld [vmem:[%s13009_s1 + $0x1b20] ss:$8 sps:$4 sm:$0xff]  }
 0x313   :  { %6367 = vmatpush1.bf16.msra.mxu1 %v9685_v25  ;;  %v9778_v25 = vld [vmem:[%s13009_s1 + $0xd34] ss:$8 sps:$4 sm:$0xff]  }
 0x314   :  { %6941 = vmatpush1.bf16.msra.mxu0 %v9688_v26  ;;  %6368 = vmatprep.subr.bf16.mxu1 %v9693_v27  ;;  %v9781_v26 = vld [vmem:[%s13009_s1 + $0x1b34] ss:$8 sps:$4 sm:$0xff]   ;;  %v9776_v27 = vld [vmem:[%s13009_s1 + $0xd30] ss:$8 sps:$4 sm:$0xff]  }
 0x315   :  { %6942 = vmatprep.subr.bf16.mxu0 %v9696_v28  ;;  %v9779_v28 = vld [vmem:[%s13009_s1 + $0x1b30] ss:$8 sps:$4 sm:$0xff]  }
 0x317   :  { %6369 = vmatpush1.bf16.msra.mxu1 %v9691_v29  ;;  %v9784_v29 = vld [vmem:[%s13009_s1 + $0xd44] ss:$8 sps:$4 sm:$0xff]  }
 0x318   :  { %6943 = vmatpush1.bf16.msra.mxu0 %v9694_v30  ;;  %6370 = vmatprep.subr.bf16.mxu1 %v9699_v31  ;;  %v9787_v30 = vld [vmem:[%s13009_s1 + $0x1b44] ss:$8 sps:$4 sm:$0xff]   ;;  %v9782_v31 = vld [vmem:[%s13009_s1 + $0xd40] ss:$8 sps:$4 sm:$0xff]  }
 0x319   :  { %6944 = vmatprep.subr.bf16.mxu0 %v9702_v14  ;;  %v9785_v14 = vld [vmem:[%s13009_s1 + $0x1b40] ss:$8 sps:$4 sm:$0xff]  }
 0x31b   :  { %6371 = vmatpush1.bf16.msra.mxu1 %v9697_v17  ;;  %v9790_v17 = vld [vmem:[%s13009_s1 + $0xd54] ss:$8 sps:$4 sm:$0xff]  }
 0x31c   :  { %6945 = vmatpush1.bf16.msra.mxu0 %v9700_v34  ;;  %6372 = vmatprep.subr.bf16.mxu1 %v9705_v36  ;;  %v9793_v34 = vld [vmem:[%s13009_s1 + $0x1b54] ss:$8 sps:$4 sm:$0xff]   ;;  %v9788_v36 = vld [vmem:[%s13009_s1 + $0xd50] ss:$8 sps:$4 sm:$0xff]  }
 0x31d   :  { %6946 = vmatprep.subr.bf16.mxu0 %v9708_v44  ;;  %v9791_v44 = vld [vmem:[%s13009_s1 + $0x1b50] ss:$8 sps:$4 sm:$0xff]  }
 0x31f   :  { %6373 = vmatpush1.bf16.msra.mxu1 %v9703_v21  ;;  %v9796_v21 = vld [vmem:[%s13009_s1 + $0xd64] ss:$8 sps:$4 sm:$0xff]  }
 0x320   :  { %6947 = vmatpush1.bf16.msra.mxu0 %v9706_v12  ;;  %6374 = vmatprep.subr.bf16.mxu1 %v9711_v52  ;;  %v9799_v12 = vld [vmem:[%s13009_s1 + $0x1b64] ss:$8 sps:$4 sm:$0xff]   ;;  %v9794_v52 = vld [vmem:[%s13009_s1 + $0xd60] ss:$8 sps:$4 sm:$0xff]  }
 0x321   :  { %6948 = vmatprep.subr.bf16.mxu0 %v9714_v46  ;;  %v9797_v46 = vld [vmem:[%s13009_s1 + $0x1b60] ss:$8 sps:$4 sm:$0xff]  }
 0x323   :  { %6375 = vmatpush1.bf16.msra.mxu1 %v9709_v47  ;;  %v9802_v47 = vld [vmem:[%s13009_s1 + $0xd74] ss:$8 sps:$4 sm:$0xff]  }
 0x324   :  { %6949 = vmatpush1.bf16.msra.mxu0 %v9712_v15  ;;  %6376 = vmatprep.subr.bf16.mxu1 %v9717_v32  ;;  %v9805_v15 = vld [vmem:[%s13009_s1 + $0x1b74] ss:$8 sps:$4 sm:$0xff]   ;;  %v9800_v32 = vld [vmem:[%s13009_s1 + $0xd70] ss:$8 sps:$4 sm:$0xff]  }
 0x325   :  { %6950 = vmatprep.subr.bf16.mxu0 %v9720_v48  ;;  %v9803_v48 = vld [vmem:[%s13009_s1 + $0x1b70] ss:$8 sps:$4 sm:$0xff]  }
 0x327   :  { %6377 = vmatpush1.bf16.msra.mxu1 %v9715_v18  ;;  %v9808_v18 = vld [vmem:[%s13009_s1 + $0xd84] ss:$8 sps:$4 sm:$0xff]  }
 0x328   :  { %6951 = vmatpush1.bf16.msra.mxu0 %v9718_v41  ;;  %6378 = vmatprep.subr.bf16.mxu1 %v9723_v50  ;;  %v9811_v41 = vld [vmem:[%s13009_s1 + $0x1b84] ss:$8 sps:$4 sm:$0xff]   ;;  %v9806_v50 = vld [vmem:[%s13009_s1 + $0xd80] ss:$8 sps:$4 sm:$0xff]  }
 0x329   :  { %6952 = vmatprep.subr.bf16.mxu0 %v9726_v51  ;;  %v9809_v51 = vld [vmem:[%s13009_s1 + $0x1b80] ss:$8 sps:$4 sm:$0xff]  }
 0x32b   :  { %6379 = vmatpush1.bf16.msra.mxu1 %v9721_v53  ;;  %v9814_v53 = vld [vmem:[%s13009_s1 + $0xd94] ss:$8 sps:$4 sm:$0xff]  }
 0x32c   :  { %6953 = vmatpush1.bf16.msra.mxu0 %v9724_v54  ;;  %6380 = vmatprep.subr.bf16.mxu1 %v9729_v37  ;;  %v9817_v54 = vld [vmem:[%s13009_s1 + $0x1b94] ss:$8 sps:$4 sm:$0xff]   ;;  %v9812_v37 = vld [vmem:[%s13009_s1 + $0xd90] ss:$8 sps:$4 sm:$0xff]  }
 0x32d   :  { %6954 = vmatprep.subr.bf16.mxu0 %v9732_v56  ;;  %v9815_v56 = vld [vmem:[%s13009_s1 + $0x1b90] ss:$8 sps:$4 sm:$0xff]  }
 0x32f   :  { %6381 = vmatpush1.bf16.msra.mxu1 %v9727_v57  ;;  %v9820_v57 = vld [vmem:[%s13009_s1 + $0xda4] ss:$8 sps:$4 sm:$0xff]  }
 0x330   :  { %6955 = vmatpush1.bf16.msra.mxu0 %v9730_v59  ;;  %6382 = vmatprep.subr.bf16.mxu1 %v9735_v45  ;;  %v9823_v59 = vld [vmem:[%s13009_s1 + $0x1ba4] ss:$8 sps:$4 sm:$0xff]   ;;  %v9818_v45 = vld [vmem:[%s13009_s1 + $0xda0] ss:$8 sps:$4 sm:$0xff]  }
 0x331   :  { %6956 = vmatprep.subr.bf16.mxu0 %v9738_v35  ;;  %v9821_v35 = vld [vmem:[%s13009_s1 + $0x1ba0] ss:$8 sps:$4 sm:$0xff]  }
 0x333   :  { %6383 = vmatpush1.bf16.msra.mxu1 %v9733_v22  ;;  %v9826_v22 = vld [vmem:[%s13009_s1 + $0xdb4] ss:$8 sps:$4 sm:$0xff]  }
 0x334   :  { %6957 = vmatpush1.bf16.msra.mxu0 %v9736_v39  ;;  %6384 = vmatprep.subr.bf16.mxu1 %v9741_v2  ;;  %v9829_v39 = vld [vmem:[%s13009_s1 + $0x1bb4] ss:$8 sps:$4 sm:$0xff]   ;;  %v9824_v2 = vld [vmem:[%s13009_s1 + $0xdb0] ss:$8 sps:$4 sm:$0xff]  }
 0x335   :  { %6958 = vmatprep.subr.bf16.mxu0 %v9744_v3  ;;  %v9827_v3 = vld [vmem:[%s13009_s1 + $0x1bb0] ss:$8 sps:$4 sm:$0xff]  }
 0x337   :  { %6385 = vmatpush1.bf16.msra.mxu1 %v9739_v58  ;;  %v9832_v58 = vld [vmem:[%s13009_s1 + $0xdc4] ss:$8 sps:$4 sm:$0xff]  }
 0x338   :  { %6959 = vmatpush1.bf16.msra.mxu0 %v9742_v38  ;;  %6386 = vmatprep.subr.bf16.mxu1 %v9747_v55  ;;  %v9835_v38 = vld [vmem:[%s13009_s1 + $0x1bc4] ss:$8 sps:$4 sm:$0xff]   ;;  %v9830_v55 = vld [vmem:[%s13009_s1 + $0xdc0] ss:$8 sps:$4 sm:$0xff]  }
 0x339   :  { %6960 = vmatprep.subr.bf16.mxu0 %v9750_v40  ;;  %v9833_v40 = vld [vmem:[%s13009_s1 + $0x1bc0] ss:$8 sps:$4 sm:$0xff]  }
 0x33b   :  { %6387 = vmatpush1.bf16.msra.mxu1 %v9745_v4  ;;  %v9838_v4 = vld [vmem:[%s13009_s1 + $0xdd4] ss:$8 sps:$4 sm:$0xff]  }
 0x33c   :  { %6961 = vmatpush1.bf16.msra.mxu0 %v9748_v5  ;;  %6388 = vmatprep.subr.bf16.mxu1 %v9753_v6  ;;  %v9841_v5 = vld [vmem:[%s13009_s1 + $0x1bd4] ss:$8 sps:$4 sm:$0xff]   ;;  %v9836_v6 = vld [vmem:[%s13009_s1 + $0xdd0] ss:$8 sps:$4 sm:$0xff]  }
 0x33d   :  { %6962 = vmatprep.subr.bf16.mxu0 %v9756_v7  ;;  %v9839_v7 = vld [vmem:[%s13009_s1 + $0x1bd0] ss:$8 sps:$4 sm:$0xff]  }
 0x33f   :  { %6389 = vmatpush1.bf16.msra.mxu1 %v9751_v8  ;;  %v9844_v8 = vld [vmem:[%s13009_s1 + $0xde4] ss:$8 sps:$4 sm:$0xff]  }
 0x340   :  { %6963 = vmatpush1.bf16.msra.mxu0 %v9754_v62  ;;  %6399 = vmatprep.subr.bf16.mxu1 %v9759_v10  ;;  %v9847_v62 = vld [vmem:[%s13009_s1 + $0x1be4] ss:$8 sps:$4 sm:$0xff]   ;;  %v9842_v10 = vld [vmem:[%s13009_s1 + $0xde0] ss:$8 sps:$4 sm:$0xff]  }
 0x341   :  { %6973 = vmatprep.subr.bf16.mxu0 %v9763_v60  ;;  %v9845_v60 = vld [vmem:[%s13009_s1 + $0x1be0] ss:$8 sps:$4 sm:$0xff]  }
 0x342   :  { %6391 = vmatmul.mubr.bf16.vlgmr.msra.gmra.mrb[0].mxu1 %v12702_v13 }
 0x343   :  { %6965 = vmatmul.mubr.bf16.vlgmr.msra.gmra.mrb[0].mxu0 %v12706_v16  ;;  %6400 = vmatpush1.bf16.msra.mxu1 %v9757_v19  ;;  %v9850_v19 = vld [vmem:[%s13009_s1 + $0xdf4] ss:$8 sps:$4 sm:$0xff]  }
 0x344   :  { %6974 = vmatpush1.bf16.msra.mxu0 %v9761_v1  ;;  %6401 = vmatprep.subr.bf16.mxu1 %v9766_v33  ;;  %v9853_v1 = vld [vmem:[%s13009_s1 + $0x1bf4] ss:$8 sps:$4 sm:$0xff]   ;;  %v9848_v33 = vld [vmem:[%s13009_s1 + $0xdf0] ss:$8 sps:$4 sm:$0xff]  }
 0x345   :  { %6975 = vmatprep.subr.bf16.mxu0 %v9769_v0  ;;  %6431 = vmatprep.mubr.bf16.mxu1 %v1132_v42  ;;  %v9851_v0 = vld [vmem:[%s13009_s1 + $0x1bf0] ss:$8 sps:$4 sm:$0xff]   ;;  %v9856_v42 = vld [vmem:[%s13009_s1 + $0x1c04] ss:$8 sps:$4 sm:$0xff]  }
 0x346   :  { %7005 = vmatprep.mubr.bf16.mxu0 %v1280_v20  ;;  %v9860_v20 = vld [vmem:[%s13011_s3 + $0x40] sm:$0xff]  }
 0x347   :  { %6402 = vmatpush1.bf16.msra.mxu1 %v9764_v23  ;;  %v1130_v23 = vcombine.high %v12702_v13, %v12702_v13  ;;  %v9862_v13 = vld [vmem:[%s13011_s3 + $0x48] sm:$0xff]  }
 0x348   :  { %6976 = vmatpush1.bf16.msra.mxu0 %v9767_v61  ;;  %6403 = vmatprep.subr.bf16.mxu1 %v9772_v63  ;;  %v1278_v61 = vcombine.high %v12706_v16, %v12706_v16  ;;  %v9854_v63 = vld [vmem:[%s13009_s1 + $0x1c00] ss:$8 sps:$4 sm:$0xff]   ;;  %v9857_v16 = vld [vmem:[%s13009_s1 + $0x1c10] ss:$8 sps:$4 sm:$0xff]  }
 0x349   :  { %6977 = vmatprep.subr.bf16.mxu0 %v9775_v9  ;;  %v9859_v9 = vld [vmem:[%s13009_s1 + $0x1c14] ss:$8 sps:$4 sm:$0xff]  }
 0x34b   :  { %6404 = vmatpush1.bf16.msra.mxu1 %v9770_v11  ;;  %v9861_v11 = vld [vmem:[%s13011_s3] sm:$0xff]  }
 0x34c   :  { %6978 = vmatpush1.bf16.msra.mxu0 %v9773_v24  ;;  %6405 = vmatprep.subr.bf16.mxu1 %v9778_v25  ;;  %v9896_v24 = vmov 0   ;;  %v9863_v25 = vld [vmem:[%s13011_s3 + $0x8] sm:$0xff]  }
 0x34d   :  { %6979 = vmatprep.subr.bf16.mxu0 %v9781_v26  ;;  %v9864_v26 = vld [vmem:[%s13011_s3 + $0x50] sm:$0xff]  }
 0x34f   :  { %6406 = vmatpush1.bf16.msra.mxu1 %v9776_v27  ;;  %v7411_v27 = vld.sshfl [vmem:[%s13010_s0 + $0x38] sm:$0x1 pattern:$0x75316420] }
 0x350   :  { %6980 = vmatpush1.bf16.msra.mxu0 %v9779_v28  ;;  %6407 = vmatprep.subr.bf16.mxu1 %v9784_v29  ;;  %v9865_v28 = vld [vmem:[%s13011_s3 + $0x10] sm:$0xff]   ;;  %v1294_v29 = vrot.slane %v7411_v27, %v10067_v49  ;;  %v9869_v49 = vld [vmem:[%s13011_s3 + $0x20] sm:$0xff]  }
 0x351   :  { %6981 = vmatprep.subr.bf16.mxu0 %v9787_v30  ;;  %v9866_v30 = vld [vmem:[%s13011_s3 + $0x58] sm:$0xff]  }
 0x352   :  { %v9880_v27 = vld [vmem:[%s13011_s3 + $0x9c] sm:$0xff]  }
 0x353   :  { %6408 = vmatpush1.bf16.msra.mxu1 %v9782_v31  ;;  %v9867_v31 = vld [vmem:[%s13011_s3 + $0x18] sm:$0xff]  }
 0x354   :  { %6982 = vmatpush1.bf16.msra.mxu0 %v9785_v14  ;;  %6409 = vmatprep.subr.bf16.mxu1 %v9790_v17  ;;  %v9868_v14 = vld [vmem:[%s13011_s3 + $0x60] sm:$0xff]   ;;  %v9870_v17 = vld [vmem:[%s13011_s3 + $0x68] sm:$0xff]  }
 0x355   :  { %6983 = vmatprep.subr.bf16.mxu0 %v9793_v34  ;;  %v9897_v34 = vmov 0.0  }
 0x357   :  { %6410 = vmatpush1.bf16.msra.mxu1 %v9788_v36  ;;  %v9872_v36 = vld [vmem:[%s13011_s3 + $0x80] sm:$0xff]  }
 0x358   :  { %6984 = vmatpush1.bf16.msra.mxu0 %v9791_v44  ;;  %6411 = vmatprep.subr.bf16.mxu1 %v9796_v21  ;;  %v9871_v44 = vld [vmem:[%s13011_s3 + $0x28] sm:$0xff]   ;;  %v9873_v21 = vld [vmem:[%s13011_s3 + $0x70] sm:$0xff]  }
 0x359   :  { %6985 = vmatprep.subr.bf16.mxu0 %v9799_v12  ;;  %v9874_v12 = vld [vmem:[%s13011_s3 + $0x30] sm:$0xff]  }
 0x35b   :  { %6412 = vmatpush1.bf16.msra.mxu1 %v9794_v52  ;;  %v9875_v52 = vld [vmem:[%s13011_s3 + $0x88] sm:$0xff]  }
 0x35c   :  { %6986 = vmatpush1.bf16.msra.mxu0 %v9797_v46  ;;  %6413 = vmatprep.subr.bf16.mxu1 %v9802_v47  ;;  %v9876_v46 = vld [vmem:[%s13011_s3 + $0x78] sm:$0xff]   ;;  %v9878_v47 = vld [vmem:[%s13011_s3 + $0x90] ss:$0 sps:$4 sm:$0xff]  }
 0x35d   :  { %6987 = vmatprep.subr.bf16.mxu0 %v9805_v15  ;;  %v9877_v15 = vld [vmem:[%s13011_s3 + $0x38] sm:$0xff]  }
 0x35f   :  { %6414 = vmatpush1.bf16.msra.mxu1 %v9800_v32  ;;  %v7119_v32 = vsel %vm7117_vm1, %v9878_v47, 0 }
 0x360   :  { %6988 = vmatpush1.bf16.msra.mxu0 %v9803_v48  ;;  %6415 = vmatprep.subr.bf16.mxu1 %v9808_v18  ;;  %v7057_v48 = vld [vmem:[%s13012_s4] sm:$0x1]  ;;  %s9900_s4 = smov 96  }
 0x361   :  { %6989 = vmatprep.subr.bf16.mxu0 %v9811_v41  ;;  %v7092_v18 = vpack.c.bf16 %v7057_v48, %v7057_v48 }
 0x363   :  { %6416 = vmatpush1.bf16.msra.mxu1 %v9806_v50 }
 0x364   :  { %6990 = vmatpush1.bf16.msra.mxu0 %v9809_v51  ;;  %6417 = vmatprep.subr.bf16.mxu1 %v9814_v53  ;;  %v5854_v53 = vsub.s32 0, %v10049_v43 }
 0x365   :  { %6991 = vmatprep.subr.bf16.mxu0 %v9817_v54 }
 0x367   :  { %6418 = vmatpush1.bf16.msra.mxu1 %v9812_v37  ;;  %v929_v37 = vld [vmem:[%s13013_s2] sm:$0x3]  ;;  %s9899_s2 = smov 64  }
 0x368   :  { %6992 = vmatpush1.bf16.msra.mxu0 %v9815_v56  ;;  %6419 = vmatprep.subr.bf16.mxu1 %v9820_v57  ;;  %v5858_v56 = vsub.s32 1, %v10049_v43  ;;  %v5855_v57 = vrot.slane %v929_v37, %v5854_v53 }
 0x369   :  { %6993 = vmatprep.subr.bf16.mxu0 %v9823_v59 }
 0x36a   :  { %v5859_v59 = vrot.slane %v929_v37, %v5858_v56 }
 0x36b   :  { %6420 = vmatpush1.bf16.msra.mxu1 %v9818_v45 }
 0x36c   :  { %6994 = vmatpush1.bf16.msra.mxu0 %v9821_v35  ;;  %6421 = vmatprep.subr.bf16.mxu1 %v9826_v22 }
 0x36d   :  { %6995 = vmatprep.subr.bf16.mxu0 %v9829_v39 }
 0x36f   :  { %6422 = vmatpush1.bf16.msra.mxu1 %v9824_v2 }
 0x370   :  { %6996 = vmatpush1.bf16.msra.mxu0 %v9827_v3  ;;  %6423 = vmatprep.subr.bf16.mxu1 %v9832_v58 }
 0x371   :  { %6997 = vmatprep.subr.bf16.mxu0 %v9835_v38 }
 0x373   :  { %6424 = vmatpush1.bf16.msra.mxu1 %v9830_v55 }
 0x374   :  { %6998 = vmatpush1.bf16.msra.mxu0 %v9833_v40  ;;  %6425 = vmatprep.subr.bf16.mxu1 %v9838_v4 }
 0x375   :  { %6999 = vmatprep.subr.bf16.mxu0 %v9841_v5 }
 0x377   :  { %6426 = vmatpush1.bf16.msra.mxu1 %v9836_v6 }
 0x378   :  { %7000 = vmatpush1.bf16.msra.mxu0 %v9839_v7  ;;  %6427 = vmatprep.subr.bf16.mxu1 %v9844_v8 }
 0x379   :  { %7001 = vmatprep.subr.bf16.mxu0 %v9847_v62 }
 0x37b   :  { %6428 = vmatpush1.bf16.msra.mxu1 %v9842_v10 }
 0x37c   :  { %7002 = vmatpush1.bf16.msra.mxu0 %v9845_v60  ;;  %6429 = vmatprep.subr.bf16.mxu1 %v9850_v19 }
 0x37d   :  { %7003 = vmatprep.subr.bf16.mxu0 %v9853_v1 }
 0x37f   :  { %6430 = vmatpush1.bf16.msra.mxu1 %v9848_v33 }
 0x380   :  { %7004 = vmatpush1.bf16.msra.mxu0 %v9851_v0  ;;  %8341 = vmatprep.subr.bf16.mxu1 %v9860_v20 }
 0x381   :  { %7014 = vmatprep.subr.bf16.mxu0 %v9856_v42  ;;  %v7308_v42 = vrot.slane %v7057_v48, %v5854_v53 }
 0x382   :  { %6432 = vmatmul.mubr.bf16.vlgmr.msra.gmra.mrb[0].mxu1 %v1130_v23 }
 0x383   :  { %7006 = vmatmul.mubr.bf16.vlgmr.msra.gmra.mrb[0].mxu0 %v1278_v61  ;;  %8342 = vmatpush3.bf16.msra.mxu1 %v9861_v11 }
 0x384   :  { %7015 = vmatpush1.bf16.msra.mxu0 %v9854_v63  ;;  %7046 = vmatprep.mubr.bf16.mxu0 %v9896_v24 }
 0x385   :  { %7016 = vmatprep.subr.bf16.mxu0 %v9859_v9  ;;  %8343 = vmatprep.subr.bf16.mxu1 %v9862_v13 }
 0x387   :  { %8344 = vmatpush3.bf16.msra.mxu1 %v9863_v25 }
 0x388   :  { %7017 = vmatpush1.bf16.msra.mxu0 %v9857_v16  ;;  %8345 = vmatprep.subr.bf16.mxu1 %v9864_v26  ;;  %v9879_v26 = vld [vmem:[%s13011_s3 + $0x94] sm:$0xff]  }
 0x389   :  { %8366 = vmatprep.subr.bf16.mxu0 %v9897_v34 }
 0x38b   :  { %8346 = vmatpush3.bf16.msra.mxu1 %v9865_v28 }
 0x38c   :  { %8347 = vmatprep.subr.bf16.mxu1 %v9866_v30 }
 0x38f   :  { %8312 = vmatmul.mubr.msk.bf16.vlgmr.msra.gmra.mrb[0].mxu0 %vm5862_vm0, %v1294_v29  ;;  %8348 = vmatpush3.bf16.msra.mxu1 %v9867_v31 }
 0x390   :  { %8349 = vmatprep.subr.bf16.mxu1 %v9868_v14  ;;  %8367 = vmatpush3.bf16.msra.mxu0 %v9872_v36 }
 0x391   :  { %8368 = vmatprep.subr.bf16.mxu0 %v9897_v34  ;;  %8372 = vmatprep.mubr.msk.bf16.mxu0 %vm9898_vm2, %v9897_v34 }
 0x393   :  { %8350 = vmatpush3.bf16.msra.mxu1 %v9869_v49  ;;  %v7334_v49 = vld [vmem:[%s13011_s3 + $0xa4] sm:$0x1] }
 0x394   :  { %8351 = vmatprep.subr.bf16.mxu1 %v9870_v17  ;;  %8369 = vmatpush3.bf16.msra.mxu0 %v9875_v52  ;;  %v7335_v17 = vunpack.c.l.bf16 %v7334_v49 }
 0x395   :  { %8370 = vmatprep.subr.bf16.mxu0 %v9897_v34 }
 0x397   :  { %8352 = vmatpush3.bf16.msra.mxu1 %v9871_v44 }
 0x398   :  { %8353 = vmatprep.subr.bf16.mxu1 %v9873_v21  ;;  %8371 = vmatpush3.bf16.msra.mxu0 %v7119_v32 }
 0x399   :  { %8376 = vmatprep.subr.bf16.mxu0 %v9897_v34 }
 0x39b   :  { %8354 = vmatpush3.bf16.msra.mxu1 %v9874_v12  ;;  %8373 = vmatmul.mubr.msk.bf16.vlgmr.msra.gmra.mrb[4].mxu0 %vm7113_vm3, %v7092_v18 }
 0x39c   :  { %8355 = vmatprep.subr.bf16.mxu1 %v9876_v46  ;;  %8380 = vmatprep.mubr.msk.bf16.mxu0 %vm9898_vm2, %v9897_v34 }
 0x39d   :  { %8377 = vmatpush3.bf16.msra.mxu0 %v9879_v26 }
 0x39e   :  { %8378 = vmatprep.subr.bf16.mxu0 %v9897_v34 }
 0x39f   :  { %8356 = vmatpush3.bf16.msra.mxu1 %v9877_v15 }
 0x3a1   :  { %8379 = vmatpush3.bf16.msra.mxu0 %v9880_v27 }
 0x455   :  { %v6433_v41 = vpop.f32.mrb[0].mxu1 }
 0x456   :  { %v6435_v50 = vpop.f32.mrb[1].mxu1  ;;  %v8384_v45 = vadd.f32 %v6433_v41, %v5855_v57 }
 0x457   :  { %v6437_v51 = vpop.f32.mrb[2].mxu1  ;;  %v8386_v35 = vadd.f32 %v6435_v50, %v5859_v59 }
 0x458   :  { %v6438_v54 = vpop.f32.mrb[3].mxu1 }
 0x462   :  { %v7048_v22 = vpop.f32.mrb[0].mxu0 }
 0x463   :  { %v8385_v39 = vadd.f32 %v8384_v45, %v7048_v22  ;;  %v7050_v2 = vpop.f32.mrb[1].mxu0 }
 0x464   :  { %v8387_v3 = vadd.f32 %v8386_v35, %v7050_v2  ;;  %v7052_v58 = vpop.f32.mrb[2].mxu0 }
 0x465   :  { %v7055_v38 = vmax.f32 %v8385_v39, 0.0  ;;  %v7053_v55 = vpop.f32.mrb[3].mxu0 }
 0x466   :  { %v7056_v40 = vmax.f32 %v8387_v3, 0.0 }
 0x467   :  { %v7058_v5 = vpack.c.bf16 %v7055_v38, %v7055_v38 }
 0x468   :  { %v7059_v4 = vpack.c.bf16 %v7056_v40, %v7056_v40 }
 0x46a   :  { %7289 = vmatprep.mubr.bf16.mxu1 %v7059_v4 }
 0x46b   :  { %7290 = vmatmul.mubr.bf16.vlgmr.msra.gmra.mrb[4].mxu1 %v7058_v5 }
 0x46e   :  { %v7155_v6 = vpop.f32.mrb[4].mxu0 }
 0x46f   :  { %v8374_v7 = vpop.f32.mrb[5].mxu0 }
 0x470   :  { %v7158_v8 = vpop.f32.mrb[6].mxu0 }
 0x471   :  { %v8375_v43 = vpop.f32.mrb[7].mxu0 }
 0x53e   :  { %v8357_v62 = vpop.f32.mrb[4].mxu1 }
 0x53f   :  { %v8358_v10 = vpop.f32.mrb[5].mxu1 }
 0x540   :  { %v8359_v60 = vadd.f32 %v8358_v10, %v8357_v62  ;;  %v8360_v19 = vpop.f32.mrb[6].mxu1 }
 0x541   :  { %v8361_v1 = vpop.f32.mrb[7].mxu1 }
 0x542   :  { %v7292_v33 = vadd.f32 %v8359_v60, %v7155_v6 }
 0x544   :  { %9881 = vtanh.f32 %v7292_v33  ;;  %v8333_v20 = vmul.f32 -1.442695, %v7292_v33 }
 0x546   :  { %9883 = vpow2.f32 %v8333_v20 }
 0x54e   :  { %v9882_v0 = vpop.eup %9881 }
 0x54f   :  { %7314 = vrot.lane.b32.xlu0 %v9882_v0, %s9899_s2 }
 0x550   :  { %v9884_v23 = vpop.eup %9883 }
 0x551   :  { %v7300_v61 = vadd.f32 1.0, %v9884_v23 }
 0x553   :  { %7309 = vrot.lane.b32.xlu0 %v7308_v42, %s9900_s4  ;;  %9885 = vrcp.f32 %v7300_v61 }
 0x55d   :  { %v9886_v63 = vpop.eup %9885 }
 0x5c1   :  { %v7315_v9 = vpop.permute.xlu0 %7314 }
 0x5c2   :  { %v7317_v11 = vmul.f32 %v9886_v63, %v7315_v9 }
 0x5c4   :  { %7319 = vrot.lane.b32.xlu1 %v7317_v11, %s9901_s29 }
 0x5c5   :  { %v7310_v13 = vpop.permute.xlu0 %7309 }
 0x5c6   :  { %v7312_v16 = vmul.f32 %v9886_v63, %v7310_v13 }
 0x636   :  { %v7320_v24 = vpop.permute.xlu1 %7319 }
 0x637   :  { %v7322_v25 = vadd.f32 %v7320_v24, %v7312_v16 }
 0x639   :  { %9887 = vtanh.f32 %v7322_v25 }
 0x643   :  { %v9888_v28 = vpop.eup %9887 }
 0x644   :  { %7325 = vrot.lane.b32.xlu1 %v9888_v28, %s9899_s2 }
 0x6b6   :  { %v7326_v29 = vpop.permute.xlu1 %7325 }
 0x6b7   :  { %v7328_v30 = vmul.f32 %v9886_v63, %v7326_v29 }
 0x6b9   :  { %v7329_v31 = vpack.c.bf16 %v7328_v30, %v7328_v30  ;;  %7395 = vrot.lane.b32.xlu1 %v7328_v30, %s9900_s4 }
 0x6bb   :  { %7337 = vrot.lane.b32.xlu0 %v7329_v31, %s9901_s29 }
 0x6bf   :  { %7399 = vrot.lane.b32.xlu0 %v7322_v25, %s9899_s2 }
 0x72b   :  { %v7396_v21 = vpop.permute.xlu1 %7395 }
 0x72d   :  { %v7338_v14 = vpop.permute.xlu0 %7337 }
 0x72e   :  { %8381 = vmatmul.mubr.msk.bf16.vlgmr.msra.gmra.mrb[8].mxu0 %vm5862_vm0, %v7338_v14 }
 0x731   :  { %v7400_v52 = vpop.permute.xlu0 %7399 }
 0x801   :  { %v7388_v34 = vpop.f32.mrb[8].mxu0 }
 0x802   :  { %v7389_v36 = vadd.f32 %v7388_v34, %v7335_v17  ;;  %v8382_v44 = vpop.f32.mrb[9].mxu0 }
 0x803   :  { %v7391_v12 = vpop.f32.mrb[10].mxu0 }
 0x804   :  { %v7403_v46 = vsel %vm7402_vm4, %v7389_v36, %v7396_v21  ;;  %v8383_v47 = vpop.f32.mrb[11].mxu0 }
 0x805   :  { %v7405_v15 = vsel %vm7404_vm5, %v7403_v46, %v7400_v52 }
 0x806   :  { %7406 = vst [vmem:[%s13014_s5] sm:$0x1] %v7405_v15 }

</bundles_post_ra>
